<compile_context>
chip_gen: v6e
topology: v6e:2x2x1
jax: 0.10.0
libtpu: 0.0.40
codegen_flags: <defaults>
</compile_context>

<pallas_src>
import numpy as np
import jax
import jax.numpy as jnp
from jax.experimental import pallas as pl
from jax.experimental.pallas import tpu as pltpu

# ---- "config" (the torch module reads these from a global config) ----
VOCAB   = 64          # vocab_size
EMBED   = 32          # config.embed_size
HID     = 32          # config.hidden_size_decoder
ENC_HID = 16          # config.hidden_size_encoder
BIDIR   = True        # config.bidirectional_encoder
CTX     = ENC_HID * (2 if BIDIR else 1)   # context_size (== HID, required for bmm w/o projection)
NLAYERS = 2           # config.num_layers_decoder
IN0     = EMBED + CTX           # input size of LSTM layer 0
FINAL_IN = HID + CTX            # output_layer input (has_output_layer == True since != EMBED)
NEG_INF = -1e9
# TODO(synk): nn.Dropout / lstm.sample_masks (dropout_layers, dropout_lstm_states) are
# identity here (eval mode); residual=False; greedy/beam search not implemented.


# ----------------------------------------------------------------------------
# Single fused kernel.
#   prologue : batched one-hot embedding of the T-1 input tokens (one matmul)
#   loop     : T-1 recurrent steps (2 fused-gate LSTM cells + attention),
#              stashing h1 / context into VMEM scratch
#   epilogue : output layer + vocab logits + summed cross-entropy (batched)
# Only a (1,1) loss is written out.
# ----------------------------------------------------------------------------
def _decoder_fused_kernel(tok_ref,                      # (T*B, 1) int32, time-major
                          h0_ref,                       # (NLAYERS, B, HID)
                          enc_ref,                      # (B, S, CTX)
                          mask_ref,                     # (B, S) additive mask
                          emb_ref,                      # (VOCAB, EMBED)
                          wx0_ref, wc0_ref, wh0_ref, b0_ref,   # layer-0 fused-gate weights
                          wi1_ref, wh1_ref, b1_ref,            # layer-1 fused-gate weights
                          wod_ref, woc_ref, bo_ref,            # output layer (split dec / ctx)
                          embT_ref,                     # (EMBED, VOCAB)
                          loss_ref,                     # (1, 1) output
                          xemb_ref,                     # scratch ((T-1)*B, EMBED)
                          dec_ref,                      # scratch ((T-1)*B, HID)
                          ctx_ref):                     # scratch ((T-1)*B, CTX)
    TB = tok_ref.shape[0]
    B = enc_ref.shape[0]
    T = TB // B
    V = emb_ref.shape[0]
    H = HID
    N = (T - 1) * B                                      # rows contributing to the loss

    # ---- hoisted loads (unrolled loop would otherwise re-issue them) ----
    enc  = enc_ref[...]                                  # (B, S, CTX)
    mask = mask_ref[...]                                 # (B, S)
    emb  = emb_ref[...]
    embT = embT_ref[...]
    wx0 = wx0_ref[...]; wc0 = wc0_ref[...]; wh0 = wh0_ref[...]
    wi1 = wi1_ref[...]; wh1 = wh1_ref[...]
    b0 = jnp.broadcast_to(b0_ref[...], (B, 4 * H))       # pre-broadcast biases (no CSE in loop)
    b1 = jnp.broadcast_to(b1_ref[...], (B, 4 * H))
    wod = wod_ref[...]; woc = woc_ref[...]; bo = bo_ref[...]
    tok = tok_ref[...]                                   # (T*B, 1) int32

    def dot(a, b):
        return jnp.dot(a, b, preferred_element_type=jnp.float32)

    # ---- prologue: embed the T-1 input tokens with ONE one-hot MXU matmul ----
    iota_nv = jax.lax.broadcasted_iota(jnp.int32, (N, V), 1)
    onehot_in = (iota_nv == tok[:N]).astype(jnp.float32)          # (N, V)
    xemb_ref[...] = dot(onehot_in, emb)                           # (N, EMBED)

    # ---- recurrence: 5 MXU dots + 2 full-lane sigmoid + 2 full-lane tanh per step ----
    def step(t, carry):
        h0, c0, h1, c1, pctx = carry
        r = pl.multiple_of(t * B, B)
        x = xemb_ref[pl.ds(r, B), :]                              # (B, EMBED)

        # layer 0: fused 128-lane gate pre-activation
        g0 = dot(x, wx0) + dot(pctx, wc0) + dot(h0, wh0) + b0     # (B, 4H)
        s0 = jax.nn.sigmoid(g0)
        t0 = jnp.tanh(g0)
        c0n = s0[:, H:2 * H] * c0 + s0[:, :H] * t0[:, 2 * H:3 * H]
        h0n = s0[:, 3 * H:] * jnp.tanh(c0n)

        # layer 1
        g1 = dot(h0n, wi1) + dot(h1, wh1) + b1                    # (B, 4H)
        s1 = jax.nn.sigmoid(g1)
        t1 = jnp.tanh(g1)
        c1n = s1[:, H:2 * H] * c1 + s1[:, :H] * t1[:, 2 * H:3 * H]
        h1n = s1[:, 3 * H:] * jnp.tanh(c1n)

        # dot-product attention over encoder outputs (VPU/XLU path; S,B tiny)
        att = jnp.sum(enc * h1n[:, None, :], axis=2) + mask       # (B, S)
        att = att - jnp.max(att, axis=1, keepdims=True)
        p = jnp.exp(att)
        p = p * pl.reciprocal(jnp.sum(p, axis=1, keepdims=True), approx=True)
        cvec = jnp.sum(enc * p[:, :, None], axis=1)                # (B, CTX)

        # stash for the batched epilogue (stays in VMEM)
        dec_ref[pl.ds(r, B), :] = h1n
        ctx_ref[pl.ds(r, B), :] = cvec
        return (h0n, c0n, h1n, c1n, cvec)

    # get_init_state: h = encoder_state, c = 0 ; init_context = 0
    init = (h0_ref[0], jnp.zeros((B, H), jnp.float32),
            h0_ref[1], jnp.zeros((B, H), jnp.float32),
            jnp.zeros((B, CTX), jnp.float32))
    # Only the first T-1 steps contribute to the loss (the original code runs
    # T steps and discards the last step's output in the piling).
    jax.lax.fori_loop(0, T - 1, step, init,
                      unroll=True if T - 1 <= 16 else 8)

    # ---- epilogue: output layer + logits + summed cross-entropy, batched over N rows ----
    hs = jnp.tanh(dot(dec_ref[...], wod) + dot(ctx_ref[...], woc) + bo)   # (N, EMBED)
    logits = dot(hs, embT)                                                # (N, V)
    m = jnp.max(logits, axis=1, keepdims=True)
    lse = m + jnp.log(jnp.sum(jnp.exp(logits - m), axis=1, keepdims=True))  # (N, 1)
    lab_onehot = (iota_nv == tok[B:]).astype(jnp.float32)                 # labels = next token
    picked = jnp.sum(lab_onehot * logits, axis=1, keepdims=True)          # (N, 1)
    loss_ref[...] = jnp.sum(lse - picked, keepdims=True)                  # (1, 1)


# ----------------------------------------------------------------------------
# Host-side parameter re-layout (once, outside the kernel):
#   - gate weights kept fused along the lane axis: (IN, 4*HID) matmul layout
#     (lane order i|f|g|o, matching torch's row order after transpose)
#   - output layer split into dec / ctx blocks, transposed
#   - embedding transposed for logits
# ----------------------------------------------------------------------------
def _prep_params(params):
    wih0_t = params["w_ih0"].T                    # (IN0, 4H)
    return dict(
        wx0=wih0_t[:EMBED, :],                    # (EMBED, 4H)
        wc0=wih0_t[EMBED:, :],                    # (CTX, 4H)
        wh0=params["w_hh0"].T,                    # (HID, 4H)
        b0=params["b0"],                          # (1, 4H)
        wi1=params["w_ih1"].T,                    # (HID, 4H)
        wh1=params["w_hh1"].T,                    # (HID, 4H)
        b1=params["b1"],                          # (1, 4H)
        wod=params["w_out"][:, :HID].T,           # (HID, EMBED)
        woc=params["w_out"][:, HID:].T,           # (CTX, EMBED)
        bo=params["b_out"],                       # (1, EMBED)
        emb=params["emb"],                        # (VOCAB, EMBED)
        embT=params["emb"].T,                     # (EMBED, VOCAB)
    )


# ----------------------------------------------------------------------------
# Decoder.forward wrapper
# ----------------------------------------------------------------------------
def decoder_forward_pallas(params, enc_out, lens_enc, encoder_state, tokens):
    # TODO(synk): ragged target lengths are not handled; all target sequences
    # are assumed to have length T (matches the synthetic test below).
    # TODO(synk): matmul operands kept f32 (bf16-cast pass skipped to preserve
    # tight parity with the reference through the T-step recurrence).
    B, T = tokens.shape
    S = enc_out.shape[1]
    p = _prep_params(params)

    pos = jnp.arange(S)[None, :]
    mask_add = jnp.where(pos < lens_enc[:, None], 0.0, NEG_INF).astype(jnp.float32)   # (B, S)
    tok_flat = jnp.transpose(tokens, (1, 0)).reshape(T * B, 1).astype(jnp.int32)      # time-major

    vmem = pl.BlockSpec(memory_space=pltpu.MemorySpace.VMEM)
    loss = pl.pallas_call(
        _decoder_fused_kernel,
        out_shape=jax.ShapeDtypeStruct((1, 1), jnp.float32),
        in_specs=[vmem] * 16,
        out_specs=vmem,
        scratch_shapes=[
            pltpu.VMEM(((T - 1) * B, EMBED), jnp.float32),   # precomputed input embeddings
            pltpu.VMEM(((T - 1) * B, HID), jnp.float32),     # per-step decoder states
            pltpu.VMEM(((T - 1) * B, CTX), jnp.float32),     # per-step attention contexts
        ],
    )(tok_flat, encoder_state, enc_out, mask_add, p["emb"],
      p["wx0"], p["wc0"], p["wh0"], p["b0"],
      p["wi1"], p["wh1"], p["b1"],
      p["wod"], p["woc"], p["bo"], p["embT"])
    return loss[0, 0]


# ----------------------------------------------------------------------------
# pure-JAX reference (mirrors the torch forward, eval mode)
# ----------------------------------------------------------------------------
def decoder_forward_ref(params, enc_out, lens_enc, encoder_state, tokens):
    B, T = tokens.shape
    S = enc_out.shape[1]
    emb_seq = jnp.transpose(params["emb"][tokens], (1, 0, 2))
    pos = jnp.arange(S)[None, :]
    mask_add = jnp.where(pos < lens_enc[:, None], 0.0, NEG_INF).astype(jnp.float32)

    def cell(xin, hp, cp, wih, whh, b):
        g = xin @ wih.T + hp @ whh.T + b
        i = jax.nn.sigmoid(g[:, :HID]); f = jax.nn.sigmoid(g[:, HID:2 * HID])
        gg = jnp.tanh(g[:, 2 * HID:3 * HID]); o = jax.nn.sigmoid(g[:, 3 * HID:])
        cn = f * cp + i * gg
        return o * jnp.tanh(cn), cn

    h = encoder_state
    c = jnp.zeros_like(encoder_state)
    pctx = jnp.zeros((B, CTX), jnp.float32)
    decs, ctxs = [], []
    for t in range(T):
        inp = jnp.concatenate([emb_seq[t], pctx], axis=1)
        h0n, c0n = cell(inp, h[0], c[0], params["w_ih0"], params["w_hh0"], params["b0"])
        h1n, c1n = cell(h0n, h[1], c[1], params["w_ih1"], params["w_hh1"], params["b1"])
        h = jnp.stack([h0n, h1n]); c = jnp.stack([c0n, c1n])
        att = jnp.einsum('bsh,bh->bs', enc_out, h1n) + mask_add
        p = jax.nn.softmax(att, axis=1)
        ctxv = jnp.einsum('bs,bsh->bh', p, enc_out)
        pctx = ctxv
        decs.append(h1n); ctxs.append(ctxv)
    dec = jnp.stack(decs); ctx = jnp.stack(ctxs)
    piled_dec = jnp.transpose(dec[:T - 1], (1, 0, 2)).reshape(-1, HID)
    piled_ctx = jnp.transpose(ctx[:T - 1], (1, 0, 2)).reshape(-1, CTX)
    hout = jnp.tanh(jnp.concatenate([piled_dec, piled_ctx], axis=1) @ params["w_out"].T
                    + params["b_out"])
    logits = hout @ params["emb"].T
    labels = tokens[:, 1:].reshape(-1)
    logp = jax.nn.log_softmax(logits, axis=1)
    return -jnp.sum(logp[jnp.arange(labels.shape[0]), labels])


if __name__ == "__main__":
    B, T, S = 2, 8, 8
    key = jax.random.PRNGKey(0)
    ks = jax.random.split(key, 16)
    nrm = lambda k, shp: 0.1 * jax.random.normal(k, shp, dtype=jnp.float32)
    params = {
        "emb":   nrm(ks[0], (VOCAB, EMBED)),
        "w_ih0": nrm(ks[1], (4 * HID, IN0)),
        "w_hh0": nrm(ks[2], (4 * HID, HID)),
        "b0":    nrm(ks[3], (1, 4 * HID)),      # b_ih + b_hh folded
        "w_ih1": nrm(ks[4], (4 * HID, HID)),
        "w_hh1": nrm(ks[5], (4 * HID, HID)),
        "b1":    nrm(ks[6], (1, 4 * HID)),
        "w_out": nrm(ks[7], (EMBED, FINAL_IN)),
        "b_out": nrm(ks[8], (1, EMBED)),
    }
    tokens = jax.random.randint(ks[9], (B, T), 0, VOCAB, dtype=jnp.int32)
    enc_out = jax.random.normal(ks[10], (B, S, CTX), dtype=jnp.float32)    # padded encoder outputs
    enc_state = 0.1 * jax.random.normal(ks[11], (NLAYERS, B, HID), dtype=jnp.float32)
    lens_enc = jnp.array([S, S - 2], dtype=jnp.int32)                      # ragged source lengths

    loss = decoder_forward_pallas(params, enc_out, lens_enc, enc_state, tokens)
    loss = jax.block_until_ready(loss)
    loss_ref = decoder_forward_ref(params, enc_out, lens_enc, enc_state, tokens)
    np.testing.assert_allclose(np.asarray(loss), np.asarray(loss_ref), rtol=2e-2, atol=2e-2)
    print("KERNEL_OK")
</pallas_src>

<mosaic_0001>
module attributes {stable_mosaic.version = 11 : i64} {
  func.func @_decoder_fused_kernel(%arg0: memref<16x1xi32, #tpu.memory_space<vmem>>, %arg1: memref<2x2x32xf32, #tpu.memory_space<vmem>>, %arg2: memref<2x8x32xf32, #tpu.memory_space<vmem>>, %arg3: memref<2x8xf32, #tpu.memory_space<vmem>>, %arg4: memref<64x32xf32, #tpu.memory_space<vmem>>, %arg5: memref<32x128xf32, #tpu.memory_space<vmem>>, %arg6: memref<32x128xf32, #tpu.memory_space<vmem>>, %arg7: memref<32x128xf32, #tpu.memory_space<vmem>>, %arg8: memref<1x128xf32, #tpu.memory_space<vmem>>, %arg9: memref<32x128xf32, #tpu.memory_space<vmem>>, %arg10: memref<32x128xf32, #tpu.memory_space<vmem>>, %arg11: memref<1x128xf32, #tpu.memory_space<vmem>>, %arg12: memref<32x32xf32, #tpu.memory_space<vmem>>, %arg13: memref<32x32xf32, #tpu.memory_space<vmem>>, %arg14: memref<1x32xf32, #tpu.memory_space<vmem>>, %arg15: memref<32x64xf32, #tpu.memory_space<vmem>>, %arg16: memref<1x1xf32, #tpu.memory_space<vmem>>, %arg17: memref<14x32xf32, #tpu.memory_space<vmem>>, %arg18: memref<14x32xf32, #tpu.memory_space<vmem>>, %arg19: memref<14x32xf32, #tpu.memory_space<vmem>>) attributes {dimension_semantics = [], scalar_prefetch = 0 : i64, scratch_operands = 3 : i64, tpu.core_type = #tpu.core_type<tc>} {
    %c0 = arith.constant 0 : index
    %c0_0 = arith.constant 0 : index
    %c0_1 = arith.constant 0 : index
    %0 = vector.load %arg2[%c0, %c0_0, %c0_1] : memref<2x8x32xf32, #tpu.memory_space<vmem>>, vector<2x8x32xf32>
    %c0_2 = arith.constant 0 : index
    %c0_3 = arith.constant 0 : index
    %1 = vector.load %arg3[%c0_2, %c0_3] : memref<2x8xf32, #tpu.memory_space<vmem>>, vector<2x8xf32>
    %c0_4 = arith.constant 0 : index
    %c0_5 = arith.constant 0 : index
    %2 = vector.load %arg4[%c0_4, %c0_5] : memref<64x32xf32, #tpu.memory_space<vmem>>, vector<64x32xf32>
    %c0_6 = arith.constant 0 : index
    %c0_7 = arith.constant 0 : index
    %3 = vector.load %arg15[%c0_6, %c0_7] : memref<32x64xf32, #tpu.memory_space<vmem>>, vector<32x64xf32>
    %c0_8 = arith.constant 0 : index
    %c0_9 = arith.constant 0 : index
    %4 = vector.load %arg5[%c0_8, %c0_9] : memref<32x128xf32, #tpu.memory_space<vmem>>, vector<32x128xf32>
    %c0_10 = arith.constant 0 : index
    %c0_11 = arith.constant 0 : index
    %5 = vector.load %arg6[%c0_10, %c0_11] : memref<32x128xf32, #tpu.memory_space<vmem>>, vector<32x128xf32>
    %c0_12 = arith.constant 0 : index
    %c0_13 = arith.constant 0 : index
    %6 = vector.load %arg7[%c0_12, %c0_13] : memref<32x128xf32, #tpu.memory_space<vmem>>, vector<32x128xf32>
    %c0_14 = arith.constant 0 : index
    %c0_15 = arith.constant 0 : index
    %7 = vector.load %arg9[%c0_14, %c0_15] : memref<32x128xf32, #tpu.memory_space<vmem>>, vector<32x128xf32>
    %c0_16 = arith.constant 0 : index
    %c0_17 = arith.constant 0 : index
    %8 = vector.load %arg10[%c0_16, %c0_17] : memref<32x128xf32, #tpu.memory_space<vmem>>, vector<32x128xf32>
    %c0_18 = arith.constant 0 : index
    %c0_19 = arith.constant 0 : index
    %9 = vector.load %arg8[%c0_18, %c0_19] : memref<1x128xf32, #tpu.memory_space<vmem>>, vector<1x128xf32>
    %10 = vector.shape_cast %9 : vector<1x128xf32> to vector<1x128xf32>
    %11 = vector.broadcast %10 : vector<1x128xf32> to vector<2x128xf32>
    %c0_20 = arith.constant 0 : index
    %c0_21 = arith.constant 0 : index
    %12 = vector.load %arg11[%c0_20, %c0_21] : memref<1x128xf32, #tpu.memory_space<vmem>>, vector<1x128xf32>
    %13 = vector.shape_cast %12 : vector<1x128xf32> to vector<1x128xf32>
    %14 = vector.broadcast %13 : vector<1x128xf32> to vector<2x128xf32>
    %c0_22 = arith.constant 0 : index
    %c0_23 = arith.constant 0 : index
    %15 = vector.load %arg12[%c0_22, %c0_23] : memref<32x32xf32, #tpu.memory_space<vmem>>, vector<32x32xf32>
    %c0_24 = arith.constant 0 : index
    %c0_25 = arith.constant 0 : index
    %16 = vector.load %arg13[%c0_24, %c0_25] : memref<32x32xf32, #tpu.memory_space<vmem>>, vector<32x32xf32>
    %c0_26 = arith.constant 0 : index
    %c0_27 = arith.constant 0 : index
    %17 = vector.load %arg14[%c0_26, %c0_27] : memref<1x32xf32, #tpu.memory_space<vmem>>, vector<1x32xf32>
    %c0_28 = arith.constant 0 : index
    %c0_29 = arith.constant 0 : index
    %18 = vector.load %arg0[%c0_28, %c0_29] : memref<16x1xi32, #tpu.memory_space<vmem>>, vector<16x1xi32>
    %19 = tpu.iota {dimensions = array<i32: 1>} : vector<14x64xi32>
    %20 = vector.extract_strided_slice %18 {offsets = [0, 0], sizes = [14, 1], strides = [1, 1]} : vector<16x1xi32> to vector<14x1xi32>
    %21 = vector.broadcast %20 : vector<14x1xi32> to vector<14x64xi32>
    %22 = arith.cmpi eq, %19, %21 : vector<14x64xi32>
    %23 = arith.extui %22 : vector<14x64xi1> to vector<14x64xi32>
    %24 = arith.sitofp %23 : vector<14x64xi32> to vector<14x64xf32>
    %cst = arith.constant dense<0.000000e+00> : vector<14x32xf32>
    %25 = tpu.matmul %24, %2, %cst {dimension_numbers = #tpu.dot_dimension_numbers<[1], [0], [0], [1], [0, 0, 1, 1], [], []>} : vector<14x64xf32>, vector<64x32xf32>, vector<14x32xf32> -> vector<14x32xf32>
    %c0_30 = arith.constant 0 : index
    %c0_31 = arith.constant 0 : index
    %26 = vector.load %arg17[%c0_30, %c0_31] : memref<14x32xf32, #tpu.memory_space<vmem>>, vector<14x32xf32>
    tpu.vector_store %arg17[%c0_30, %c0_31], %25 {strides = array<i32>} : memref<14x32xf32, #tpu.memory_space<vmem>>, vector<14x32xf32>,
    %c0_32 = arith.constant 0 : index
    %c0_33 = arith.constant 0 : index
    %c0_34 = arith.constant 0 : index
    %27 = vector.load %arg1[%c0_32, %c0_33, %c0_34] : memref<2x2x32xf32, #tpu.memory_space<vmem>>, vector<1x2x32xf32>
    %28 = vector.shape_cast %27 : vector<1x2x32xf32> to vector<2x32xf32>
    %cst_35 = arith.constant 0.000000e+00 : f32
    %29 = vector.broadcast %cst_35 : f32 to vector<2x32xf32>
    %c1 = arith.constant 1 : index
    %c0_36 = arith.constant 0 : index
    %c0_37 = arith.constant 0 : index
    %30 = vector.load %arg1[%c1, %c0_36, %c0_37] : memref<2x2x32xf32, #tpu.memory_space<vmem>>, vector<1x2x32xf32>
    %31 = vector.shape_cast %30 : vector<1x2x32xf32> to vector<2x32xf32>
    %cst_38 = arith.constant 0.000000e+00 : f32
    %32 = vector.broadcast %cst_38 : f32 to vector<2x32xf32>
    %cst_39 = arith.constant 0.000000e+00 : f32
    %33 = vector.broadcast %cst_39 : f32 to vector<2x32xf32>
    %c0_i32 = arith.constant 0 : i32
    %c2_i32 = arith.constant 2 : i32
    %34 = arith.muli %c0_i32, %c2_i32 : i32
    %35 = tpu.assume_multiple %34, 2 : i32
    %36 = arith.index_cast %35 : i32 to index
    %c0_40 = arith.constant 0 : index
    %37 = vector.load %arg17[%36, %c0_40] : memref<14x32xf32, #tpu.memory_space<vmem>>, vector<2x32xf32>
    %cst_41 = arith.constant dense<0.000000e+00> : vector<2x128xf32>
    %38 = tpu.matmul %37, %4, %cst_41 {dimension_numbers = #tpu.dot_dimension_numbers<[1], [0], [0], [1], [0, 0, 1, 1], [], []>} : vector<2x32xf32>, vector<32x128xf32>, vector<2x128xf32> -> vector<2x128xf32>
    %cst_42 = arith.constant dense<0.000000e+00> : vector<2x128xf32>
    %39 = tpu.matmul %33, %5, %cst_42 {dimension_numbers = #tpu.dot_dimension_numbers<[1], [0], [0], [1], [0, 0, 1, 1], [], []>} : vector<2x32xf32>, vector<32x128xf32>, vector<2x128xf32> -> vector<2x128xf32>
    %40 = arith.addf %38, %39 : vector<2x128xf32>
    %cst_43 = arith.constant dense<0.000000e+00> : vector<2x128xf32>
    %41 = tpu.matmul %28, %6, %cst_43 {dimension_numbers = #tpu.dot_dimension_numbers<[1], [0], [0], [1], [0, 0, 1, 1], [], []>} : vector<2x32xf32>, vector<32x128xf32>, vector<2x128xf32> -> vector<2x128xf32>
    %42 = arith.addf %40, %41 : vector<2x128xf32>
    %43 = arith.addf %42, %11 : vector<2x128xf32>
    %44 = arith.negf %43 : vector<2x128xf32>
    %45 = math.exp %44 : vector<2x128xf32>
    %cst_44 = arith.constant 1.000000e+00 : f32
    %46 = vector.broadcast %cst_44 : f32 to vector<2x128xf32>
    %47 = arith.addf %46, %45 : vector<2x128xf32>
    %48 = arith.divf %46, %47 : vector<2x128xf32>
    %49 = math.tanh %43 : vector<2x128xf32>
    %50 = vector.extract_strided_slice %48 {offsets = [0, 32], sizes = [2, 32], strides = [1, 1]} : vector<2x128xf32> to vector<2x32xf32>
    %51 = arith.mulf %50, %29 : vector<2x32xf32>
    %52 = vector.extract_strided_slice %48 {offsets = [0, 0], sizes = [2, 32], strides = [1, 1]} : vector<2x128xf32> to vector<2x32xf32>
    %53 = vector.extract_strided_slice %49 {offsets = [0, 64], sizes = [2, 32], strides = [1, 1]} : vector<2x128xf32> to vector<2x32xf32>
    %54 = arith.mulf %52, %53 : vector<2x32xf32>
    %55 = arith.addf %51, %54 : vector<2x32xf32>
    %56 = vector.extract_strided_slice %48 {offsets = [0, 96], sizes = [2, 32], strides = [1, 1]} : vector<2x128xf32> to vector<2x32xf32>
    %57 = math.tanh %55 : vector<2x32xf32>
    %58 = arith.mulf %56, %57 : vector<2x32xf32>
    %cst_45 = arith.constant dense<0.000000e+00> : vector<2x128xf32>
    %59 = tpu.matmul %58, %7, %cst_45 {dimension_numbers = #tpu.dot_dimension_numbers<[1], [0], [0], [1], [0, 0, 1, 1], [], []>} : vector<2x32xf32>, vector<32x128xf32>, vector<2x128xf32> -> vector<2x128xf32>
    %cst_46 = arith.constant dense<0.000000e+00> : vector<2x128xf32>
    %60 = tpu.matmul %31, %8, %cst_46 {dimension_numbers = #tpu.dot_dimension_numbers<[1], [0], [0], [1], [0, 0, 1, 1], [], []>} : vector<2x32xf32>, vector<32x128xf32>, vector<2x128xf32> -> vector<2x128xf32>
    %61 = arith.addf %59, %60 : vector<2x128xf32>
    %62 = arith.addf %61, %14 : vector<2x128xf32>
    %63 = arith.negf %62 : vector<2x128xf32>
    %64 = math.exp %63 : vector<2x128xf32>
    %cst_47 = arith.constant 1.000000e+00 : f32
    %65 = vector.broadcast %cst_47 : f32 to vector<2x128xf32>
    %66 = arith.addf %65, %64 : vector<2x128xf32>
    %67 = arith.divf %65, %66 : vector<2x128xf32>
    %68 = math.tanh %62 : vector<2x128xf32>
    %69 = vector.extract_strided_slice %67 {offsets = [0, 32], sizes = [2, 32], strides = [1, 1]} : vector<2x128xf32> to vector<2x32xf32>
    %70 = arith.mulf %69, %32 : vector<2x32xf32>
    %71 = vector.extract_strided_slice %67 {offsets = [0, 0], sizes = [2, 32], strides = [1, 1]} : vector<2x128xf32> to vector<2x32xf32>
    %72 = vector.extract_strided_slice %68 {offsets = [0, 64], sizes = [2, 32], strides = [1, 1]} : vector<2x128xf32> to vector<2x32xf32>
    %73 = arith.mulf %71, %72 : vector<2x32xf32>
    %74 = arith.addf %70, %73 : vector<2x32xf32>
    %75 = vector.extract_strided_slice %67 {offsets = [0, 96], sizes = [2, 32], strides = [1, 1]} : vector<2x128xf32> to vector<2x32xf32>
    %76 = math.tanh %74 : vector<2x32xf32>
    %77 = arith.mulf %75, %76 : vector<2x32xf32>
    %78 = vector.shape_cast %77 : vector<2x32xf32> to vector<2x1x32xf32>
    %79 = vector.broadcast %78 : vector<2x1x32xf32> to vector<2x8x32xf32>
    %80 = arith.mulf %0, %79 : vector<2x8x32xf32>
    %cst_48 = arith.constant dense<0.000000e+00> : vector<2x8xf32>
    %81 = vector.multi_reduction <add>, %80, %cst_48 [2] : vector<2x8x32xf32> to vector<2x8xf32>
    %82 = arith.addf %81, %1 : vector<2x8xf32>
    %cst_49 = arith.constant dense<0xFF800000> : vector<2xf32>
    %83 = vector.multi_reduction <maximumf>, %82, %cst_49 [1] : vector<2x8xf32> to vector<2xf32>
    %84 = vector.shape_cast %83 : vector<2xf32> to vector<2x1xf32>
    %85 = vector.broadcast %84 : vector<2x1xf32> to vector<2x8xf32>
    %86 = arith.subf %82, %85 : vector<2x8xf32>
    %87 = math.exp %86 : vector<2x8xf32>
    %cst_50 = arith.constant dense<0.000000e+00> : vector<2xf32>
    %88 = vector.multi_reduction <add>, %87, %cst_50 [1] : vector<2x8xf32> to vector<2xf32>
    %89 = vector.shape_cast %88 : vector<2xf32> to vector<2x1xf32>
    %90 = tpu.reciprocal %89 {approx = true} : vector<2x1xf32> -> vector<2x1xf32>
    %91 = vector.broadcast %90 : vector<2x1xf32> to vector<2x8xf32>
    %92 = arith.mulf %87, %91 : vector<2x8xf32>
    %93 = vector.shape_cast %92 : vector<2x8xf32> to vector<2x8x1xf32>
    %94 = vector.broadcast %93 : vector<2x8x1xf32> to vector<2x8x32xf32>
    %95 = arith.mulf %0, %94 : vector<2x8x32xf32>
    %cst_51 = arith.constant dense<0.000000e+00> : vector<2x32xf32>
    %96 = vector.multi_reduction <add>, %95, %cst_51 [1] : vector<2x8x32xf32> to vector<2x32xf32>
    %97 = arith.index_cast %35 : i32 to index
    %c0_52 = arith.constant 0 : index
    %98 = vector.load %arg18[%97, %c0_52] : memref<14x32xf32, #tpu.memory_space<vmem>>, vector<2x32xf32>
    tpu.vector_store %arg18[%97, %c0_52], %77 {strides = array<i32>} : memref<14x32xf32, #tpu.memory_space<vmem>>, vector<2x32xf32>,
    %99 = arith.index_cast %35 : i32 to index
    %c0_53 = arith.constant 0 : index
    %100 = vector.load %arg19[%99, %c0_53] : memref<14x32xf32, #tpu.memory_space<vmem>>, vector<2x32xf32>
    tpu.vector_store %arg19[%99, %c0_53], %96 {strides = array<i32>} : memref<14x32xf32, #tpu.memory_space<vmem>>, vector<2x32xf32>,
    %c1_i32 = arith.constant 1 : i32
    %c2_i32_54 = arith.constant 2 : i32
    %101 = arith.muli %c1_i32, %c2_i32_54 : i32
    %102 = tpu.assume_multiple %101, 2 : i32
    %103 = arith.index_cast %102 : i32 to index
    %c0_55 = arith.constant 0 : index
    %104 = vector.load %arg17[%103, %c0_55] : memref<14x32xf32, #tpu.memory_space<vmem>>, vector<2x32xf32>
    %cst_56 = arith.constant dense<0.000000e+00> : vector<2x128xf32>
    %105 = tpu.matmul %104, %4, %cst_56 {dimension_numbers = #tpu.dot_dimension_numbers<[1], [0], [0], [1], [0, 0, 1, 1], [], []>} : vector<2x32xf32>, vector<32x128xf32>, vector<2x128xf32> -> vector<2x128xf32>
    %cst_57 = arith.constant dense<0.000000e+00> : vector<2x128xf32>
    %106 = tpu.matmul %96, %5, %cst_57 {dimension_numbers = #tpu.dot_dimension_numbers<[1], [0], [0], [1], [0, 0, 1, 1], [], []>} : vector<2x32xf32>, vector<32x128xf32>, vector<2x128xf32> -> vector<2x128xf32>
    %107 = arith.addf %105, %106 : vector<2x128xf32>
    %cst_58 = arith.constant dense<0.000000e+00> : vector<2x128xf32>
    %108 = tpu.matmul %58, %6, %cst_58 {dimension_numbers = #tpu.dot_dimension_numbers<[1], [0], [0], [1], [0, 0, 1, 1], [], []>} : vector<2x32xf32>, vector<32x128xf32>, vector<2x128xf32> -> vector<2x128xf32>
    %109 = arith.addf %107, %108 : vector<2x128xf32>
    %110 = arith.addf %109, %11 : vector<2x128xf32>
    %111 = arith.negf %110 : vector<2x128xf32>
    %112 = math.exp %111 : vector<2x128xf32>
    %cst_59 = arith.constant 1.000000e+00 : f32
    %113 = vector.broadcast %cst_59 : f32 to vector<2x128xf32>
    %114 = arith.addf %113, %112 : vector<2x128xf32>
    %115 = arith.divf %113, %114 : vector<2x128xf32>
    %116 = math.tanh %110 : vector<2x128xf32>
    %117 = vector.extract_strided_slice %115 {offsets = [0, 32], sizes = [2, 32], strides = [1, 1]} : vector<2x128xf32> to vector<2x32xf32>
    %118 = arith.mulf %117, %55 : vector<2x32xf32>
    %119 = vector.extract_strided_slice %115 {offsets = [0, 0], sizes = [2, 32], strides = [1, 1]} : vector<2x128xf32> to vector<2x32xf32>
    %120 = vector.extract_strided_slice %116 {offsets = [0, 64], sizes = [2, 32], strides = [1, 1]} : vector<2x128xf32> to vector<2x32xf32>
    %121 = arith.mulf %119, %120 : vector<2x32xf32>
    %122 = arith.addf %118, %121 : vector<2x32xf32>
    %123 = vector.extract_strided_slice %115 {offsets = [0, 96], sizes = [2, 32], strides = [1, 1]} : vector<2x128xf32> to vector<2x32xf32>
    %124 = math.tanh %122 : vector<2x32xf32>
    %125 = arith.mulf %123, %124 : vector<2x32xf32>
    %cst_60 = arith.constant dense<0.000000e+00> : vector<2x128xf32>
    %126 = tpu.matmul %125, %7, %cst_60 {dimension_numbers = #tpu.dot_dimension_numbers<[1], [0], [0], [1], [0, 0, 1, 1], [], []>} : vector<2x32xf32>, vector<32x128xf32>, vector<2x128xf32> -> vector<2x128xf32>
    %cst_61 = arith.constant dense<0.000000e+00> : vector<2x128xf32>
    %127 = tpu.matmul %77, %8, %cst_61 {dimension_numbers = #tpu.dot_dimension_numbers<[1], [0], [0], [1], [0, 0, 1, 1], [], []>} : vector<2x32xf32>, vector<32x128xf32>, vector<2x128xf32> -> vector<2x128xf32>
    %128 = arith.addf %126, %127 : vector<2x128xf32>
    %129 = arith.addf %128, %14 : vector<2x128xf32>
    %130 = arith.negf %129 : vector<2x128xf32>
    %131 = math.exp %130 : vector<2x128xf32>
    %cst_62 = arith.constant 1.000000e+00 : f32
    %132 = vector.broadcast %cst_62 : f32 to vector<2x128xf32>
    %133 = arith.addf %132, %131 : vector<2x128xf32>
    %134 = arith.divf %132, %133 : vector<2x128xf32>
    %135 = math.tanh %129 : vector<2x128xf32>
    %136 = vector.extract_strided_slice %134 {offsets = [0, 32], sizes = [2, 32], strides = [1, 1]} : vector<2x128xf32> to vector<2x32xf32>
    %137 = arith.mulf %136, %74 : vector<2x32xf32>
    %138 = vector.extract_strided_slice %134 {offsets = [0, 0], sizes = [2, 32], strides = [1, 1]} : vector<2x128xf32> to vector<2x32xf32>
    %139 = vector.extract_strided_slice %135 {offsets = [0, 64], sizes = [2, 32], strides = [1, 1]} : vector<2x128xf32> to vector<2x32xf32>
    %140 = arith.mulf %138, %139 : vector<2x32xf32>
    %141 = arith.addf %137, %140 : vector<2x32xf32>
    %142 = vector.extract_strided_slice %134 {offsets = [0, 96], sizes = [2, 32], strides = [1, 1]} : vector<2x128xf32> to vector<2x32xf32>
    %143 = math.tanh %141 : vector<2x32xf32>
    %144 = arith.mulf %142, %143 : vector<2x32xf32>
    %145 = vector.shape_cast %144 : vector<2x32xf32> to vector<2x1x32xf32>
    %146 = vector.broadcast %145 : vector<2x1x32xf32> to vector<2x8x32xf32>
    %147 = arith.mulf %0, %146 : vector<2x8x32xf32>
    %cst_63 = arith.constant dense<0.000000e+00> : vector<2x8xf32>
    %148 = vector.multi_reduction <add>, %147, %cst_63 [2] : vector<2x8x32xf32> to vector<2x8xf32>
    %149 = arith.addf %148, %1 : vector<2x8xf32>
    %cst_64 = arith.constant dense<0xFF800000> : vector<2xf32>
    %150 = vector.multi_reduction <maximumf>, %149, %cst_64 [1] : vector<2x8xf32> to vector<2xf32>
    %151 = vector.shape_cast %150 : vector<2xf32> to vector<2x1xf32>
    %152 = vector.broadcast %151 : vector<2x1xf32> to vector<2x8xf32>
    %153 = arith.subf %149, %152 : vector<2x8xf32>
    %154 = math.exp %153 : vector<2x8xf32>
    %cst_65 = arith.constant dense<0.000000e+00> : vector<2xf32>
    %155 = vector.multi_reduction <add>, %154, %cst_65 [1] : vector<2x8xf32> to vector<2xf32>
    %156 = vector.shape_cast %155 : vector<2xf32> to vector<2x1xf32>
    %157 = tpu.reciprocal %156 {approx = true} : vector<2x1xf32> -> vector<2x1xf32>
    %158 = vector.broadcast %157 : vector<2x1xf32> to vector<2x8xf32>
    %159 = arith.mulf %154, %158 : vector<2x8xf32>
    %160 = vector.shape_cast %159 : vector<2x8xf32> to vector<2x8x1xf32>
    %161 = vector.broadcast %160 : vector<2x8x1xf32> to vector<2x8x32xf32>
    %162 = arith.mulf %0, %161 : vector<2x8x32xf32>
    %cst_66 = arith.constant dense<0.000000e+00> : vector<2x32xf32>
    %163 = vector.multi_reduction <add>, %162, %cst_66 [1] : vector<2x8x32xf32> to vector<2x32xf32>
    %164 = arith.index_cast %102 : i32 to index
    %c0_67 = arith.constant 0 : index
    %165 = vector.load %arg18[%164, %c0_67] : memref<14x32xf32, #tpu.memory_space<vmem>>, vector<2x32xf32>
    tpu.vector_store %arg18[%164, %c0_67], %144 {strides = array<i32>} : memref<14x32xf32, #tpu.memory_space<vmem>>, vector<2x32xf32>,
    %166 = arith.index_cast %102 : i32 to index
    %c0_68 = arith.constant 0 : index
    %167 = vector.load %arg19[%166, %c0_68] : memref<14x32xf32, #tpu.memory_space<vmem>>, vector<2x32xf32>
    tpu.vector_store %arg19[%166, %c0_68], %163 {strides = array<i32>} : memref<14x32xf32, #tpu.memory_space<vmem>>, vector<2x32xf32>,
    %c2_i32_69 = arith.constant 2 : i32
    %c2_i32_70 = arith.constant 2 : i32
    %168 = arith.muli %c2_i32_69, %c2_i32_70 : i32
    %169 = tpu.assume_multiple %168, 2 : i32
    %170 = arith.index_cast %169 : i32 to index
    %c0_71 = arith.constant 0 : index
    %171 = vector.load %arg17[%170, %c0_71] : memref<14x32xf32, #tpu.memory_space<vmem>>, vector<2x32xf32>
    %cst_72 = arith.constant dense<0.000000e+00> : vector<2x128xf32>
    %172 = tpu.matmul %171, %4, %cst_72 {dimension_numbers = #tpu.dot_dimension_numbers<[1], [0], [0], [1], [0, 0, 1, 1], [], []>} : vector<2x32xf32>, vector<32x128xf32>, vector<2x128xf32> -> vector<2x128xf32>
    %cst_73 = arith.constant dense<0.000000e+00> : vector<2x128xf32>
    %173 = tpu.matmul %163, %5, %cst_73 {dimension_numbers = #tpu.dot_dimension_numbers<[1], [0], [0], [1], [0, 0, 1, 1], [], []>} : vector<2x32xf32>, vector<32x128xf32>, vector<2x128xf32> -> vector<2x128xf32>
    %174 = arith.addf %172, %173 : vector<2x128xf32>
    %cst_74 = arith.constant dense<0.000000e+00> : vector<2x128xf32>
    %175 = tpu.matmul %125, %6, %cst_74 {dimension_numbers = #tpu.dot_dimension_numbers<[1], [0], [0], [1], [0, 0, 1, 1], [], []>} : vector<2x32xf32>, vector<32x128xf32>, vector<2x128xf32> -> vector<2x128xf32>
    %176 = arith.addf %174, %175 : vector<2x128xf32>
    %177 = arith.addf %176, %11 : vector<2x128xf32>
    %178 = arith.negf %177 : vector<2x128xf32>
    %179 = math.exp %178 : vector<2x128xf32>
    %cst_75 = arith.constant 1.000000e+00 : f32
    %180 = vector.broadcast %cst_75 : f32 to vector<2x128xf32>
    %181 = arith.addf %180, %179 : vector<2x128xf32>
    %182 = arith.divf %180, %181 : vector<2x128xf32>
    %183 = math.tanh %177 : vector<2x128xf32>
    %184 = vector.extract_strided_slice %182 {offsets = [0, 32], sizes = [2, 32], strides = [1, 1]} : vector<2x128xf32> to vector<2x32xf32>
    %185 = arith.mulf %184, %122 : vector<2x32xf32>
    %186 = vector.extract_strided_slice %182 {offsets = [0, 0], sizes = [2, 32], strides = [1, 1]} : vector<2x128xf32> to vector<2x32xf32>
    %187 = vector.extract_strided_slice %183 {offsets = [0, 64], sizes = [2, 32], strides = [1, 1]} : vector<2x128xf32> to vector<2x32xf32>
    %188 = arith.mulf %186, %187 : vector<2x32xf32>
    %189 = arith.addf %185, %188 : vector<2x32xf32>
    %190 = vector.extract_strided_slice %182 {offsets = [0, 96], sizes = [2, 32], strides = [1, 1]} : vector<2x128xf32> to vector<2x32xf32>
    %191 = math.tanh %189 : vector<2x32xf32>
    %192 = arith.mulf %190, %191 : vector<2x32xf32>
    %cst_76 = arith.constant dense<0.000000e+00> : vector<2x128xf32>
    %193 = tpu.matmul %192, %7, %cst_76 {dimension_numbers = #tpu.dot_dimension_numbers<[1], [0], [0], [1], [0, 0, 1, 1], [], []>} : vector<2x32xf32>, vector<32x128xf32>, vector<2x128xf32> -> vector<2x128xf32>
    %cst_77 = arith.constant dense<0.000000e+00> : vector<2x128xf32>
    %194 = tpu.matmul %144, %8, %cst_77 {dimension_numbers = #tpu.dot_dimension_numbers<[1], [0], [0], [1], [0, 0, 1, 1], [], []>} : vector<2x32xf32>, vector<32x128xf32>, vector<2x128xf32> -> vector<2x128xf32>
    %195 = arith.addf %193, %194 : vector<2x128xf32>
    %196 = arith.addf %195, %14 : vector<2x128xf32>
    %197 = arith.negf %196 : vector<2x128xf32>
    %198 = math.exp %197 : vector<2x128xf32>
    %cst_78 = arith.constant 1.000000e+00 : f32
    %199 = vector.broadcast %cst_78 : f32 to vector<2x128xf32>
    %200 = arith.addf %199, %198 : vector<2x128xf32>
    %201 = arith.divf %199, %200 : vector<2x128xf32>
    %202 = math.tanh %196 : vector<2x128xf32>
    %203 = vector.extract_strided_slice %201 {offsets = [0, 32], sizes = [2, 32], strides = [1, 1]} : vector<2x128xf32> to vector<2x32xf32>
    %204 = arith.mulf %203, %141 : vector<2x32xf32>
    %205 = vector.extract_strided_slice %201 {offsets = [0, 0], sizes = [2, 32], strides = [1, 1]} : vector<2x128xf32> to vector<2x32xf32>
    %206 = vector.extract_strided_slice %202 {offsets = [0, 64], sizes = [2, 32], strides = [1, 1]} : vector<2x128xf32> to vector<2x32xf32>
    %207 = arith.mulf %205, %206 : vector<2x32xf32>
    %208 = arith.addf %204, %207 : vector<2x32xf32>
    %209 = vector.extract_strided_slice %201 {offsets = [0, 96], sizes = [2, 32], strides = [1, 1]} : vector<2x128xf32> to vector<2x32xf32>
    %210 = math.tanh %208 : vector<2x32xf32>
    %211 = arith.mulf %209, %210 : vector<2x32xf32>
    %212 = vector.shape_cast %211 : vector<2x32xf32> to vector<2x1x32xf32>
    %213 = vector.broadcast %212 : vector<2x1x32xf32> to vector<2x8x32xf32>
    %214 = arith.mulf %0, %213 : vector<2x8x32xf32>
    %cst_79 = arith.constant dense<0.000000e+00> : vector<2x8xf32>
    %215 = vector.multi_reduction <add>, %214, %cst_79 [2] : vector<2x8x32xf32> to vector<2x8xf32>
    %216 = arith.addf %215, %1 : vector<2x8xf32>
    %cst_80 = arith.constant dense<0xFF800000> : vector<2xf32>
    %217 = vector.multi_reduction <maximumf>, %216, %cst_80 [1] : vector<2x8xf32> to vector<2xf32>
    %218 = vector.shape_cast %217 : vector<2xf32> to vector<2x1xf32>
    %219 = vector.broadcast %218 : vector<2x1xf32> to vector<2x8xf32>
    %220 = arith.subf %216, %219 : vector<2x8xf32>
    %221 = math.exp %220 : vector<2x8xf32>
    %cst_81 = arith.constant dense<0.000000e+00> : vector<2xf32>
    %222 = vector.multi_reduction <add>, %221, %cst_81 [1] : vector<2x8xf32> to vector<2xf32>
    %223 = vector.shape_cast %222 : vector<2xf32> to vector<2x1xf32>
    %224 = tpu.reciprocal %223 {approx = true} : vector<2x1xf32> -> vector<2x1xf32>
    %225 = vector.broadcast %224 : vector<2x1xf32> to vector<2x8xf32>
    %226 = arith.mulf %221, %225 : vector<2x8xf32>
    %227 = vector.shape_cast %226 : vector<2x8xf32> to vector<2x8x1xf32>
    %228 = vector.broadcast %227 : vector<2x8x1xf32> to vector<2x8x32xf32>
    %229 = arith.mulf %0, %228 : vector<2x8x32xf32>
    %cst_82 = arith.constant dense<0.000000e+00> : vector<2x32xf32>
    %230 = vector.multi_reduction <add>, %229, %cst_82 [1] : vector<2x8x32xf32> to vector<2x32xf32>
    %231 = arith.index_cast %169 : i32 to index
    %c0_83 = arith.constant 0 : index
    %232 = vector.load %arg18[%231, %c0_83] : memref<14x32xf32, #tpu.memory_space<vmem>>, vector<2x32xf32>
    tpu.vector_store %arg18[%231, %c0_83], %211 {strides = array<i32>} : memref<14x32xf32, #tpu.memory_space<vmem>>, vector<2x32xf32>,
    %233 = arith.index_cast %169 : i32 to index
    %c0_84 = arith.constant 0 : index
    %234 = vector.load %arg19[%233, %c0_84] : memref<14x32xf32, #tpu.memory_space<vmem>>, vector<2x32xf32>
    tpu.vector_store %arg19[%233, %c0_84], %230 {strides = array<i32>} : memref<14x32xf32, #tpu.memory_space<vmem>>, vector<2x32xf32>,
    %c3_i32 = arith.constant 3 : i32
    %c2_i32_85 = arith.constant 2 : i32
    %235 = arith.muli %c3_i32, %c2_i32_85 : i32
    %236 = tpu.assume_multiple %235, 2 : i32
    %237 = arith.index_cast %236 : i32 to index
    %c0_86 = arith.constant 0 : index
    %238 = vector.load %arg17[%237, %c0_86] : memref<14x32xf32, #tpu.memory_space<vmem>>, vector<2x32xf32>
    %cst_87 = arith.constant dense<0.000000e+00> : vector<2x128xf32>
    %239 = tpu.matmul %238, %4, %cst_87 {dimension_numbers = #tpu.dot_dimension_numbers<[1], [0], [0], [1], [0, 0, 1, 1], [], []>} : vector<2x32xf32>, vector<32x128xf32>, vector<2x128xf32> -> vector<2x128xf32>
    %cst_88 = arith.constant dense<0.000000e+00> : vector<2x128xf32>
    %240 = tpu.matmul %230, %5, %cst_88 {dimension_numbers = #tpu.dot_dimension_numbers<[1], [0], [0], [1], [0, 0, 1, 1], [], []>} : vector<2x32xf32>, vector<32x128xf32>, vector<2x128xf32> -> vector<2x128xf32>
    %241 = arith.addf %239, %240 : vector<2x128xf32>
    %cst_89 = arith.constant dense<0.000000e+00> : vector<2x128xf32>
    %242 = tpu.matmul %192, %6, %cst_89 {dimension_numbers = #tpu.dot_dimension_numbers<[1], [0], [0], [1], [0, 0, 1, 1], [], []>} : vector<2x32xf32>, vector<32x128xf32>, vector<2x128xf32> -> vector<2x128xf32>
    %243 = arith.addf %241, %242 : vector<2x128xf32>
    %244 = arith.addf %243, %11 : vector<2x128xf32>
    %245 = arith.negf %244 : vector<2x128xf32>
    %246 = math.exp %245 : vector<2x128xf32>
    %cst_90 = arith.constant 1.000000e+00 : f32
    %247 = vector.broadcast %cst_90 : f32 to vector<2x128xf32>
    %248 = arith.addf %247, %246 : vector<2x128xf32>
    %249 = arith.divf %247, %248 : vector<2x128xf32>
    %250 = math.tanh %244 : vector<2x128xf32>
    %251 = vector.extract_strided_slice %249 {offsets = [0, 32], sizes = [2, 32], strides = [1, 1]} : vector<2x128xf32> to vector<2x32xf32>
    %252 = arith.mulf %251, %189 : vector<2x32xf32>
    %253 = vector.extract_strided_slice %249 {offsets = [0, 0], sizes = [2, 32], strides = [1, 1]} : vector<2x128xf32> to vector<2x32xf32>
    %254 = vector.extract_strided_slice %250 {offsets = [0, 64], sizes = [2, 32], strides = [1, 1]} : vector<2x128xf32> to vector<2x32xf32>
    %255 = arith.mulf %253, %254 : vector<2x32xf32>
    %256 = arith.addf %252, %255 : vector<2x32xf32>
    %257 = vector.extract_strided_slice %249 {offsets = [0, 96], sizes = [2, 32], strides = [1, 1]} : vector<2x128xf32> to vector<2x32xf32>
    %258 = math.tanh %256 : vector<2x32xf32>
    %259 = arith.mulf %257, %258 : vector<2x32xf32>
    %cst_91 = arith.constant dense<0.000000e+00> : vector<2x128xf32>
    %260 = tpu.matmul %259, %7, %cst_91 {dimension_numbers = #tpu.dot_dimension_numbers<[1], [0], [0], [1], [0, 0, 1, 1], [], []>} : vector<2x32xf32>, vector<32x128xf32>, vector<2x128xf32> -> vector<2x128xf32>
    %cst_92 = arith.constant dense<0.000000e+00> : vector<2x128xf32>
    %261 = tpu.matmul %211, %8, %cst_92 {dimension_numbers = #tpu.dot_dimension_numbers<[1], [0], [0], [1], [0, 0, 1, 1], [], []>} : vector<2x32xf32>, vector<32x128xf32>, vector<2x128xf32> -> vector<2x128xf32>
    %262 = arith.addf %260, %261 : vector<2x128xf32>
    %263 = arith.addf %262, %14 : vector<2x128xf32>
    %264 = arith.negf %263 : vector<2x128xf32>
    %265 = math.exp %264 : vector<2x128xf32>
    %cst_93 = arith.constant 1.000000e+00 : f32
    %266 = vector.broadcast %cst_93 : f32 to vector<2x128xf32>
    %267 = arith.addf %266, %265 : vector<2x128xf32>
    %268 = arith.divf %266, %267 : vector<2x128xf32>
    %269 = math.tanh %263 : vector<2x128xf32>
    %270 = vector.extract_strided_slice %268 {offsets = [0, 32], sizes = [2, 32], strides = [1, 1]} : vector<2x128xf32> to vector<2x32xf32>
    %271 = arith.mulf %270, %208 : vector<2x32xf32>
    %272 = vector.extract_strided_slice %268 {offsets = [0, 0], sizes = [2, 32], strides = [1, 1]} : vector<2x128xf32> to vector<2x32xf32>
    %273 = vector.extract_strided_slice %269 {offsets = [0, 64], sizes = [2, 32], strides = [1, 1]} : vector<2x128xf32> to vector<2x32xf32>
    %274 = arith.mulf %272, %273 : vector<2x32xf32>
    %275 = arith.addf %271, %274 : vector<2x32xf32>
    %276 = vector.extract_strided_slice %268 {offsets = [0, 96], sizes = [2, 32], strides = [1, 1]} : vector<2x128xf32> to vector<2x32xf32>
    %277 = math.tanh %275 : vector<2x32xf32>
    %278 = arith.mulf %276, %277 : vector<2x32xf32>
    %279 = vector.shape_cast %278 : vector<2x32xf32> to vector<2x1x32xf32>
    %280 = vector.broadcast %279 : vector<2x1x32xf32> to vector<2x8x32xf32>
    %281 = arith.mulf %0, %280 : vector<2x8x32xf32>
    %cst_94 = arith.constant dense<0.000000e+00> : vector<2x8xf32>
    %282 = vector.multi_reduction <add>, %281, %cst_94 [2] : vector<2x8x32xf32> to vector<2x8xf32>
    %283 = arith.addf %282, %1 : vector<2x8xf32>
    %cst_95 = arith.constant dense<0xFF800000> : vector<2xf32>
    %284 = vector.multi_reduction <maximumf>, %283, %cst_95 [1] : vector<2x8xf32> to vector<2xf32>
    %285 = vector.shape_cast %284 : vector<2xf32> to vector<2x1xf32>
    %286 = vector.broadcast %285 : vector<2x1xf32> to vector<2x8xf32>
    %287 = arith.subf %283, %286 : vector<2x8xf32>
    %288 = math.exp %287 : vector<2x8xf32>
    %cst_96 = arith.constant dense<0.000000e+00> : vector<2xf32>
    %289 = vector.multi_reduction <add>, %288, %cst_96 [1] : vector<2x8xf32> to vector<2xf32>
    %290 = vector.shape_cast %289 : vector<2xf32> to vector<2x1xf32>
    %291 = tpu.reciprocal %290 {approx = true} : vector<2x1xf32> -> vector<2x1xf32>
    %292 = vector.broadcast %291 : vector<2x1xf32> to vector<2x8xf32>
    %293 = arith.mulf %288, %292 : vector<2x8xf32>
    %294 = vector.shape_cast %293 : vector<2x8xf32> to vector<2x8x1xf32>
    %295 = vector.broadcast %294 : vector<2x8x1xf32> to vector<2x8x32xf32>
    %296 = arith.mulf %0, %295 : vector<2x8x32xf32>
    %cst_97 = arith.constant dense<0.000000e+00> : vector<2x32xf32>
    %297 = vector.multi_reduction <add>, %296, %cst_97 [1] : vector<2x8x32xf32> to vector<2x32xf32>
    %298 = arith.index_cast %236 : i32 to index
    %c0_98 = arith.constant 0 : index
    %299 = vector.load %arg18[%298, %c0_98] : memref<14x32xf32, #tpu.memory_space<vmem>>, vector<2x32xf32>
    tpu.vector_store %arg18[%298, %c0_98], %278 {strides = array<i32>} : memref<14x32xf32, #tpu.memory_space<vmem>>, vector<2x32xf32>,
    %300 = arith.index_cast %236 : i32 to index
    %c0_99 = arith.constant 0 : index
    %301 = vector.load %arg19[%300, %c0_99] : memref<14x32xf32, #tpu.memory_space<vmem>>, vector<2x32xf32>
    tpu.vector_store %arg19[%300, %c0_99], %297 {strides = array<i32>} : memref<14x32xf32, #tpu.memory_space<vmem>>, vector<2x32xf32>,
    %c4_i32 = arith.constant 4 : i32
    %c2_i32_100 = arith.constant 2 : i32
    %302 = arith.muli %c4_i32, %c2_i32_100 : i32
    %303 = tpu.assume_multiple %302, 2 : i32
    %304 = arith.index_cast %303 : i32 to index
    %c0_101 = arith.constant 0 : index
    %305 = vector.load %arg17[%304, %c0_101] : memref<14x32xf32, #tpu.memory_space<vmem>>, vector<2x32xf32>
    %cst_102 = arith.constant dense<0.000000e+00> : vector<2x128xf32>
    %306 = tpu.matmul %305, %4, %cst_102 {dimension_numbers = #tpu.dot_dimension_numbers<[1], [0], [0], [1], [0, 0, 1, 1], [], []>} : vector<2x32xf32>, vector<32x128xf32>, vector<2x128xf32> -> vector<2x128xf32>
    %cst_103 = arith.constant dense<0.000000e+00> : vector<2x128xf32>
    %307 = tpu.matmul %297, %5, %cst_103 {dimension_numbers = #tpu.dot_dimension_numbers<[1], [0], [0], [1], [0, 0, 1, 1], [], []>} : vector<2x32xf32>, vector<32x128xf32>, vector<2x128xf32> -> vector<2x128xf32>
    %308 = arith.addf %306, %307 : vector<2x128xf32>
    %cst_104 = arith.constant dense<0.000000e+00> : vector<2x128xf32>
    %309 = tpu.matmul %259, %6, %cst_104 {dimension_numbers = #tpu.dot_dimension_numbers<[1], [0], [0], [1], [0, 0, 1, 1], [], []>} : vector<2x32xf32>, vector<32x128xf32>, vector<2x128xf32> -> vector<2x128xf32>
    %310 = arith.addf %308, %309 : vector<2x128xf32>
    %311 = arith.addf %310, %11 : vector<2x128xf32>
    %312 = arith.negf %311 : vector<2x128xf32>
    %313 = math.exp %312 : vector<2x128xf32>
    %cst_105 = arith.constant 1.000000e+00 : f32
    %314 = vector.broadcast %cst_105 : f32 to vector<2x128xf32>
    %315 = arith.addf %314, %313 : vector<2x128xf32>
    %316 = arith.divf %314, %315 : vector<2x128xf32>
    %317 = math.tanh %311 : vector<2x128xf32>
    %318 = vector.extract_strided_slice %316 {offsets = [0, 32], sizes = [2, 32], strides = [1, 1]} : vector<2x128xf32> to vector<2x32xf32>
    %319 = arith.mulf %318, %256 : vector<2x32xf32>
    %320 = vector.extract_strided_slice %316 {offsets = [0, 0], sizes = [2, 32], strides = [1, 1]} : vector<2x128xf32> to vector<2x32xf32>
    %321 = vector.extract_strided_slice %317 {offsets = [0, 64], sizes = [2, 32], strides = [1, 1]} : vector<2x128xf32> to vector<2x32xf32>
    %322 = arith.mulf %320, %321 : vector<2x32xf32>
    %323 = arith.addf %319, %322 : vector<2x32xf32>
    %324 = vector.extract_strided_slice %316 {offsets = [0, 96], sizes = [2, 32], strides = [1, 1]} : vector<2x128xf32> to vector<2x32xf32>
    %325 = math.tanh %323 : vector<2x32xf32>
    %326 = arith.mulf %324, %325 : vector<2x32xf32>
    %cst_106 = arith.constant dense<0.000000e+00> : vector<2x128xf32>
    %327 = tpu.matmul %326, %7, %cst_106 {dimension_numbers = #tpu.dot_dimension_numbers<[1], [0], [0], [1], [0, 0, 1, 1], [], []>} : vector<2x32xf32>, vector<32x128xf32>, vector<2x128xf32> -> vector<2x128xf32>
    %cst_107 = arith.constant dense<0.000000e+00> : vector<2x128xf32>
    %328 = tpu.matmul %278, %8, %cst_107 {dimension_numbers = #tpu.dot_dimension_numbers<[1], [0], [0], [1], [0, 0, 1, 1], [], []>} : vector<2x32xf32>, vector<32x128xf32>, vector<2x128xf32> -> vector<2x128xf32>
    %329 = arith.addf %327, %328 : vector<2x128xf32>
    %330 = arith.addf %329, %14 : vector<2x128xf32>
    %331 = arith.negf %330 : vector<2x128xf32>
    %332 = math.exp %331 : vector<2x128xf32>
    %cst_108 = arith.constant 1.000000e+00 : f32
    %333 = vector.broadcast %cst_108 : f32 to vector<2x128xf32>
    %334 = arith.addf %333, %332 : vector<2x128xf32>
    %335 = arith.divf %333, %334 : vector<2x128xf32>
    %336 = math.tanh %330 : vector<2x128xf32>
    %337 = vector.extract_strided_slice %335 {offsets = [0, 32], sizes = [2, 32], strides = [1, 1]} : vector<2x128xf32> to vector<2x32xf32>
    %338 = arith.mulf %337, %275 : vector<2x32xf32>
    %339 = vector.extract_strided_slice %335 {offsets = [0, 0], sizes = [2, 32], strides = [1, 1]} : vector<2x128xf32> to vector<2x32xf32>
    %340 = vector.extract_strided_slice %336 {offsets = [0, 64], sizes = [2, 32], strides = [1, 1]} : vector<2x128xf32> to vector<2x32xf32>
    %341 = arith.mulf %339, %340 : vector<2x32xf32>
    %342 = arith.addf %338, %341 : vector<2x32xf32>
    %343 = vector.extract_strided_slice %335 {offsets = [0, 96], sizes = [2, 32], strides = [1, 1]} : vector<2x128xf32> to vector<2x32xf32>
    %344 = math.tanh %342 : vector<2x32xf32>
    %345 = arith.mulf %343, %344 : vector<2x32xf32>
    %346 = vector.shape_cast %345 : vector<2x32xf32> to vector<2x1x32xf32>
    %347 = vector.broadcast %346 : vector<2x1x32xf32> to vector<2x8x32xf32>
    %348 = arith.mulf %0, %347 : vector<2x8x32xf32>
    %cst_109 = arith.constant dense<0.000000e+00> : vector<2x8xf32>
    %349 = vector.multi_reduction <add>, %348, %cst_109 [2] : vector<2x8x32xf32> to vector<2x8xf32>
    %350 = arith.addf %349, %1 : vector<2x8xf32>
    %cst_110 = arith.constant dense<0xFF800000> : vector<2xf32>
    %351 = vector.multi_reduction <maximumf>, %350, %cst_110 [1] : vector<2x8xf32> to vector<2xf32>
    %352 = vector.shape_cast %351 : vector<2xf32> to vector<2x1xf32>
    %353 = vector.broadcast %352 : vector<2x1xf32> to vector<2x8xf32>
    %354 = arith.subf %350, %353 : vector<2x8xf32>
    %355 = math.exp %354 : vector<2x8xf32>
    %cst_111 = arith.constant dense<0.000000e+00> : vector<2xf32>
    %356 = vector.multi_reduction <add>, %355, %cst_111 [1] : vector<2x8xf32> to vector<2xf32>
    %357 = vector.shape_cast %356 : vector<2xf32> to vector<2x1xf32>
    %358 = tpu.reciprocal %357 {approx = true} : vector<2x1xf32> -> vector<2x1xf32>
    %359 = vector.broadcast %358 : vector<2x1xf32> to vector<2x8xf32>
    %360 = arith.mulf %355, %359 : vector<2x8xf32>
    %361 = vector.shape_cast %360 : vector<2x8xf32> to vector<2x8x1xf32>
    %362 = vector.broadcast %361 : vector<2x8x1xf32> to vector<2x8x32xf32>
    %363 = arith.mulf %0, %362 : vector<2x8x32xf32>
    %cst_112 = arith.constant dense<0.000000e+00> : vector<2x32xf32>
    %364 = vector.multi_reduction <add>, %363, %cst_112 [1] : vector<2x8x32xf32> to vector<2x32xf32>
    %365 = arith.index_cast %303 : i32 to index
    %c0_113 = arith.constant 0 : index
    %366 = vector.load %arg18[%365, %c0_113] : memref<14x32xf32, #tpu.memory_space<vmem>>, vector<2x32xf32>
    tpu.vector_store %arg18[%365, %c0_113], %345 {strides = array<i32>} : memref<14x32xf32, #tpu.memory_space<vmem>>, vector<2x32xf32>,
    %367 = arith.index_cast %303 : i32 to index
    %c0_114 = arith.constant 0 : index
    %368 = vector.load %arg19[%367, %c0_114] : memref<14x32xf32, #tpu.memory_space<vmem>>, vector<2x32xf32>
    tpu.vector_store %arg19[%367, %c0_114], %364 {strides = array<i32>} : memref<14x32xf32, #tpu.memory_space<vmem>>, vector<2x32xf32>,
    %c5_i32 = arith.constant 5 : i32
    %c2_i32_115 = arith.constant 2 : i32
    %369 = arith.muli %c5_i32, %c2_i32_115 : i32
    %370 = tpu.assume_multiple %369, 2 : i32
    %371 = arith.index_cast %370 : i32 to index
    %c0_116 = arith.constant 0 : index
    %372 = vector.load %arg17[%371, %c0_116] : memref<14x32xf32, #tpu.memory_space<vmem>>, vector<2x32xf32>
    %cst_117 = arith.constant dense<0.000000e+00> : vector<2x128xf32>
    %373 = tpu.matmul %372, %4, %cst_117 {dimension_numbers = #tpu.dot_dimension_numbers<[1], [0], [0], [1], [0, 0, 1, 1], [], []>} : vector<2x32xf32>, vector<32x128xf32>, vector<2x128xf32> -> vector<2x128xf32>
    %cst_118 = arith.constant dense<0.000000e+00> : vector<2x128xf32>
    %374 = tpu.matmul %364, %5, %cst_118 {dimension_numbers = #tpu.dot_dimension_numbers<[1], [0], [0], [1], [0, 0, 1, 1], [], []>} : vector<2x32xf32>, vector<32x128xf32>, vector<2x128xf32> -> vector<2x128xf32>
    %375 = arith.addf %373, %374 : vector<2x128xf32>
    %cst_119 = arith.constant dense<0.000000e+00> : vector<2x128xf32>
    %376 = tpu.matmul %326, %6, %cst_119 {dimension_numbers = #tpu.dot_dimension_numbers<[1], [0], [0], [1], [0, 0, 1, 1], [], []>} : vector<2x32xf32>, vector<32x128xf32>, vector<2x128xf32> -> vector<2x128xf32>
    %377 = arith.addf %375, %376 : vector<2x128xf32>
    %378 = arith.addf %377, %11 : vector<2x128xf32>
    %379 = arith.negf %378 : vector<2x128xf32>
    %380 = math.exp %379 : vector<2x128xf32>
    %cst_120 = arith.constant 1.000000e+00 : f32
    %381 = vector.broadcast %cst_120 : f32 to vector<2x128xf32>
    %382 = arith.addf %381, %380 : vector<2x128xf32>
    %383 = arith.divf %381, %382 : vector<2x128xf32>
    %384 = math.tanh %378 : vector<2x128xf32>
    %385 = vector.extract_strided_slice %383 {offsets = [0, 32], sizes = [2, 32], strides = [1, 1]} : vector<2x128xf32> to vector<2x32xf32>
    %386 = arith.mulf %385, %323 : vector<2x32xf32>
    %387 = vector.extract_strided_slice %383 {offsets = [0, 0], sizes = [2, 32], strides = [1, 1]} : vector<2x128xf32> to vector<2x32xf32>
    %388 = vector.extract_strided_slice %384 {offsets = [0, 64], sizes = [2, 32], strides = [1, 1]} : vector<2x128xf32> to vector<2x32xf32>
    %389 = arith.mulf %387, %388 : vector<2x32xf32>
    %390 = arith.addf %386, %389 : vector<2x32xf32>
    %391 = vector.extract_strided_slice %383 {offsets = [0, 96], sizes = [2, 32], strides = [1, 1]} : vector<2x128xf32> to vector<2x32xf32>
    %392 = math.tanh %390 : vector<2x32xf32>
    %393 = arith.mulf %391, %392 : vector<2x32xf32>
    %cst_121 = arith.constant dense<0.000000e+00> : vector<2x128xf32>
    %394 = tpu.matmul %393, %7, %cst_121 {dimension_numbers = #tpu.dot_dimension_numbers<[1], [0], [0], [1], [0, 0, 1, 1], [], []>} : vector<2x32xf32>, vector<32x128xf32>, vector<2x128xf32> -> vector<2x128xf32>
    %cst_122 = arith.constant dense<0.000000e+00> : vector<2x128xf32>
    %395 = tpu.matmul %345, %8, %cst_122 {dimension_numbers = #tpu.dot_dimension_numbers<[1], [0], [0], [1], [0, 0, 1, 1], [], []>} : vector<2x32xf32>, vector<32x128xf32>, vector<2x128xf32> -> vector<2x128xf32>
    %396 = arith.addf %394, %395 : vector<2x128xf32>
    %397 = arith.addf %396, %14 : vector<2x128xf32>
    %398 = arith.negf %397 : vector<2x128xf32>
    %399 = math.exp %398 : vector<2x128xf32>
    %cst_123 = arith.constant 1.000000e+00 : f32
    %400 = vector.broadcast %cst_123 : f32 to vector<2x128xf32>
    %401 = arith.addf %400, %399 : vector<2x128xf32>
    %402 = arith.divf %400, %401 : vector<2x128xf32>
    %403 = math.tanh %397 : vector<2x128xf32>
    %404 = vector.extract_strided_slice %402 {offsets = [0, 32], sizes = [2, 32], strides = [1, 1]} : vector<2x128xf32> to vector<2x32xf32>
    %405 = arith.mulf %404, %342 : vector<2x32xf32>
    %406 = vector.extract_strided_slice %402 {offsets = [0, 0], sizes = [2, 32], strides = [1, 1]} : vector<2x128xf32> to vector<2x32xf32>
    %407 = vector.extract_strided_slice %403 {offsets = [0, 64], sizes = [2, 32], strides = [1, 1]} : vector<2x128xf32> to vector<2x32xf32>
    %408 = arith.mulf %406, %407 : vector<2x32xf32>
    %409 = arith.addf %405, %408 : vector<2x32xf32>
    %410 = vector.extract_strided_slice %402 {offsets = [0, 96], sizes = [2, 32], strides = [1, 1]} : vector<2x128xf32> to vector<2x32xf32>
    %411 = math.tanh %409 : vector<2x32xf32>
    %412 = arith.mulf %410, %411 : vector<2x32xf32>
    %413 = vector.shape_cast %412 : vector<2x32xf32> to vector<2x1x32xf32>
    %414 = vector.broadcast %413 : vector<2x1x32xf32> to vector<2x8x32xf32>
    %415 = arith.mulf %0, %414 : vector<2x8x32xf32>
    %cst_124 = arith.constant dense<0.000000e+00> : vector<2x8xf32>
    %416 = vector.multi_reduction <add>, %415, %cst_124 [2] : vector<2x8x32xf32> to vector<2x8xf32>
    %417 = arith.addf %416, %1 : vector<2x8xf32>
    %cst_125 = arith.constant dense<0xFF800000> : vector<2xf32>
    %418 = vector.multi_reduction <maximumf>, %417, %cst_125 [1] : vector<2x8xf32> to vector<2xf32>
    %419 = vector.shape_cast %418 : vector<2xf32> to vector<2x1xf32>
    %420 = vector.broadcast %419 : vector<2x1xf32> to vector<2x8xf32>
    %421 = arith.subf %417, %420 : vector<2x8xf32>
    %422 = math.exp %421 : vector<2x8xf32>
    %cst_126 = arith.constant dense<0.000000e+00> : vector<2xf32>
    %423 = vector.multi_reduction <add>, %422, %cst_126 [1] : vector<2x8xf32> to vector<2xf32>
    %424 = vector.shape_cast %423 : vector<2xf32> to vector<2x1xf32>
    %425 = tpu.reciprocal %424 {approx = true} : vector<2x1xf32> -> vector<2x1xf32>
    %426 = vector.broadcast %425 : vector<2x1xf32> to vector<2x8xf32>
    %427 = arith.mulf %422, %426 : vector<2x8xf32>
    %428 = vector.shape_cast %427 : vector<2x8xf32> to vector<2x8x1xf32>
    %429 = vector.broadcast %428 : vector<2x8x1xf32> to vector<2x8x32xf32>
    %430 = arith.mulf %0, %429 : vector<2x8x32xf32>
    %cst_127 = arith.constant dense<0.000000e+00> : vector<2x32xf32>
    %431 = vector.multi_reduction <add>, %430, %cst_127 [1] : vector<2x8x32xf32> to vector<2x32xf32>
    %432 = arith.index_cast %370 : i32 to index
    %c0_128 = arith.constant 0 : index
    %433 = vector.load %arg18[%432, %c0_128] : memref<14x32xf32, #tpu.memory_space<vmem>>, vector<2x32xf32>
    tpu.vector_store %arg18[%432, %c0_128], %412 {strides = array<i32>} : memref<14x32xf32, #tpu.memory_space<vmem>>, vector<2x32xf32>,
    %434 = arith.index_cast %370 : i32 to index
    %c0_129 = arith.constant 0 : index
    %435 = vector.load %arg19[%434, %c0_129] : memref<14x32xf32, #tpu.memory_space<vmem>>, vector<2x32xf32>
    tpu.vector_store %arg19[%434, %c0_129], %431 {strides = array<i32>} : memref<14x32xf32, #tpu.memory_space<vmem>>, vector<2x32xf32>,
    %c6_i32 = arith.constant 6 : i32
    %c2_i32_130 = arith.constant 2 : i32
    %436 = arith.muli %c6_i32, %c2_i32_130 : i32
    %437 = tpu.assume_multiple %436, 2 : i32
    %438 = arith.index_cast %437 : i32 to index
    %c0_131 = arith.constant 0 : index
    %439 = vector.load %arg17[%438, %c0_131] : memref<14x32xf32, #tpu.memory_space<vmem>>, vector<2x32xf32>
    %cst_132 = arith.constant dense<0.000000e+00> : vector<2x128xf32>
    %440 = tpu.matmul %439, %4, %cst_132 {dimension_numbers = #tpu.dot_dimension_numbers<[1], [0], [0], [1], [0, 0, 1, 1], [], []>} : vector<2x32xf32>, vector<32x128xf32>, vector<2x128xf32> -> vector<2x128xf32>
    %cst_133 = arith.constant dense<0.000000e+00> : vector<2x128xf32>
    %441 = tpu.matmul %431, %5, %cst_133 {dimension_numbers = #tpu.dot_dimension_numbers<[1], [0], [0], [1], [0, 0, 1, 1], [], []>} : vector<2x32xf32>, vector<32x128xf32>, vector<2x128xf32> -> vector<2x128xf32>
    %442 = arith.addf %440, %441 : vector<2x128xf32>
    %cst_134 = arith.constant dense<0.000000e+00> : vector<2x128xf32>
    %443 = tpu.matmul %393, %6, %cst_134 {dimension_numbers = #tpu.dot_dimension_numbers<[1], [0], [0], [1], [0, 0, 1, 1], [], []>} : vector<2x32xf32>, vector<32x128xf32>, vector<2x128xf32> -> vector<2x128xf32>
    %444 = arith.addf %442, %443 : vector<2x128xf32>
    %445 = arith.addf %444, %11 : vector<2x128xf32>
    %446 = arith.negf %445 : vector<2x128xf32>
    %447 = math.exp %446 : vector<2x128xf32>
    %cst_135 = arith.constant 1.000000e+00 : f32
    %448 = vector.broadcast %cst_135 : f32 to vector<2x128xf32>
    %449 = arith.addf %448, %447 : vector<2x128xf32>
    %450 = arith.divf %448, %449 : vector<2x128xf32>
    %451 = math.tanh %445 : vector<2x128xf32>
    %452 = vector.extract_strided_slice %450 {offsets = [0, 32], sizes = [2, 32], strides = [1, 1]} : vector<2x128xf32> to vector<2x32xf32>
    %453 = arith.mulf %452, %390 : vector<2x32xf32>
    %454 = vector.extract_strided_slice %450 {offsets = [0, 0], sizes = [2, 32], strides = [1, 1]} : vector<2x128xf32> to vector<2x32xf32>
    %455 = vector.extract_strided_slice %451 {offsets = [0, 64], sizes = [2, 32], strides = [1, 1]} : vector<2x128xf32> to vector<2x32xf32>
    %456 = arith.mulf %454, %455 : vector<2x32xf32>
    %457 = arith.addf %453, %456 : vector<2x32xf32>
    %458 = vector.extract_strided_slice %450 {offsets = [0, 96], sizes = [2, 32], strides = [1, 1]} : vector<2x128xf32> to vector<2x32xf32>
    %459 = math.tanh %457 : vector<2x32xf32>
    %460 = arith.mulf %458, %459 : vector<2x32xf32>
    %cst_136 = arith.constant dense<0.000000e+00> : vector<2x128xf32>
    %461 = tpu.matmul %460, %7, %cst_136 {dimension_numbers = #tpu.dot_dimension_numbers<[1], [0], [0], [1], [0, 0, 1, 1], [], []>} : vector<2x32xf32>, vector<32x128xf32>, vector<2x128xf32> -> vector<2x128xf32>
    %cst_137 = arith.constant dense<0.000000e+00> : vector<2x128xf32>
    %462 = tpu.matmul %412, %8, %cst_137 {dimension_numbers = #tpu.dot_dimension_numbers<[1], [0], [0], [1], [0, 0, 1, 1], [], []>} : vector<2x32xf32>, vector<32x128xf32>, vector<2x128xf32> -> vector<2x128xf32>
    %463 = arith.addf %461, %462 : vector<2x128xf32>
    %464 = arith.addf %463, %14 : vector<2x128xf32>
    %465 = arith.negf %464 : vector<2x128xf32>
    %466 = math.exp %465 : vector<2x128xf32>
    %cst_138 = arith.constant 1.000000e+00 : f32
    %467 = vector.broadcast %cst_138 : f32 to vector<2x128xf32>
    %468 = arith.addf %467, %466 : vector<2x128xf32>
    %469 = arith.divf %467, %468 : vector<2x128xf32>
    %470 = math.tanh %464 : vector<2x128xf32>
    %471 = vector.extract_strided_slice %469 {offsets = [0, 32], sizes = [2, 32], strides = [1, 1]} : vector<2x128xf32> to vector<2x32xf32>
    %472 = arith.mulf %471, %409 : vector<2x32xf32>
    %473 = vector.extract_strided_slice %469 {offsets = [0, 0], sizes = [2, 32], strides = [1, 1]} : vector<2x128xf32> to vector<2x32xf32>
    %474 = vector.extract_strided_slice %470 {offsets = [0, 64], sizes = [2, 32], strides = [1, 1]} : vector<2x128xf32> to vector<2x32xf32>
    %475 = arith.mulf %473, %474 : vector<2x32xf32>
    %476 = arith.addf %472, %475 : vector<2x32xf32>
    %477 = vector.extract_strided_slice %469 {offsets = [0, 96], sizes = [2, 32], strides = [1, 1]} : vector<2x128xf32> to vector<2x32xf32>
    %478 = math.tanh %476 : vector<2x32xf32>
    %479 = arith.mulf %477, %478 : vector<2x32xf32>
    %480 = vector.shape_cast %479 : vector<2x32xf32> to vector<2x1x32xf32>
    %481 = vector.broadcast %480 : vector<2x1x32xf32> to vector<2x8x32xf32>
    %482 = arith.mulf %0, %481 : vector<2x8x32xf32>
    %cst_139 = arith.constant dense<0.000000e+00> : vector<2x8xf32>
    %483 = vector.multi_reduction <add>, %482, %cst_139 [2] : vector<2x8x32xf32> to vector<2x8xf32>
    %484 = arith.addf %483, %1 : vector<2x8xf32>
    %cst_140 = arith.constant dense<0xFF800000> : vector<2xf32>
    %485 = vector.multi_reduction <maximumf>, %484, %cst_140 [1] : vector<2x8xf32> to vector<2xf32>
    %486 = vector.shape_cast %485 : vector<2xf32> to vector<2x1xf32>
    %487 = vector.broadcast %486 : vector<2x1xf32> to vector<2x8xf32>
    %488 = arith.subf %484, %487 : vector<2x8xf32>
    %489 = math.exp %488 : vector<2x8xf32>
    %cst_141 = arith.constant dense<0.000000e+00> : vector<2xf32>
    %490 = vector.multi_reduction <add>, %489, %cst_141 [1] : vector<2x8xf32> to vector<2xf32>
    %491 = vector.shape_cast %490 : vector<2xf32> to vector<2x1xf32>
    %492 = tpu.reciprocal %491 {approx = true} : vector<2x1xf32> -> vector<2x1xf32>
    %493 = vector.broadcast %492 : vector<2x1xf32> to vector<2x8xf32>
    %494 = arith.mulf %489, %493 : vector<2x8xf32>
    %495 = vector.shape_cast %494 : vector<2x8xf32> to vector<2x8x1xf32>
    %496 = vector.broadcast %495 : vector<2x8x1xf32> to vector<2x8x32xf32>
    %497 = arith.mulf %0, %496 : vector<2x8x32xf32>
    %cst_142 = arith.constant dense<0.000000e+00> : vector<2x32xf32>
    %498 = vector.multi_reduction <add>, %497, %cst_142 [1] : vector<2x8x32xf32> to vector<2x32xf32>
    %499 = arith.index_cast %437 : i32 to index
    %c0_143 = arith.constant 0 : index
    %500 = vector.load %arg18[%499, %c0_143] : memref<14x32xf32, #tpu.memory_space<vmem>>, vector<2x32xf32>
    tpu.vector_store %arg18[%499, %c0_143], %479 {strides = array<i32>} : memref<14x32xf32, #tpu.memory_space<vmem>>, vector<2x32xf32>,
    %501 = arith.index_cast %437 : i32 to index
    %c0_144 = arith.constant 0 : index
    %502 = vector.load %arg19[%501, %c0_144] : memref<14x32xf32, #tpu.memory_space<vmem>>, vector<2x32xf32>
    tpu.vector_store %arg19[%501, %c0_144], %498 {strides = array<i32>} : memref<14x32xf32, #tpu.memory_space<vmem>>, vector<2x32xf32>,
    %c7_i32 = arith.constant 7 : i32
    %c0_145 = arith.constant 0 : index
    %c0_146 = arith.constant 0 : index
    %503 = vector.load %arg18[%c0_145, %c0_146] : memref<14x32xf32, #tpu.memory_space<vmem>>, vector<14x32xf32>
    %cst_147 = arith.constant dense<0.000000e+00> : vector<14x32xf32>
    %504 = tpu.matmul %503, %15, %cst_147 {dimension_numbers = #tpu.dot_dimension_numbers<[1], [0], [0], [1], [0, 0, 1, 1], [], []>} : vector<14x32xf32>, vector<32x32xf32>, vector<14x32xf32> -> vector<14x32xf32>
    %c0_148 = arith.constant 0 : index
    %c0_149 = arith.constant 0 : index
    %505 = vector.load %arg19[%c0_148, %c0_149] : memref<14x32xf32, #tpu.memory_space<vmem>>, vector<14x32xf32>
    %cst_150 = arith.constant dense<0.000000e+00> : vector<14x32xf32>
    %506 = tpu.matmul %505, %16, %cst_150 {dimension_numbers = #tpu.dot_dimension_numbers<[1], [0], [0], [1], [0, 0, 1, 1], [], []>} : vector<14x32xf32>, vector<32x32xf32>, vector<14x32xf32> -> vector<14x32xf32>
    %507 = arith.addf %504, %506 : vector<14x32xf32>
    %508 = vector.broadcast %17 : vector<1x32xf32> to vector<14x32xf32>
    %509 = arith.addf %507, %508 : vector<14x32xf32>
    %510 = math.tanh %509 : vector<14x32xf32>
    %cst_151 = arith.constant dense<0.000000e+00> : vector<14x64xf32>
    %511 = tpu.matmul %510, %3, %cst_151 {dimension_numbers = #tpu.dot_dimension_numbers<[1], [0], [0], [1], [0, 0, 1, 1], [], []>} : vector<14x32xf32>, vector<32x64xf32>, vector<14x64xf32> -> vector<14x64xf32>
    %cst_152 = arith.constant dense<0xFF800000> : vector<14xf32>
    %512 = vector.multi_reduction <maximumf>, %511, %cst_152 [1] : vector<14x64xf32> to vector<14xf32>
    %513 = vector.shape_cast %512 : vector<14xf32> to vector<14x1xf32>
    %514 = vector.broadcast %513 : vector<14x1xf32> to vector<14x64xf32>
    %515 = arith.subf %511, %514 : vector<14x64xf32>
    %516 = math.exp %515 : vector<14x64xf32>
    %cst_153 = arith.constant dense<0.000000e+00> : vector<14xf32>
    %517 = vector.multi_reduction <add>, %516, %cst_153 [1] : vector<14x64xf32> to vector<14xf32>
    %518 = vector.shape_cast %517 : vector<14xf32> to vector<14x1xf32>
    %519 = math.log %518 : vector<14x1xf32>
    %520 = arith.addf %513, %519 : vector<14x1xf32>
    %521 = vector.extract_strided_slice %18 {offsets = [2, 0], sizes = [14, 1], strides = [1, 1]} : vector<16x1xi32> to vector<14x1xi32>
    %522 = vector.broadcast %521 : vector<14x1xi32> to vector<14x64xi32>
    %523 = arith.cmpi eq, %19, %522 : vector<14x64xi32>
    %524 = arith.extui %523 : vector<14x64xi1> to vector<14x64xi32>
    %525 = arith.sitofp %524 : vector<14x64xi32> to vector<14x64xf32>
    %526 = arith.mulf %525, %511 : vector<14x64xf32>
    %cst_154 = arith.constant dense<0.000000e+00> : vector<14xf32>
    %527 = vector.multi_reduction <add>, %526, %cst_154 [1] : vector<14x64xf32> to vector<14xf32>
    %528 = vector.shape_cast %527 : vector<14xf32> to vector<14x1xf32>
    %529 = arith.subf %520, %528 : vector<14x1xf32>
    %530 = vector.shape_cast %529 : vector<14x1xf32> to vector<1x14x1xf32>
    %cst_155 = arith.constant dense<0.000000e+00> : vector<1xf32>
    %531 = vector.multi_reduction <add>, %530, %cst_155 [1, 2] : vector<1x14x1xf32> to vector<1xf32>
    %532 = vector.shape_cast %531 : vector<1xf32> to vector<1x1x1xf32>
    %533 = vector.extract %532[0, 0, 0] : f32 from vector<1x1x1xf32>
    %534 = vector.broadcast %533 : f32 to vector<1x1xf32>
    %c0_156 = arith.constant 0 : index
    %c0_157 = arith.constant 0 : index
    %535 = vector.load %arg16[%c0_156, %c0_157] : memref<1x1xf32, #tpu.memory_space<vmem>>, vector<1x1xf32>
    tpu.vector_store %arg16[%c0_156, %c0_157], %534 {strides = array<i32>} : memref<1x1xf32, #tpu.memory_space<vmem>>, vector<1x1xf32>,
    return
  }
}

</mosaic_0001>

<bundles_post_ra>
// kernel: tpu_custom_call.1
= control target key start
LH: loop header
LB: loop body
LE: loop exit
PB: predicated region body
PF: predicated region fallthrough
CT: control target
= control target key end

     0   :  { %s7000_s0 = inlined_call_operand.vmem [shape: s32[16,1], index: 0, kind: input, shape index: {}]   ;;  %s7001_s1 = inlined_call_operand.hbm [shape: f32[2,2,32], index: 1, kind: input, shape index: {}]   ;;  %s7002_s2 = inlined_call_operand.hbm [shape: f32[2,8,32], index: 2, kind: input, shape index: {}]   ;;  %s7003_s3 = inlined_call_operand.hbm [shape: f32[2,8], index: 3, kind: input, shape index: {}]   ;;  %s7004_s4 = inlined_call_operand.vmem [shape: f32[64,32], index: 4, kind: input, shape index: {}]   ;;  %s7005_s5 = inlined_call_operand.vmem [shape: f32[32,128], index: 5, kind: input, shape index: {}]   ;;  %s7006_s6 = inlined_call_operand.vmem [shape: f32[32,128], index: 6, kind: input, shape index: {}]   ;;  %s7007_s7 = inlined_call_operand.vmem [shape: f32[32,128], index: 7, kind: input, shape index: {}]   ;;  %s7008_s8 = inlined_call_operand.vmem [shape: f32[1,128], index: 8, kind: input, shape index: {}]   ;;  %s7009_s9 = inlined_call_operand.vmem [shape: f32[32,128], index: 9, kind: input, shape index: {}]   ;;  %s7010_s10 = inlined_call_operand.hbm [shape: f32[32,128], index: 10, kind: input, shape index: {}]   ;;  %s7011_s11 = inlined_call_operand.vmem [shape: f32[1,128], index: 11, kind: input, shape index: {}]   ;;  %s7012_s12 = inlined_call_operand.hbm [shape: f32[32,32], index: 12, kind: input, shape index: {}]   ;;  %s7013_s13 = inlined_call_operand.hbm [shape: f32[32,32], index: 13, kind: input, shape index: {}]   ;;  %s7014_s14 = inlined_call_operand.vmem [shape: f32[1,32], index: 14, kind: input, shape index: {}]   ;;  %s7015_s15 = inlined_call_operand.hbm [shape: f32[32,64], index: 15, kind: input, shape index: {}]   ;;  %s7016_s16 = inlined_call_operand.hbm [shape: f32[1,1], index: 16, kind: output, shape index: {}]  }
   0x1   :  { %7018 = sst [smem:[#allocation23_spill]] %s7000_s0 }
   0x2   :  { %21 = vsyncpa [#allocation6], 0 }
   0x3   :  { %22 = vsyncpa [#allocation9], 0 }
   0x4   :  { %23 = vsyncpa [#allocation12], 0 }
   0x5   :  { %24 = vsyncpa [#allocation15], 0 }
   0x6   :  { %25 = vsyncpa [#allocation7], 0  ;;  %s5774_s21 = smov [#allocation8]  }
   0x7   :  { %s45_s22 = sshll.u32 %s5774_s21, 4  ;;  %s46_s22 = int_to_ptr.vmem [resolvable:$true] %s45_s22 }
   0x8   :  { %s5612_s23 = scalar_lea.vmem %s46_s22, 256  ;;  %p5617_p1 = scmp.lt.s32.totalorder %s46_s22, %s46_s22 }
   0x9   :  { %p5613_p0 = scmp.ne.s32.totalorder %s46_s22, %s5612_s23  ;;  %p5618_p2 = scmp.lt.s32.totalorder %s5612_s23, %s5612_s23 }
   0xb   :  { %p5619_p3 = por %p5618_p2, %p5617_p1 }
   0xd   :  { %p5620_p4 = pnand %p5619_p3, %p5613_p0 }
   0xf   :  { %5623 = shalt.err (!%p5620_p4)
}
  0x10   :  { %s5775_s24 = smov 128   ;;  %s5776_s25 = smov 8  }
  0x11   :  { %51 = dma.hbm_to_vmem [thread:$0]  %s7002_s2, 256, %s46_s22, [#allocation9], %s5775_s24, %s5775_s24, %s5776_s25  }
  0x12   :  { %s5777_s28 = smov [#allocation11]   ;;  %s5778_s30 = smov [#allocation14]  }
  0x13   :  { %s79_s29 = sshll.u32 %s5777_s28, 4  ;;  %s105_s0 = sshll.u32 %s5778_s30, 4  ;;  %s80_s29 = int_to_ptr.vmem [resolvable:$true] %s79_s29  ;;  %s106_s0 = int_to_ptr.vmem [resolvable:$true] %s105_s0 }
  0x14   :  { %s5632_s17 = scalar_lea.vmem %s80_s29, 512  ;;  %p5637_p6 = scmp.lt.s32.totalorder %s80_s29, %s80_s29 }
  0x15   :  { %p5633_p5 = scmp.ne.s32.totalorder %s80_s29, %s5632_s17  ;;  %p5638_p7 = scmp.lt.s32.totalorder %s5632_s17, %s5632_s17 }
  0x17   :  { %p5639_p8 = por %p5638_p7, %p5637_p6 }
  0x19   :  { %p5640_p9 = pnand %p5639_p8, %p5633_p5 }
  0x1b   :  { %5643 = shalt.err (!%p5640_p9)
}
  0x1c   :  { %85 = dma.hbm_to_vmem [thread:$0]  %s7010_s10, 512, %s80_s29, [#allocation12], %s5775_s24, %s5775_s24, %s5776_s25  }
  0x1d   :  { %s5652_s2 = scalar_lea.vmem %s106_s0, 512  ;;  %p5657_p11 = scmp.lt.s32.totalorder %s106_s0, %s106_s0 }
  0x1e   :  { %p5653_p10 = scmp.ne.s32.totalorder %s106_s0, %s5652_s2  ;;  %p5658_p12 = scmp.lt.s32.totalorder %s5652_s2, %s5652_s2 }
  0x20   :  { %p5659_p13 = por %p5658_p12, %p5657_p11 }
  0x22   :  { %p5660_p0 = pnand %p5659_p13, %p5653_p10 }
  0x24   :  { %5663 = shalt.err (!%p5660_p0)
}
  0x25   :  { %111 = dma.hbm_to_vmem [thread:$0]  %s7013_s13, 512, %s106_s0, [#allocation15], %s5775_s24, %s5775_s24, %s5776_s25  }
  0x26   :  { %s5779_s22 = smov [#allocation5]  }
  0x27   :  { %s33_s23 = sshll.u32 %s5779_s22, 4  ;;  %s34_s23 = int_to_ptr.vmem [resolvable:$true] %s33_s23 }
  0x28   :  { %s5672_s26 = scalar_lea.vmem %s34_s23, 64  ;;  %p5677_p2 = scmp.lt.s32.totalorder %s34_s23, %s34_s23 }
  0x29   :  { %p5673_p1 = scmp.ne.s32.totalorder %s34_s23, %s5672_s26  ;;  %p5678_p3 = scmp.lt.s32.totalorder %s5672_s26, %s5672_s26 }
  0x2b   :  { %p5679_p4 = por %p5678_p3, %p5677_p2 }
  0x2d   :  { %p5680_p5 = pnand %p5679_p4, %p5673_p1 }
  0x2f   :  { %5683 = shalt.err (!%p5680_p5)
}
  0x30   :  { %s5780_s10 = smov 32   ;;  %s5781_s27 = smov 2  }
  0x31   :  { %39 = dma.hbm_to_vmem [thread:$0]  %s7001_s1, 64, %s34_s23, [#allocation6], %s5780_s10, %s5780_s10, %s5781_s27  }
  0x32   :  { %s5782_s30 = smov [#allocation10]   ;;  %s5783_s0 = smov [#allocation13]  }
  0x33   :  { %s58_s13 = sshll.u32 %s5782_s30, 4  ;;  %s93_s17 = sshll.u32 %s5783_s0, 4  ;;  %s59_s13 = int_to_ptr.vmem [resolvable:$true] %s58_s13  ;;  %s94_s17 = int_to_ptr.vmem [resolvable:$true] %s93_s17 }
  0x34   :  { %s5692_s18 = scalar_lea.vmem %s59_s13, 32  ;;  %p5697_p7 = scmp.lt.s32.totalorder %s59_s13, %s59_s13 }
  0x35   :  { %p5693_p6 = scmp.ne.s32.totalorder %s59_s13, %s5692_s18  ;;  %p5698_p8 = scmp.lt.s32.totalorder %s5692_s18, %s5692_s18 }
  0x37   :  { %p5699_p9 = por %p5698_p8, %p5697_p7 }
  0x39   :  { %p5700_p10 = pnand %p5699_p9, %p5693_p6 }
  0x3b   :  { %5703 = shalt.err (!%p5700_p10)
}
  0x3c   :  { %61 = dma.hbm_to_vmem [thread:$0]  %s7003_s3, 32, %s59_s13, [#allocation9]  }
  0x3d   :  { %s5712_s20 = scalar_lea.vmem %s94_s17, 512  ;;  %p5717_p12 = scmp.lt.s32.totalorder %s94_s17, %s94_s17 }
  0x3e   :  { %p5713_p11 = scmp.ne.s32.totalorder %s94_s17, %s5712_s20  ;;  %p5718_p13 = scmp.lt.s32.totalorder %s5712_s20, %s5712_s20 }
  0x40   :  { %p5719_p0 = por %p5718_p13, %p5717_p12 }
  0x42   :  { %p5720_p1 = pnand %p5719_p0, %p5713_p11 }
  0x44   :  { %5723 = shalt.err (!%p5720_p1)
}
  0x45   :  { %99 = dma.hbm_to_vmem [thread:$0]  %s7012_s12, 512, %s94_s17, [#allocation12], %s5775_s24, %s5775_s24, %s5776_s25  }
  0x46   :  { %s5784_s22 = smov [#allocation16]  }
  0x47   :  { %s119_s23 = sshll.u32 %s5784_s22, 4  ;;  %s120_s23 = int_to_ptr.vmem [resolvable:$true] %s119_s23 }
  0x48   :  { %s5732_s26 = scalar_lea.vmem %s120_s23, 512  ;;  %p5737_p3 = scmp.lt.s32.totalorder %s120_s23, %s120_s23 }
  0x49   :  { %p5733_p2 = scmp.ne.s32.totalorder %s120_s23, %s5732_s26  ;;  %p5738_p4 = scmp.lt.s32.totalorder %s5732_s26, %s5732_s26 }
  0x4b   :  { %p5739_p5 = por %p5738_p4, %p5737_p3 }
  0x4d   :  { %p5740_p6 = pnand %p5739_p5, %p5733_p2 }
  0x4f   :  { %5743 = shalt.err (!%p5740_p6)
}
  0x50   :  { %125 = dma.hbm_to_vmem [thread:$0]  %s7015_s15, 512, %s120_s23, [#allocation15], %s5775_s24, %s5775_s24, %s5776_s25  }
  0x51   :  { %5764 = dma.done.wait [#allocation6], 64  }
  0x52   :  { %5765 = vsyncadd [#allocation6], 4294967232 }
  0x53   :  { %5766 = dma.done.wait [#allocation9], 288  }
  0x54   :  { %5767 = vsyncadd [#allocation9], 4294967008 }
  0x55   :  { %5768 = dma.done.wait [#allocation12], 1024  }
  0x56   :  { %5769 = vsyncadd [#allocation12], 4294966272 }
  0x57   :  { %5770 = dma.done.wait [#allocation15], 1024  }
  0x58   :  { %5771 = vsyncadd [#allocation15], 4294966272  ;;  %v5785_v0 = vmov 0   ;;  %v5786_v1 = vmov 0.0   ;;  %s7019_s29 = sld [smem:[#allocation23_spill]]  ;;  %v157_v3 = vld [vmem:[%s7004_s4 + $0x38] sm:$0xff]  ;;  %v207_v15 = vlaneseq }
  0x59   :  { %5400 = vset.pattern.permute.xlu0 %v5785_v0  ;;  %5401 = vset.pattern.permute.xlu1 %v5785_v0  ;;  %v156_v4 = vld [vmem:[%s7004_s4 + $0x30] sm:$0xff]  ;;  %v155_v6 = vld [vmem:[%s7004_s4 + $0x28] sm:$0xff]  ;;  %v5933_v7 = vld [vmem:[%s7006_s6 + $0x18] sm:$0xff]  ;;  %vm221_vm0 = vcmask 523264   ;;  %vm5787_vm3 = vmmov 0   ;;  %vm303_vm4 = vcmask 261120  }
  0x5a   :  { %4963 = vmatprep.subr.mxu1 %v5786_v1  ;;  %4944 = vmatprep.subr.mxu0 %v157_v3  ;;  %v154_v8 = vld [vmem:[%s7004_s4 + $0x20] sm:$0xff]  ;;  %v5942_v9 = vld [vmem:[%s7006_s6 + $0x10] sm:$0xff]  ;;  %v153_v10 = vld [vmem:[%s7004_s4 + $0x18] sm:$0xff]  ;;  %v5968_v16 = vand.u32 127, %v207_v15  ;;  %vm305_vm5 = vcmask 259072   ;;  %s5788_s15 = smov 64  }
  0x5b   :  { %4945 = vmatpush3.msra.mxu0 %v157_v3  ;;  %4964 = vmatpush3.msra.mxu1 %v5933_v7  ;;  %v5951_v11 = vld [vmem:[%s7006_s6 + $0x8] sm:$0xff]  ;;  %v152_v12 = vld [vmem:[%s7004_s4 + $0x10] sm:$0xff]  ;;  %v150_v14 = vld [vmem:[%s7004_s4] sm:$0xff]  ;;  %vm809_vm6 = vcmask 1041409   ;;  %vm812_vm7 = vcmask 58368   ;;  %vm897_vm8 = vcmask 254976  }
  0x5c   :  { %4946 = vmatprep.subr.mxu0 %v156_v4  ;;  %4965 = vmatprep.subr.mxu1 %v5786_v1  ;;  %v151_v13 = vld [vmem:[%s7004_s4 + $0x8] sm:$0xff]  ;;  %v5985_v21 = vld [vmem:[%s7006_s6] sm:$0xff]  ;;  %v5995_v22 = vld [vmem:[%s7005_s5 + $0x18] sm:$0xff]  ;;  %vm4596_vm9 = vcmask 521216   ;;  %vm4620_vm10 = vcmask 1041408   ;;  %vm4628_vm11 = vcmask 523266  }
  0x5d   :  { %4947 = vmatpush3.msra.mxu0 %v156_v4  ;;  %4966 = vmatpush3.msra.mxu1 %v5942_v9  ;;  %v6000_v23 = vld [vmem:[%s7007_s7 + $0x18] sm:$0xff]  ;;  %v6005_v24 = vld [vmem:[%s7005_s5 + $0x10] sm:$0xff]  ;;  %v6023_v26 = vld [vmem:[%s7005_s5 + $0x8] sm:$0xff]  ;;  %vm4637_vm12 = vcmask 1045504   ;;  %vm4647_vm13 = vcmask 5120   ;;  %vm4645_vm14 = vcmask 7168  }
  0x5e   :  { %v205_v2 = vld [vmem:[%s7019_s29] sm:$0xff]  ;;  %v206_v5 = vld [vmem:[%s7019_s29 + $0x8] sm:$0xff]  ;;  %4948 = vmatprep.subr.mxu0 %v155_v6  ;;  %4967 = vmatprep.subr.mxu1 %v5786_v1  ;;  %v6016_v25 = vld [vmem:[%s7007_s7 + $0x10] sm:$0xff]  ;;  %vm4660_vm15 = vcmask 0  }
  0x5f   :  { %210 = vperm.xlu0 %5400, %v205_v2   ;;  %4949 = vmatpush3.msra.mxu0 %v155_v6  ;;  %v6028_v27 = vld [vmem:[%s7007_s7 + $0x8] sm:$0xff]  ;;  %v6037_v28 = vld [vmem:[%s7005_s5] sm:$0xff]  ;;  %v307_v30 = vld [vmem:[#allocation5] sm:$0x3] }
  0x60   :  { %4950 = vmatprep.subr.mxu0 %v154_v8  ;;  %4968 = vmatpush3.msra.mxu1 %v5951_v11  ;;  %v6042_v29 = vld [vmem:[%s7007_s7] sm:$0xff]  ;;  %v6075_v55 = vld [vmem:[%s7009_s9 + $0x18] sm:$0xff]  ;;  %v6084_v57 = vld [vmem:[%s7009_s9 + $0x10] sm:$0xff] }
  0x61   :  { %4951 = vmatpush3.msra.mxu0 %v154_v8  ;;  %4969 = vmatprep.subr.mxu1 %v5786_v1  ;;  %v6062_v40 = vld [vmem:[%s7008_s8] ss:$0 sm:$0xff]  ;;  %v6077_v56 = vld [vmem:[#allocation11 + $0x10] sm:$0xff]  ;;  %v6088_v58 = vld [vmem:[#allocation11 + $0x8] sm:$0xff] }
  0x62   :  { %4952 = vmatprep.subr.mxu0 %v153_v10  ;;  %4970 = vmatpush3.msra.mxu1 %v5985_v21  ;;  %v6070_v54 = vld [vmem:[#allocation11 + $0x18] sm:$0xff]  ;;  %v6093_v59 = vld [vmem:[%s7009_s9 + $0x8] sm:$0xff]  ;;  %v309_v62 = vld [vmem:[#allocation5 + $0x2] sm:$0x3] }
  0x63   :  { %213 = vperm.xlu0 %5400, %v206_v5   ;;  %4953 = vmatpush3.msra.mxu0 %v153_v10  ;;  %v6099_v60 = vld [vmem:[#allocation11] sm:$0xff]  ;;  %v6155_v8 = vld [vmem:[%s7011_s11] ss:$0 sm:$0xff] }
  0x64   :  { %4954 = vmatprep.subr.mxu0 %v152_v12  ;;  %4971 = vmatprep.mubr.msk.f32.mxu1 %vm5787_vm3, %v5786_v1  ;;  %v6104_v61 = vld [vmem:[%s7009_s9] sm:$0xff] }
  0x65   :  { %4955 = vmatpush3.msra.mxu0 %v152_v12  ;;  %4972 = vmatmul.mubr.f32.vlgmr.msra.gmra.mxu1 %v5786_v1 }
  0x66   :  { %4956 = vmatprep.subr.mxu0 %v151_v13  ;;  %4974 = vmatprep.subr.mxu1 %v5786_v1 }
  0x67   :  { %4957 = vmatpush3.msra.mxu0 %v151_v13  ;;  %4982 = vmatprep.mubr.msk.f32.mxu1 %vm5787_vm3, %v5786_v1 }
  0x68   :  { %4958 = vmatprep.subr.mxu0 %v150_v14  ;;  %4975 = vmatpush3.msra.mxu1 %v5995_v22 }
  0x69   :  { %4959 = vmatpush3.msra.mxu0 %v150_v14  ;;  %4976 = vmatprep.subr.mxu1 %v5786_v1 }
  0x6a   :  { %4985 = vmatprep.subr.mxu0 %v5786_v1  ;;  %4977 = vmatpush3.msra.mxu1 %v6005_v24 }
  0x6b   :  { %4978 = vmatprep.subr.mxu1 %v5786_v1 }
  0x6c   :  { %4979 = vmatpush3.msra.mxu1 %v6023_v26 }
  0x6d   :  { %4980 = vmatprep.subr.mxu1 %v5786_v1 }
  0x6e   :  { %4981 = vmatpush3.msra.mxu1 %v6037_v28 }
  0x6f   :  { %4996 = vmatprep.subr.mxu1 %v5786_v1 }
  0xda   :  { %v211_v17 = vpop.permute.xlu0 %210 }
  0xdb   :  { %vm215_vm1 = vcmp.eq.s32.totalorder %v5968_v16, %v211_v17 }
  0xdc   :  { %v5972_v18 = vsel %vm215_vm1, 1.0, %v5786_v1 }
  0xdd   :  { %4960 = vmatprep.mubr.msk.f32.mxu0 %vm221_vm0, %v5972_v18 }
  0xde   :  { %v214_v19 = vpop.permute.xlu0 %213 }
  0xdf   :  { %vm216_vm2 = vcmp.eq.s32.totalorder %v5968_v16, %v214_v19 }
  0xe0   :  { %v5978_v20 = vsel %vm216_vm2, 1.0, %v5786_v1 }
  0xe1   :  { %4961 = vmatmul.mubr.msk.f32.vlgmr.msra.gmra.mxu0 %vm221_vm0, %v5978_v20 }
  0xe2   :  { %4993 = vmatprep.mubr.msk.f32.mxu0 %vm5787_vm3, %v5786_v1  ;;  %4986 = vmatpush3.msra.mxu0 %v6000_v23 }
  0xe3   :  { %4987 = vmatprep.subr.mxu0 %v5786_v1 }
  0xe4   :  { %4988 = vmatpush3.msra.mxu0 %v6016_v25 }
  0xe5   :  { %4989 = vmatprep.subr.mxu0 %v5786_v1 }
  0xe6   :  { %4990 = vmatpush3.msra.mxu0 %v6028_v27 }
  0xe7   :  { %4991 = vmatprep.subr.mxu0 %v5786_v1 }
  0xe8   :  { %4992 = vmatpush3.msra.mxu0 %v6042_v29 }
  0xe9   :  { %4994 = vmatmul.mubr.msk.f32.vlgmr.msra.gmra.mxu0 %vm303_vm4, %v307_v30  ;;  %5007 = vmatprep.subr.mxu0 %v5786_v1 }
  0xea   :  { %5015 = vmatprep.mubr.msk.f32.mxu0 %vm5787_vm3, %v5786_v1  ;;  %5008 = vmatpush3.msra.mxu0 %v6075_v55 }
  0xeb   :  { %5009 = vmatprep.subr.mxu0 %v5786_v1 }
  0xec   :  { %5010 = vmatpush3.msra.mxu0 %v6084_v57 }
  0xed   :  { %5011 = vmatprep.subr.mxu0 %v5786_v1 }
  0xee   :  { %5012 = vmatpush3.msra.mxu0 %v6093_v59 }
  0xef   :  { %5013 = vmatprep.subr.mxu0 %v5786_v1 }
  0xf0   :  { %5014 = vmatpush3.msra.mxu0 %v6104_v61 }
  0xf1   :  { %5029 = vmatprep.subr.mxu0 %v5786_v1 }
 0x125   :  { %v380_v34 = vpop.f32.mrf.mxu1 }
 0x127   :  { %v4973_v35 = vpop.f32.mrf.mxu1 }
 0x1a1   :  { %v4962_v31 = vpop.f32.mrf.mxu0 }
 0x1a2   :  { %306 = vst.msk [vmem:[#allocation2 + $0x8] sm:$0x3f] %vm305_vm5, %v4962_v31 }
 0x1a3   :  { %v294_v32 = vpop.f32.mrf.mxu0 }
 0x1a4   :  { %304 = vst.msk [vmem:[#allocation2] sm:$0xff] %vm303_vm4, %v294_v32 }
 0x1a9   :  { %v526_v36 = vpop.f32.mrf.mxu0 }
 0x1ab   :  { %v310_v33 = vld [vmem:[#allocation2] sm:$0x3]  ;;  %v4995_v37 = vpop.f32.mrf.mxu0  ;;  %v905_v6 = vld [vmem:[#allocation2 + $0x2] sm:$0x3] }
 0x1ac   :  { %4983 = vmatmul.mubr.msk.f32.vlgmr.msra.gmra.mxu1 %vm303_vm4, %v310_v33 }
 0x1ad   :  { %5004 = vmatprep.mubr.msk.f32.mxu1 %vm5787_vm3, %v5786_v1  ;;  %4997 = vmatpush3.msra.mxu1 %v6070_v54 }
 0x1ae   :  { %4998 = vmatprep.subr.mxu1 %v5786_v1 }
 0x1af   :  { %4999 = vmatpush3.msra.mxu1 %v6077_v56 }
 0x1b0   :  { %5000 = vmatprep.subr.mxu1 %v5786_v1 }
 0x1b1   :  { %5001 = vmatpush3.msra.mxu1 %v6088_v58 }
 0x1b2   :  { %5002 = vmatprep.subr.mxu1 %v5786_v1 }
 0x1b3   :  { %5003 = vmatpush3.msra.mxu1 %v6099_v60 }
 0x1b4   :  { %5005 = vmatmul.mubr.msk.f32.vlgmr.msra.gmra.mxu1 %vm303_vm4, %v309_v62  ;;  %5018 = vmatprep.subr.mxu1 %v5786_v1 }
 0x1b5   :  { %5026 = vmatprep.mubr.msk.f32.mxu1 %vm5787_vm3, %v5786_v1  ;;  %5019 = vmatpush3.msra.mxu1 %v5933_v7 }
 0x1b6   :  { %5020 = vmatprep.subr.mxu1 %v5786_v1 }
 0x1b7   :  { %5021 = vmatpush3.msra.mxu1 %v5942_v9 }
 0x1b8   :  { %5022 = vmatprep.subr.mxu1 %v5786_v1 }
 0x1b9   :  { %5023 = vmatpush3.msra.mxu1 %v5951_v11 }
 0x1ba   :  { %5024 = vmatprep.subr.mxu1 %v5786_v1 }
 0x1bb   :  { %5025 = vmatpush3.msra.mxu1 %v5985_v21 }
 0x1bc   :  { %5040 = vmatprep.subr.mxu1 %v5786_v1 }
 0x26c   :  { %v453_v38 = vpop.f32.mrf.mxu1 }
 0x26d   :  { %v454_v39 = vadd.f32 %v453_v38, %v380_v34 }
 0x26e   :  { %v4984_v41 = vpop.f32.mrf.mxu1 }
 0x26f   :  { %v530_v42 = vadd.f32 %v526_v36, %v454_v39 }
 0x271   :  { %v531_v43 = vadd.f32 %v6062_v40, %v530_v42  ;;  %v5789_v42 = vmov 1966171168  }
 0x273   :  { %5402 = vtanh.f32 %v531_v43  ;;  %v4688_v45 = vmul.f32 -1.442695, %v531_v43  ;;  %v731_v43 = vunpack.c.l.s4 %v5789_v42 }
 0x274   :  { %v625_v3 = vpop.f32.mrf.mxu1 }
 0x275   :  { %5404 = vpow2.f32 %v4688_v45  ;;  %v734_v45 = vshrl.u32 %v207_v15, 7 }
 0x276   :  { %v5006_v4 = vpop.f32.mrf.mxu1 }
 0x280   :  { %v5403_v44 = vpop.eup %5402 }
 0x281   :  { %541 = vrot.lane.b32.xlu1 %v5403_v44, %s5788_s15  ;;  %v732_v44 = vunpack.c.0.s8 %v731_v43 }
 0x282   :  { %v5405_v46 = vpop.eup %5404 }
 0x283   :  { %v535_v47 = vadd.f32 1.0, %v5405_v46  ;;  %v6167_v46 = vsub.s32 %v732_v44, %v734_v45 }
 0x285   :  { %5406 = vrcp.f32 %v535_v47 }
 0x292   :  { %v5407_v48 = vpop.eup %5406 }
 0x293   :  { %v539_v51 = vmul.f32 0.0, %v5407_v48 }
 0x2f3   :  { %v542_v49 = vpop.permute.xlu1 %541 }
 0x2f4   :  { %v544_v50 = vmul.f32 %v5407_v48, %v542_v49  ;;  %v6171_v49 = vsub.s32 0, %v734_v45 }
 0x2f6   :  { %546 = vrot.lane.b32.xlu1 %v544_v50, %s5780_s10 }
 0x368   :  { %v547_v52 = vpop.permute.xlu1 %546 }
 0x369   :  { %v6067_v53 = vadd.f32 %v547_v52, %v539_v51 }
 0x36b   :  { %5408 = vtanh.f32 %v6067_v53 }
 0x378   :  { %v5409_v63 = vpop.eup %5408 }
 0x379   :  { %552 = vrot.lane.b32.xlu0 %v5409_v63, %s5788_s15 }
 0x3eb   :  { %v553_v0 = vpop.permute.xlu0 %552 }
 0x3ec   :  { %v555_v2 = vmul.f32 %v5407_v48, %v553_v0  ;;  %v6181_v0 = vld [vmem:[#allocation8] sm:$0xff] }
 0x3ee   :  { %630 = vrot.lane.b32.xlu1 %v555_v2, %s5780_s10 }
 0x460   :  { %v6127_v5 = vpop.permute.xlu1 %630 }
 0x461   :  { %5016 = vmatmul.mubr.msk.f32.vlgmr.msra.gmra.mxu0 %vm303_vm4, %v6127_v5 }
 0x462   :  { %5030 = vmatpush3.msra.mxu0 %v5995_v22  ;;  %5037 = vmatprep.mubr.msk.f32.mxu0 %vm5787_vm3, %v5786_v1 }
 0x463   :  { %5031 = vmatprep.subr.mxu0 %v5786_v1 }
 0x464   :  { %5032 = vmatpush3.msra.mxu0 %v6005_v24 }
 0x465   :  { %5033 = vmatprep.subr.mxu0 %v5786_v1 }
 0x466   :  { %5034 = vmatpush3.msra.mxu0 %v6023_v26 }
 0x467   :  { %5035 = vmatprep.subr.mxu0 %v5786_v1 }
 0x468   :  { %5036 = vmatpush3.msra.mxu0 %v6037_v28 }
 0x469   :  { %5038 = vmatmul.mubr.msk.f32.vlgmr.msra.gmra.mxu0 %vm303_vm4, %v905_v6  ;;  %5051 = vmatprep.subr.mxu0 %v5786_v1 }
 0x46a   :  { %5052 = vmatpush3.msra.mxu0 %v6070_v54  ;;  %5059 = vmatprep.mubr.msk.f32.mxu0 %vm5787_vm3, %v5786_v1 }
 0x46b   :  { %5053 = vmatprep.subr.mxu0 %v5786_v1 }
 0x46c   :  { %5054 = vmatpush3.msra.mxu0 %v6077_v56 }
 0x46d   :  { %5055 = vmatprep.subr.mxu0 %v5786_v1 }
 0x46e   :  { %5056 = vmatpush3.msra.mxu0 %v6088_v58 }
 0x46f   :  { %5057 = vmatprep.subr.mxu0 %v5786_v1 }
 0x470   :  { %5058 = vmatpush3.msra.mxu0 %v6099_v60 }
 0x471   :  { %5073 = vmatprep.subr.mxu0 %v5786_v1 }
 0x521   :  { %v700_v10 = vpop.f32.mrf.mxu0 }
 0x522   :  { %v701_v12 = vadd.f32 %v700_v10, %v625_v3  ;;  %v6183_v3 = vld [vmem:[#allocation8 + $0x8] sm:$0xff] }
 0x523   :  { %v5017_v13 = vpop.f32.mrf.mxu0 }
 0x524   :  { %v704_v14 = vadd.f32 %v6155_v8, %v701_v12 }
 0x526   :  { %5410 = vtanh.f32 %v704_v14  ;;  %v4691_v31 = vmul.f32 -1.442695, %v704_v14  ;;  %v6189_v14 = vsub.s32 1, %v734_v45 }
 0x528   :  { %5412 = vpow2.f32 %v4691_v31 }
 0x529   :  { %v6158_v17 = vpop.f32.mrf.mxu0 }
 0x52b   :  { %v5039_v19 = vpop.f32.mrf.mxu0 }
 0x52c   :  { %v149_v19 = vld [vmem:[#allocation10] sm:$0x3] }
 0x52d   :  { %v778_v31 = vrot.slane %v149_v19, %v6171_v49 }
 0x533   :  { %v5411_v30 = vpop.eup %5410 }
 0x534   :  { %714 = vrot.lane.b32.xlu0 %v5411_v30, %s5788_s15  ;;  %v785_v30 = vrot.slane %v149_v19, %v6189_v14 }
 0x535   :  { %v5413_v32 = vpop.eup %5412 }
 0x536   :  { %v708_v33 = vadd.f32 1.0, %v5413_v32 }
 0x538   :  { %5414 = vrcp.f32 %v708_v33 }
 0x545   :  { %v5415_v34 = vpop.eup %5414 }
 0x546   :  { %v712_v37 = vmul.f32 0.0, %v5415_v34 }
 0x5a6   :  { %v715_v35 = vpop.permute.xlu0 %714 }
 0x5a7   :  { %v717_v36 = vmul.f32 %v5415_v34, %v715_v35 }
 0x5a9   :  { %719 = vrot.lane.b32.xlu1 %v717_v36, %s5780_s10 }
 0x61b   :  { %v720_v38 = vpop.permute.xlu1 %719 }
 0x61c   :  { %v6162_v39 = vadd.f32 %v720_v38, %v712_v37  ;;  %v6200_v38 = vsub.s32 %v5968_v16, %v734_v45 }
 0x61e   :  { %5416 = vtanh.f32 %v6162_v39 }
 0x62b   :  { %v5417_v41 = vpop.eup %5416 }
 0x62c   :  { %725 = vrot.lane.b32.xlu0 %v5417_v41, %s5788_s15 }
 0x69e   :  { %v726_v47 = vpop.permute.xlu0 %725 }
 0x69f   :  { %v6169_v48 = vmul.f32 %v5415_v34, %v726_v47 }
 0x6a1   :  { %v736_v50 = vrot.slane %v6169_v48, %v6167_v46 }
 0x6a3   :  { %v744_v51 = vrot.slane %v736_v50, %v6167_v46  ;;  %v737_v52 = vcombine.high %v736_v50, %v736_v50 }
 0x6a5   :  { %v755_v62 = vrot.slane %v744_v51, %v6171_v49  ;;  %v751_v63 = vrot.slane %v737_v52, %v6167_v46 }
 0x6a7   :  { %760 = vrot.lane.b32.xlu1 %v755_v62, %s5780_s10  ;;  %v759_v15 = vrot.slane %v751_v63, %v6171_v49 }
 0x6a9   :  { %762 = vrot.lane.b32.xlu0 %v759_v15, %s5780_s10 }
 0x719   :  { %v761_v2 = vpop.permute.xlu1 %760 }
 0x71a   :  { %v766_v4 = vmul.f32 %v761_v2, %v6181_v0 }
 0x71b   :  { %v763_v6 = vpop.permute.xlu0 %762 }
 0x71c   :  { %v767_v10 = vmul.f32 %v763_v6, %v6183_v3  ;;  %v768_v12 = vsel %vm303_vm4, %v766_v4, 0.0 }
 0x71d   :  { %769 = vadd.xlane.f32.xlu1 %v768_v12 }
 0x71e   :  { %v771_v13 = vsel %vm303_vm4, %v767_v10, 0.0 }
 0x71f   :  { %772 = vadd.xlane.f32.xlu0 %v771_v13 }
 0x72e   :  { %787 = vbcast.lane.b32.xlu1 %v785_v30, 256 }
 0x735   :  { %780 = vbcast.lane.b32.xlu0 %v778_v31, 256 }
 0x7a6   :  { %v770_v32 = vpop.xlane.xlu1 %769 }
 0x7a8   :  { %v773_v33 = vpop.xlane.xlu0 %772 }
 0x7aa   :  { %v6193_v34 = vpop.permute.xlu1 %787 }
 0x7ab   :  { %v792_v35 = vadd.f32 %v6193_v34, %v773_v33 }
 0x7ac   :  { %v6196_v36 = vpop.permute.xlu0 %780 }
 0x7ad   :  { %799 = vperm.xlu0 %5400, %v792_v35   ;;  %v791_v37 = vadd.f32 %v6196_v36, %v770_v32 }
 0x7af   :  { %796 = vperm.xlu1 %5401, %v791_v37  }
 0x828   :  { %v800_v41 = vpop.permute.xlu0 %799 }
 0x829   :  { %v808_v43 = vrot.slane %v800_v41, %v6200_v38 }
 0x82a   :  { %v797_v42 = vpop.permute.xlu1 %796 }
 0x82b   :  { %v804_v44 = vrot.slane %v797_v42, %v6200_v38 }
 0x82d   :  { %v810_v47 = vsel %vm809_vm6, %v808_v43, %v804_v44 }
 0x82e   :  { %v813_v50 = vsel %vm812_vm7, %v810_v47, -inf }
 0x82f   :  { %814 = vmax.xlane.f32.xlu1 %v813_v50 }
 0x8b8   :  { %v815_v51 = vpop.xlane.xlu1 %814 }
 0x8b9   :  { %v820_v52 = vrot.slane %v815_v51, %v6171_v49  ;;  %v824_v62 = vrot.slane %v815_v51, %v6189_v14 }
 0x8bb   :  { %v827_v16 = vsub.f32 %v791_v37, %v820_v52  ;;  %v828_v45 = vsub.f32 %v792_v35, %v824_v62 }
 0x8bd   :  { %v829_v63 = vmul.f32 1.442695, %v827_v16  ;;  %v831_v15 = vmul.f32 1.442695, %v828_v45 }
 0x8bf   :  { %5418 = vpow2.f32 %v829_v63 }
 0x8c0   :  { %5420 = vpow2.f32 %v831_v15 }
 0x8cc   :  { %v5419_v2 = vpop.eup %5418 }
 0x8cd   :  { %836 = vperm.xlu0 %5400, %v5419_v2   ;;  %v5421_v4 = vpop.eup %5420 }
 0x8d1   :  { %839 = vperm.xlu0 %5400, %v5421_v4  }
 0x948   :  { %v837_v6 = vpop.permute.xlu0 %836 }
 0x949   :  { %v844_v12 = vrot.slane %v837_v6, %v6200_v38 }
 0x94c   :  { %v840_v10 = vpop.permute.xlu0 %839 }
 0x94d   :  { %v848_v13 = vrot.slane %v840_v10, %v6200_v38 }
 0x94f   :  { %v849_v19 = vsel %vm809_vm6, %v848_v13, %v844_v12 }
 0x950   :  { %v851_v30 = vsel %vm812_vm7, %v849_v19, 0.0 }
 0x951   :  { %852 = vadd.xlane.f32.xlu0 %v851_v30 }
 0x9da   :  { %v853_v31 = vpop.xlane.xlu0 %852 }
 0x9db   :  { %5422 = vrcp.f32 %v853_v31 }
 0x9e8   :  { %v5423_v32 = vpop.eup %5422 }
 0x9e9   :  { %v863_v33 = vrot.slane %v5423_v32, %v6189_v14  ;;  %v859_v35 = vrot.slane %v5423_v32, %v6171_v49 }
 0x9eb   :  { %v867_v37 = vmul.f32 %v5421_v4, %v863_v33  ;;  %v866_v41 = vmul.f32 %v5419_v2, %v859_v35 }
 0x9ed   :  { %875 = vperm.xlu0 %5400, %v867_v37   ;;  %870 = vperm.xlu1 %5401, %v866_v41  }
 0x9f1   :  { %894 = vrot.lane.b32.xlu0 %v6169_v48, %s5780_s10 }
 0xa68   :  { %v876_v42 = vpop.permute.xlu0 %875  ;;  %v871_v43 = vpop.permute.xlu1 %870 }
 0xa69   :  { %v879_v44 = vmul.f32 %v876_v42, %v6183_v3  ;;  %v878_v47 = vmul.f32 %v871_v43, %v6181_v0 }
 0xa6b   :  { %v887_v50 = vsel %vm303_vm4, %v879_v44, 0.0  ;;  %v880_v51 = vsel %vm303_vm4, %v878_v47, 0.0 }
 0xa6c   :  { %v888_v52 = vrot.slane %v887_v50, 4  ;;  %v881_v62 = vrot.slane %v880_v51, 4  ;;  %v895_v16 = vpop.permute.xlu0 %894 }
 0xa6d   :  { %898 = vst.msk [vmem:[#allocation3] sm:$0x3] %vm897_vm8, %v895_v16  ;;  %5060 = vmatmul.mubr.msk.f32.vlgmr.msra.gmra.mxu0 %vm303_vm4, %v895_v16 }
 0xa6e   :  { %v889_v45 = vadd.f32 %v888_v52, %v887_v50  ;;  %v882_v48 = vadd.f32 %v881_v62, %v880_v51  ;;  %5074 = vmatpush3.msra.mxu0 %v5933_v7  ;;  %5081 = vmatprep.mubr.msk.f32.mxu0 %vm5787_vm3, %v5786_v1 }
 0xa6f   :  { %5075 = vmatprep.subr.mxu0 %v5786_v1 }
 0xa70   :  { %v890_v63 = vrot.slane %v889_v45, 2  ;;  %v883_v15 = vrot.slane %v882_v48, 2  ;;  %5076 = vmatpush3.msra.mxu0 %v5942_v9 }
 0xa71   :  { %5077 = vmatprep.subr.mxu0 %v5786_v1 }
 0xa72   :  { %v891_v2 = vadd.f32 %v890_v63, %v889_v45  ;;  %v884_v4 = vadd.f32 %v883_v15, %v882_v48  ;;  %5078 = vmatpush3.msra.mxu0 %v5951_v11 }
 0xa73   :  { %5079 = vmatprep.subr.mxu0 %v5786_v1 }
 0xa74   :  { %v892_v6 = vrot.slane %v891_v2, 1  ;;  %v885_v10 = vrot.slane %v884_v4, 1  ;;  %5080 = vmatpush3.msra.mxu0 %v5985_v21 }
 0xa75   :  { %5095 = vmatprep.subr.mxu0 %v5786_v1 }
 0xa76   :  { %v893_v12 = vadd.f32 %v892_v6, %v891_v2  ;;  %v886_v13 = vadd.f32 %v885_v10, %v884_v4 }
 0xa78   :  { %v901_v19 = vsel %vm809_vm6, %v893_v12, %v886_v13 }
 0xa79   :  { %903 = vst.msk [vmem:[#allocation4] sm:$0x3] %vm897_vm8, %v901_v19  ;;  %5027 = vmatmul.mubr.msk.f32.vlgmr.msra.gmra.mxu1 %vm303_vm4, %v901_v19 }
 0xa7a   :  { %5041 = vmatpush3.msra.mxu1 %v6000_v23  ;;  %5048 = vmatprep.mubr.msk.f32.mxu1 %vm5787_vm3, %v5786_v1 }
 0xa7b   :  { %5042 = vmatprep.subr.mxu1 %v5786_v1 }
 0xa7c   :  { %5043 = vmatpush3.msra.mxu1 %v6016_v25 }
 0xa7d   :  { %5044 = vmatprep.subr.mxu1 %v5786_v1 }
 0xa7e   :  { %5045 = vmatpush3.msra.mxu1 %v6028_v27 }
 0xa7f   :  { %5046 = vmatprep.subr.mxu1 %v5786_v1 }
 0xa80   :  { %5047 = vmatpush3.msra.mxu1 %v6042_v29 }
 0xa81   :  { %5049 = vmatmul.mubr.msk.f32.vlgmr.msra.gmra.mxu1 %vm303_vm4, %v6127_v5  ;;  %5062 = vmatprep.subr.mxu1 %v5786_v1 }
 0xa82   :  { %5063 = vmatpush3.msra.mxu1 %v6075_v55  ;;  %5070 = vmatprep.mubr.msk.f32.mxu1 %vm5787_vm3, %v5786_v1 }
 0xa83   :  { %5064 = vmatprep.subr.mxu1 %v5786_v1 }
 0xa84   :  { %5065 = vmatpush3.msra.mxu1 %v6084_v57 }
 0xa85   :  { %5066 = vmatprep.subr.mxu1 %v5786_v1 }
 0xa86   :  { %5067 = vmatpush3.msra.mxu1 %v6093_v59 }
 0xa87   :  { %5068 = vmatprep.subr.mxu1 %v5786_v1 }
 0xa88   :  { %5069 = vmatpush3.msra.mxu1 %v6104_v61 }
 0xa89   :  { %5084 = vmatprep.subr.mxu1 %v5786_v1 }
 0xb2d   :  { %v1215_v5 = vpop.f32.mrf.mxu0 }
 0xb2f   :  { %v5061_v30 = vpop.f32.mrf.mxu0 }
 0xb39   :  { %v974_v31 = vpop.f32.mrf.mxu1 }
 0xb3a   :  { %v1048_v33 = vadd.f32 %v6158_v17, %v974_v31 }
 0xb3b   :  { %v5028_v32 = vpop.f32.mrf.mxu1 }
 0xb41   :  { %v1117_v35 = vpop.f32.mrf.mxu1 }
 0xb42   :  { %v1121_v37 = vadd.f32 %v1117_v35, %v1048_v33 }
 0xb43   :  { %v5050_v41 = vpop.f32.mrf.mxu1 }
 0xb44   :  { %v1122_v42 = vadd.f32 %v6062_v40, %v1121_v37 }
 0xb46   :  { %5424 = vtanh.f32 %v1122_v42  ;;  %v4695_v44 = vmul.f32 -1.442695, %v1122_v42 }
 0xb48   :  { %5426 = vpow2.f32 %v4695_v44 }
 0xb53   :  { %v5425_v43 = vpop.eup %5424 }
 0xb54   :  { %1132 = vrot.lane.b32.xlu1 %v5425_v43, %s5788_s15 }
 0xb55   :  { %v5427_v47 = vpop.eup %5426 }
 0xb56   :  { %v1126_v50 = vadd.f32 1.0, %v5427_v47 }
 0xb58   :  { %5428 = vrcp.f32 %v1126_v50 }
 0xb65   :  { %v5429_v51 = vpop.eup %5428 }
 0xb66   :  { %v1130_v17 = vmul.f32 %v5429_v51, %v6067_v53  ;;  %v1477_v53 = vld [vmem:[#allocation2 + $0x4] sm:$0x3] }
 0xbc6   :  { %v1133_v52 = vpop.permute.xlu1 %1132 }
 0xbc7   :  { %v1135_v62 = vmul.f32 %v5429_v51, %v1133_v52 }
 0xbc9   :  { %1137 = vrot.lane.b32.xlu1 %v1135_v62, %s5780_s10 }
 0xc3b   :  { %v1138_v16 = vpop.permute.xlu1 %1137 }
 0xc3c   :  { %v6262_v45 = vadd.f32 %v1138_v16, %v1130_v17 }
 0xc3e   :  { %5430 = vtanh.f32 %v6262_v45 }
 0xc4b   :  { %v5431_v48 = vpop.eup %5430 }
 0xc4c   :  { %1143 = vrot.lane.b32.xlu1 %v5431_v48, %s5788_s15 }
 0xcbe   :  { %v1144_v63 = vpop.permute.xlu1 %1143 }
 0xcbf   :  { %v1146_v15 = vmul.f32 %v5429_v51, %v1144_v63 }
 0xcc1   :  { %1220 = vrot.lane.b32.xlu1 %v1146_v15, %s5780_s10 }
 0xd33   :  { %v6267_v2 = vpop.permute.xlu1 %1220 }
 0xd34   :  { %5071 = vmatmul.mubr.msk.f32.vlgmr.msra.gmra.mxu1 %vm303_vm4, %v6267_v2 }
 0xd35   :  { %5085 = vmatpush3.msra.mxu1 %v5995_v22  ;;  %5092 = vmatprep.mubr.msk.f32.mxu1 %vm5787_vm3, %v5786_v1 }
 0xd36   :  { %5086 = vmatprep.subr.mxu1 %v5786_v1 }
 0xd37   :  { %5087 = vmatpush3.msra.mxu1 %v6005_v24 }
 0xd38   :  { %5088 = vmatprep.subr.mxu1 %v5786_v1 }
 0xd39   :  { %5089 = vmatpush3.msra.mxu1 %v6023_v26 }
 0xd3a   :  { %5090 = vmatprep.subr.mxu1 %v5786_v1 }
 0xd3b   :  { %5091 = vmatpush3.msra.mxu1 %v6037_v28 }
 0xd3c   :  { %5093 = vmatmul.mubr.msk.f32.vlgmr.msra.gmra.mxu1 %vm303_vm4, %v1477_v53  ;;  %5106 = vmatprep.subr.mxu1 %v5786_v1 }
 0xd3d   :  { %5107 = vmatpush3.msra.mxu1 %v6070_v54  ;;  %5114 = vmatprep.mubr.msk.f32.mxu1 %vm5787_vm3, %v5786_v1 }
 0xd3e   :  { %5108 = vmatprep.subr.mxu1 %v5786_v1 }
 0xd3f   :  { %5109 = vmatpush3.msra.mxu1 %v6077_v56 }
 0xd40   :  { %5110 = vmatprep.subr.mxu1 %v5786_v1 }
 0xd41   :  { %5111 = vmatpush3.msra.mxu1 %v6088_v58 }
 0xd42   :  { %5112 = vmatprep.subr.mxu1 %v5786_v1 }
 0xd43   :  { %5113 = vmatpush3.msra.mxu1 %v6099_v60 }
 0xd44   :  { %5128 = vmatprep.subr.mxu1 %v5786_v1 }
 0xdf4   :  { %v1290_v4 = vpop.f32.mrf.mxu1 }
 0xdf5   :  { %v1291_v6 = vadd.f32 %v1290_v4, %v1215_v5 }
 0xdf6   :  { %v5072_v10 = vpop.f32.mrf.mxu1 }
 0xdf7   :  { %v1294_v12 = vadd.f32 %v6155_v8, %v1291_v6 }
 0xdf9   :  { %5432 = vtanh.f32 %v1294_v12  ;;  %v4698_v31 = vmul.f32 -1.442695, %v1294_v12 }
 0xdfb   :  { %5434 = vpow2.f32 %v4698_v31 }
 0xdfc   :  { %v6293_v13 = vpop.f32.mrf.mxu1 }
 0xdfe   :  { %v5094_v19 = vpop.f32.mrf.mxu1 }
 0xe06   :  { %v5433_v30 = vpop.eup %5432 }
 0xe07   :  { %1304 = vrot.lane.b32.xlu0 %v5433_v30, %s5788_s15 }
 0xe08   :  { %v5435_v32 = vpop.eup %5434 }
 0xe09   :  { %v1298_v33 = vadd.f32 1.0, %v5435_v32 }
 0xe0b   :  { %5436 = vrcp.f32 %v1298_v33 }
 0xe18   :  { %v5437_v35 = vpop.eup %5436 }
 0xe19   :  { %v1302_v5 = vmul.f32 %v5437_v35, %v6162_v39 }
 0xe79   :  { %v1305_v37 = vpop.permute.xlu0 %1304 }
 0xe7a   :  { %v1307_v41 = vmul.f32 %v5437_v35, %v1305_v37 }
 0xe7c   :  { %1309 = vrot.lane.b32.xlu1 %v1307_v41, %s5780_s10 }
 0xeee   :  { %v1310_v42 = vpop.permute.xlu1 %1309 }
 0xeef   :  { %v6298_v43 = vadd.f32 %v1310_v42, %v1302_v5 }
 0xef1   :  { %5438 = vtanh.f32 %v6298_v43 }
 0xefe   :  { %v5439_v44 = vpop.eup %5438 }
 0xeff   :  { %1315 = vrot.lane.b32.xlu0 %v5439_v44, %s5788_s15 }
 0xf71   :  { %v1316_v47 = vpop.permute.xlu0 %1315 }
 0xf72   :  { %v1318_v50 = vmul.f32 %v5437_v35, %v1316_v47 }
 0xf74   :  { %v1326_v51 = vrot.slane %v1318_v50, %v6167_v46 }
 0xf76   :  { %v1334_v52 = vrot.slane %v1326_v51, %v6167_v46  ;;  %v1327_v62 = vcombine.high %v1326_v51, %v1326_v51 }
 0xf78   :  { %v1345_v17 = vrot.slane %v1334_v52, %v6171_v49  ;;  %v1341_v16 = vrot.slane %v1327_v62, %v6167_v46 }
 0xf7a   :  { %1350 = vrot.lane.b32.xlu1 %v1345_v17, %s5780_s10  ;;  %v1349_v39 = vrot.slane %v1341_v16, %v6171_v49 }
 0xf7c   :  { %1352 = vrot.lane.b32.xlu0 %v1349_v39, %s5780_s10 }
 0xfec   :  { %v1351_v48 = vpop.permute.xlu1 %1350 }
 0xfed   :  { %v1356_v63 = vmul.f32 %v1351_v48, %v6181_v0 }
 0xfee   :  { %v1353_v15 = vpop.permute.xlu0 %1352 }
 0xfef   :  { %v1357_v53 = vmul.f32 %v1353_v15, %v6183_v3  ;;  %v1358_v4 = vsel %vm303_vm4, %v1356_v63, 0.0 }
 0xff0   :  { %1359 = vadd.xlane.f32.xlu1 %v1358_v4 }
 0xff1   :  { %v1361_v6 = vsel %vm303_vm4, %v1357_v53, 0.0 }
 0xff2   :  { %1362 = vadd.xlane.f32.xlu0 %v1361_v6 }
0x1079   :  { %v1360_v10 = vpop.xlane.xlu1 %1359 }
0x107a   :  { %v1364_v12 = vadd.f32 %v1360_v10, %v6196_v36 }
0x107b   :  { %v1363_v19 = vpop.xlane.xlu0 %1362 }
0x107c   :  { %v1365_v30 = vadd.f32 %v1363_v19, %v6193_v34  ;;  %1369 = vperm.xlu0 %5400, %v1364_v12  }
0x107e   :  { %1372 = vperm.xlu1 %5401, %v1365_v30  }
0x10f7   :  { %v1370_v31 = vpop.permute.xlu0 %1369 }
0x10f8   :  { %v1377_v33 = vrot.slane %v1370_v31, %v6200_v38 }
0x10f9   :  { %v1373_v32 = vpop.permute.xlu1 %1372 }
0x10fa   :  { %v1381_v35 = vrot.slane %v1373_v32, %v6200_v38 }
0x10fc   :  { %v1382_v37 = vsel %vm809_vm6, %v1381_v35, %v1377_v33 }
0x10fd   :  { %v1384_v41 = vsel %vm812_vm7, %v1382_v37, -inf }
0x10fe   :  { %1385 = vmax.xlane.f32.xlu1 %v1384_v41 }
0x1187   :  { %v1386_v5 = vpop.xlane.xlu1 %1385 }
0x1188   :  { %v1391_v42 = vrot.slane %v1386_v5, %v6171_v49  ;;  %v1395_v44 = vrot.slane %v1386_v5, %v6189_v14 }
0x118a   :  { %v1398_v47 = vsub.f32 %v1364_v12, %v1391_v42  ;;  %v1399_v51 = vsub.f32 %v1365_v30, %v1395_v44 }
0x118c   :  { %v1400_v52 = vmul.f32 1.442695, %v1398_v47  ;;  %v1402_v62 = vmul.f32 1.442695, %v1399_v51 }
0x118e   :  { %5440 = vpow2.f32 %v1400_v52 }
0x118f   :  { %5442 = vpow2.f32 %v1402_v62 }
0x119b   :  { %v5441_v17 = vpop.eup %5440 }
0x119c   :  { %1407 = vperm.xlu0 %5400, %v5441_v17   ;;  %v5443_v16 = vpop.eup %5442 }
0x11a0   :  { %1410 = vperm.xlu0 %5400, %v5443_v16  }
0x1217   :  { %v1408_v39 = vpop.permute.xlu0 %1407 }
0x1218   :  { %v1415_v63 = vrot.slane %v1408_v39, %v6200_v38 }
0x121b   :  { %v1411_v48 = vpop.permute.xlu0 %1410 }
0x121c   :  { %v1419_v15 = vrot.slane %v1411_v48, %v6200_v38 }
0x121e   :  { %v1420_v53 = vsel %vm809_vm6, %v1419_v15, %v1415_v63 }
0x121f   :  { %v1422_v4 = vsel %vm812_vm7, %v1420_v53, 0.0 }
0x1220   :  { %1423 = vadd.xlane.f32.xlu0 %v1422_v4 }
0x12a9   :  { %v1424_v6 = vpop.xlane.xlu0 %1423 }
0x12aa   :  { %5444 = vrcp.f32 %v1424_v6 }
0x12b7   :  { %v5445_v10 = vpop.eup %5444 }
0x12b8   :  { %v1434_v12 = vrot.slane %v5445_v10, %v6189_v14  ;;  %v1430_v19 = vrot.slane %v5445_v10, %v6171_v49 }
0x12ba   :  { %v1438_v30 = vmul.f32 %v5443_v16, %v1434_v12  ;;  %v1437_v31 = vmul.f32 %v5441_v17, %v1430_v19 }
0x12bc   :  { %1446 = vperm.xlu0 %5400, %v1438_v30   ;;  %1441 = vperm.xlu1 %5401, %v1437_v31  }
0x12c0   :  { %1465 = vrot.lane.b32.xlu0 %v1318_v50, %s5780_s10 }
0x1337   :  { %v1447_v32 = vpop.permute.xlu0 %1446  ;;  %v1442_v33 = vpop.permute.xlu1 %1441 }
0x1338   :  { %v1450_v35 = vmul.f32 %v1447_v32, %v6183_v3  ;;  %v1449_v37 = vmul.f32 %v1442_v33, %v6181_v0 }
0x133a   :  { %v1458_v41 = vsel %vm303_vm4, %v1450_v35, 0.0  ;;  %v1451_v5 = vsel %vm303_vm4, %v1449_v37, 0.0 }
0x133b   :  { %v1459_v42 = vrot.slane %v1458_v41, 4  ;;  %v1452_v44 = vrot.slane %v1451_v5, 4  ;;  %v1466_v47 = vpop.permute.xlu0 %1465 }
0x133c   :  { %1469 = vst.msk [vmem:[#allocation3 + $0x2] sm:$0x3] %vm897_vm8, %v1466_v47  ;;  %5115 = vmatmul.mubr.msk.f32.vlgmr.msra.gmra.mxu1 %vm303_vm4, %v1466_v47 }
0x133d   :  { %v1460_v51 = vadd.f32 %v1459_v42, %v1458_v41  ;;  %v1453_v52 = vadd.f32 %v1452_v44, %v1451_v5  ;;  %5129 = vmatpush3.msra.mxu1 %v5933_v7  ;;  %5136 = vmatprep.mubr.msk.f32.mxu1 %vm5787_vm3, %v5786_v1 }
0x133e   :  { %5130 = vmatprep.subr.mxu1 %v5786_v1 }
0x133f   :  { %v1461_v50 = vrot.slane %v1460_v51, 2  ;;  %v1454_v62 = vrot.slane %v1453_v52, 2  ;;  %5131 = vmatpush3.msra.mxu1 %v5942_v9 }
0x1340   :  { %5132 = vmatprep.subr.mxu1 %v5786_v1 }
0x1341   :  { %v1462_v17 = vadd.f32 %v1461_v50, %v1460_v51  ;;  %v1455_v16 = vadd.f32 %v1454_v62, %v1453_v52  ;;  %5133 = vmatpush3.msra.mxu1 %v5951_v11 }
0x1342   :  { %5134 = vmatprep.subr.mxu1 %v5786_v1 }
0x1343   :  { %v1463_v39 = vrot.slane %v1462_v17, 1  ;;  %v1456_v48 = vrot.slane %v1455_v16, 1  ;;  %5135 = vmatpush3.msra.mxu1 %v5985_v21 }
0x1344   :  { %5150 = vmatprep.subr.mxu1 %v5786_v1 }
0x1345   :  { %v1464_v7 = vadd.f32 %v1463_v39, %v1462_v17  ;;  %v1457_v63 = vadd.f32 %v1456_v48, %v1455_v16 }
0x1347   :  { %v1472_v15 = vsel %vm809_vm6, %v1464_v7, %v1457_v63 }
0x1348   :  { %1475 = vst.msk [vmem:[#allocation4 + $0x2] sm:$0x3] %vm897_vm8, %v1472_v15  ;;  %5082 = vmatmul.mubr.msk.f32.vlgmr.msra.gmra.mxu0 %vm303_vm4, %v1472_v15 }
0x1349   :  { %5096 = vmatpush3.msra.mxu0 %v6000_v23  ;;  %5103 = vmatprep.mubr.msk.f32.mxu0 %vm5787_vm3, %v5786_v1 }
0x134a   :  { %5097 = vmatprep.subr.mxu0 %v5786_v1 }
0x134b   :  { %5098 = vmatpush3.msra.mxu0 %v6016_v25 }
0x134c   :  { %5099 = vmatprep.subr.mxu0 %v5786_v1 }
0x134d   :  { %5100 = vmatpush3.msra.mxu0 %v6028_v27 }
0x134e   :  { %5101 = vmatprep.subr.mxu0 %v5786_v1 }
0x134f   :  { %5102 = vmatpush3.msra.mxu0 %v6042_v29 }
0x1350   :  { %5104 = vmatmul.mubr.msk.f32.vlgmr.msra.gmra.mxu0 %vm303_vm4, %v6267_v2  ;;  %5117 = vmatprep.subr.mxu0 %v5786_v1 }
0x1351   :  { %5118 = vmatpush3.msra.mxu0 %v6075_v55  ;;  %5125 = vmatprep.mubr.msk.f32.mxu0 %vm5787_vm3, %v5786_v1 }
0x1352   :  { %5119 = vmatprep.subr.mxu0 %v5786_v1 }
0x1353   :  { %5120 = vmatpush3.msra.mxu0 %v6084_v57 }
0x1354   :  { %5121 = vmatprep.subr.mxu0 %v5786_v1 }
0x1355   :  { %5122 = vmatpush3.msra.mxu0 %v6093_v59 }
0x1356   :  { %5123 = vmatprep.subr.mxu0 %v5786_v1 }
0x1357   :  { %5124 = vmatpush3.msra.mxu0 %v6104_v61 }
0x1358   :  { %5139 = vmatprep.subr.mxu0 %v5786_v1 }
0x13fc   :  { %v1787_v9 = vpop.f32.mrf.mxu1 }
0x13fe   :  { %v5116_v11 = vpop.f32.mrf.mxu1 }
0x1408   :  { %v1546_v21 = vpop.f32.mrf.mxu0 }
0x1409   :  { %v1620_v25 = vadd.f32 %v6293_v13, %v1546_v21 }
0x140a   :  { %v5083_v23 = vpop.f32.mrf.mxu0 }
0x1410   :  { %v1689_v27 = vpop.f32.mrf.mxu0 }
0x1411   :  { %v1693_v29 = vadd.f32 %v1689_v27, %v1620_v25 }
0x1412   :  { %v5105_v55 = vpop.f32.mrf.mxu0 }
0x1413   :  { %v1694_v57 = vadd.f32 %v6062_v40, %v1693_v29 }
0x1415   :  { %5446 = vtanh.f32 %v1694_v57  ;;  %v4702_v59 = vmul.f32 -1.442695, %v1694_v57 }
0x1417   :  { %5448 = vpow2.f32 %v4702_v59 }
0x1422   :  { %v5447_v2 = vpop.eup %5446 }
0x1423   :  { %1704 = vrot.lane.b32.xlu1 %v5447_v2, %s5788_s15 }
0x1424   :  { %v5449_v61 = vpop.eup %5448 }
0x1425   :  { %v1698_v53 = vadd.f32 1.0, %v5449_v61 }
0x1427   :  { %5450 = vrcp.f32 %v1698_v53 }
0x1434   :  { %v5451_v4 = vpop.eup %5450 }
0x1435   :  { %v1702_v13 = vmul.f32 %v5451_v4, %v6262_v45  ;;  %v2049_v45 = vld [vmem:[#allocation2 + $0x6] sm:$0x3] }
0x1495   :  { %v1705_v6 = vpop.permute.xlu1 %1704 }
0x1496   :  { %v1707_v10 = vmul.f32 %v5451_v4, %v1705_v6 }
0x1498   :  { %1709 = vrot.lane.b32.xlu1 %v1707_v10, %s5780_s10 }
0x150a   :  { %v1710_v12 = vpop.permute.xlu1 %1709 }
0x150b   :  { %v6374_v19 = vadd.f32 %v1710_v12, %v1702_v13 }
0x150d   :  { %5452 = vtanh.f32 %v6374_v19 }
0x151a   :  { %v5453_v40 = vpop.eup %5452 }
0x151b   :  { %1715 = vrot.lane.b32.xlu1 %v5453_v40, %s5788_s15 }
0x158d   :  { %v1716_v30 = vpop.permute.xlu1 %1715 }
0x158e   :  { %v1718_v31 = vmul.f32 %v5451_v4, %v1716_v30 }
0x1590   :  { %1792 = vrot.lane.b32.xlu1 %v1718_v31, %s5780_s10 }
0x1602   :  { %v6379_v32 = vpop.permute.xlu1 %1792 }
0x1603   :  { %5126 = vmatmul.mubr.msk.f32.vlgmr.msra.gmra.mxu0 %vm303_vm4, %v6379_v32 }
0x1604   :  { %5140 = vmatpush3.msra.mxu0 %v5995_v22  ;;  %5147 = vmatprep.mubr.msk.f32.mxu0 %vm5787_vm3, %v5786_v1 }
0x1605   :  { %5141 = vmatprep.subr.mxu0 %v5786_v1 }
0x1606   :  { %5142 = vmatpush3.msra.mxu0 %v6005_v24 }
0x1607   :  { %5143 = vmatprep.subr.mxu0 %v5786_v1 }
0x1608   :  { %5144 = vmatpush3.msra.mxu0 %v6023_v26 }
0x1609   :  { %5145 = vmatprep.subr.mxu0 %v5786_v1 }
0x160a   :  { %5146 = vmatpush3.msra.mxu0 %v6037_v28 }
0x160b   :  { %5148 = vmatmul.mubr.msk.f32.vlgmr.msra.gmra.mxu0 %vm303_vm4, %v2049_v45  ;;  %5161 = vmatprep.subr.mxu0 %v5786_v1 }
0x160c   :  { %5162 = vmatpush3.msra.mxu0 %v6070_v54  ;;  %5169 = vmatprep.mubr.msk.f32.mxu0 %vm5787_vm3, %v5786_v1 }
0x160d   :  { %5163 = vmatprep.subr.mxu0 %v5786_v1 }
0x160e   :  { %5164 = vmatpush3.msra.mxu0 %v6077_v56 }
0x160f   :  { %5165 = vmatprep.subr.mxu0 %v5786_v1 }
0x1610   :  { %5166 = vmatpush3.msra.mxu0 %v6088_v58 }
0x1611   :  { %5167 = vmatprep.subr.mxu0 %v5786_v1 }
0x1612   :  { %5168 = vmatpush3.msra.mxu0 %v6099_v60 }
0x1613   :  { %5183 = vmatprep.subr.mxu0 %v5786_v1 }
0x16c3   :  { %v1862_v22 = vpop.f32.mrf.mxu0 }
0x16c4   :  { %v1863_v24 = vadd.f32 %v1862_v22, %v1787_v9 }
0x16c5   :  { %v5127_v26 = vpop.f32.mrf.mxu0 }
0x16c6   :  { %v1866_v28 = vadd.f32 %v6155_v8, %v1863_v24 }
0x16c8   :  { %5454 = vtanh.f32 %v1866_v28  ;;  %v4705_v35 = vmul.f32 -1.442695, %v1866_v28 }
0x16ca   :  { %5456 = vpow2.f32 %v4705_v35 }
0x16cb   :  { %v6405_v54 = vpop.f32.mrf.mxu0 }
0x16cd   :  { %v5149_v33 = vpop.f32.mrf.mxu0 }
0x16d5   :  { %v5455_v56 = vpop.eup %5454 }
0x16d6   :  { %1876 = vrot.lane.b32.xlu0 %v5455_v56, %s5788_s15 }
0x16d7   :  { %v5457_v58 = vpop.eup %5456 }
0x16d8   :  { %v1870_v37 = vadd.f32 1.0, %v5457_v58 }
0x16da   :  { %5458 = vrcp.f32 %v1870_v37 }
0x16e7   :  { %v5459_v60 = vpop.eup %5458 }
0x16e8   :  { %v1874_v42 = vmul.f32 %v5459_v60, %v6298_v43 }
0x1748   :  { %v1877_v41 = vpop.permute.xlu0 %1876 }
0x1749   :  { %v1879_v5 = vmul.f32 %v5459_v60, %v1877_v41 }
0x174b   :  { %1881 = vrot.lane.b32.xlu1 %v1879_v5, %s5780_s10 }
0x17bd   :  { %v1882_v8 = vpop.permute.xlu1 %1881 }
0x17be   :  { %v6410_v44 = vadd.f32 %v1882_v8, %v1874_v42 }
0x17c0   :  { %5460 = vtanh.f32 %v6410_v44 }
0x17cd   :  { %v5461_v47 = vpop.eup %5460 }
0x17ce   :  { %1887 = vrot.lane.b32.xlu0 %v5461_v47, %s5788_s15 }
0x1840   :  { %v1888_v51 = vpop.permute.xlu0 %1887 }
0x1841   :  { %v1890_v52 = vmul.f32 %v5459_v60, %v1888_v51 }
0x1843   :  { %v1898_v50 = vrot.slane %v1890_v52, %v6167_v46 }
0x1845   :  { %v1906_v62 = vrot.slane %v1898_v50, %v6167_v46  ;;  %v1899_v17 = vcombine.high %v1898_v50, %v1898_v50 }
0x1847   :  { %v1917_v16 = vrot.slane %v1906_v62, %v6171_v49  ;;  %v1913_v39 = vrot.slane %v1899_v17, %v6167_v46 }
0x1849   :  { %1922 = vrot.lane.b32.xlu1 %v1917_v16, %s5780_s10  ;;  %v1921_v43 = vrot.slane %v1913_v39, %v6171_v49 }
0x184b   :  { %1924 = vrot.lane.b32.xlu0 %v1921_v43, %s5780_s10 }
0x18bb   :  { %v1923_v48 = vpop.permute.xlu1 %1922 }
0x18bc   :  { %v1928_v7 = vmul.f32 %v1923_v48, %v6181_v0  ;;  %v6458_v48 = vld [vmem:[%s7006_s6 + $0x10] sm:$0xff] }
0x18bd   :  { %v1925_v63 = vpop.permute.xlu0 %1924 }
0x18be   :  { %v1929_v15 = vmul.f32 %v1925_v63, %v6183_v3  ;;  %v1930_v9 = vsel %vm303_vm4, %v1928_v7, 0.0 }
0x18bf   :  { %1931 = vadd.xlane.f32.xlu1 %v1930_v9 }
0x18c0   :  { %v1933_v11 = vsel %vm303_vm4, %v1929_v15, 0.0  ;;  %v6465_v15 = vld [vmem:[%s7006_s6 + $0x8] sm:$0xff] }
0x18c1   :  { %1934 = vadd.xlane.f32.xlu0 %v1933_v11 }
0x1948   :  { %v1932_v21 = vpop.xlane.xlu1 %1931 }
0x1949   :  { %v1936_v23 = vadd.f32 %v1932_v21, %v6196_v36  ;;  %v6472_v21 = vld [vmem:[%s7006_s6] sm:$0xff] }
0x194a   :  { %v1935_v25 = vpop.xlane.xlu0 %1934 }
0x194b   :  { %v1937_v27 = vadd.f32 %v1935_v25, %v6193_v34  ;;  %1941 = vperm.xlu0 %5400, %v1936_v23  }
0x194d   :  { %1944 = vperm.xlu1 %5401, %v1937_v27  }
0x19c6   :  { %v1942_v29 = vpop.permute.xlu0 %1941 }
0x19c7   :  { %v1949_v57 = vrot.slane %v1942_v29, %v6200_v38  ;;  %v6482_v29 = vld [vmem:[%s7007_s7 + $0x18] sm:$0xff] }
0x19c8   :  { %v1945_v55 = vpop.permute.xlu1 %1944 }
0x19c9   :  { %v1953_v2 = vrot.slane %v1945_v55, %v6200_v38  ;;  %v6491_v55 = vld [vmem:[%s7007_s7 + $0x10] sm:$0xff] }
0x19cb   :  { %v1954_v59 = vsel %vm809_vm6, %v1953_v2, %v1949_v57  ;;  %v6498_v57 = vld [vmem:[%s7007_s7 + $0x8] sm:$0xff]  ;;  %v6505_v2 = vld [vmem:[%s7007_s7] sm:$0xff] }
0x19cc   :  { %v1956_v61 = vsel %vm812_vm7, %v1954_v59, -inf  ;;  %v6514_v59 = vld [vmem:[%s7009_s9 + $0x18] sm:$0xff] }
0x19cd   :  { %1957 = vmax.xlane.f32.xlu1 %v1956_v61  ;;  %v6523_v61 = vld [vmem:[%s7009_s9 + $0x10] sm:$0xff] }
0x1a56   :  { %v1958_v53 = vpop.xlane.xlu1 %1957 }
0x1a57   :  { %v1963_v4 = vrot.slane %v1958_v53, %v6171_v49  ;;  %v1967_v6 = vrot.slane %v1958_v53, %v6189_v14  ;;  %v6537_v53 = vld [vmem:[%s7009_s9] sm:$0xff] }
0x1a59   :  { %v1970_v10 = vsub.f32 %v1936_v23, %v1963_v4  ;;  %v1971_v13 = vsub.f32 %v1937_v27, %v1967_v6 }
0x1a5b   :  { %v1972_v12 = vmul.f32 1.442695, %v1970_v10  ;;  %v1974_v40 = vmul.f32 1.442695, %v1971_v13 }
0x1a5d   :  { %5462 = vpow2.f32 %v1972_v12 }
0x1a5e   :  { %5464 = vpow2.f32 %v1974_v40 }
0x1a6a   :  { %v5463_v30 = vpop.eup %5462 }
0x1a6b   :  { %1979 = vperm.xlu0 %5400, %v5463_v30   ;;  %v5465_v31 = vpop.eup %5464 }
0x1a6f   :  { %1982 = vperm.xlu0 %5400, %v5465_v31  }
0x1ae6   :  { %v1980_v45 = vpop.permute.xlu0 %1979 }
0x1ae7   :  { %v1987_v24 = vrot.slane %v1980_v45, %v6200_v38  ;;  %v6545_v45 = vld [vmem:[%s7008_s8] ss:$0 sm:$0xff] }
0x1aea   :  { %v1983_v22 = vpop.permute.xlu0 %1982 }
0x1aeb   :  { %v1991_v26 = vrot.slane %v1983_v22, %v6200_v38 }
0x1aed   :  { %v1992_v28 = vsel %vm809_vm6, %v1991_v26, %v1987_v24 }
0x1aee   :  { %v1994_v33 = vsel %vm812_vm7, %v1992_v28, 0.0 }
0x1aef   :  { %1995 = vadd.xlane.f32.xlu0 %v1994_v33 }
0x1b78   :  { %v1996_v56 = vpop.xlane.xlu0 %1995 }
0x1b79   :  { %5466 = vrcp.f32 %v1996_v56 }
0x1b86   :  { %v5467_v35 = vpop.eup %5466 }
0x1b87   :  { %v2006_v58 = vrot.slane %v5467_v35, %v6189_v14  ;;  %v2002_v37 = vrot.slane %v5467_v35, %v6171_v49 }
0x1b89   :  { %v2010_v60 = vmul.f32 %v5465_v31, %v2006_v58  ;;  %v2009_v41 = vmul.f32 %v5463_v30, %v2002_v37 }
0x1b8b   :  { %2018 = vperm.xlu0 %5400, %v2010_v60   ;;  %2013 = vperm.xlu1 %5401, %v2009_v41  }
0x1b8f   :  { %2037 = vrot.lane.b32.xlu0 %v1890_v52, %s5780_s10  ;;  %v6449_v52 = vld [vmem:[%s7006_s6 + $0x18] sm:$0xff] }
0x1c06   :  { %v2019_v5 = vpop.permute.xlu0 %2018  ;;  %v2014_v42 = vpop.permute.xlu1 %2013 }
0x1c07   :  { %v2022_v8 = vmul.f32 %v2019_v5, %v6183_v3  ;;  %v2021_v47 = vmul.f32 %v2014_v42, %v6181_v0 }
0x1c09   :  { %v2030_v51 = vsel %vm303_vm4, %v2022_v8, 0.0  ;;  %v2023_v50 = vsel %vm303_vm4, %v2021_v47, 0.0  ;;  %v6572_v47 = vld [vmem:[%s7005_s5 + $0x10] sm:$0xff] }
0x1c0a   :  { %v2031_v62 = vrot.slane %v2030_v51, 4  ;;  %v2024_v17 = vrot.slane %v2023_v50, 4  ;;  %v2038_v16 = vpop.permute.xlu0 %2037 }
0x1c0b   :  { %2041 = vst.msk [vmem:[#allocation3 + $0x4] sm:$0x3] %vm897_vm8, %v2038_v16  ;;  %5170 = vmatmul.mubr.msk.f32.vlgmr.msra.gmra.mxu0 %vm303_vm4, %v2038_v16  ;;  %v6597_v16 = vld [vmem:[#allocation11 + $0x10] sm:$0xff] }
0x1c0c   :  { %v2032_v39 = vadd.f32 %v2031_v62, %v2030_v51  ;;  %v2025_v43 = vadd.f32 %v2024_v17, %v2023_v50  ;;  %5184 = vmatpush3.msra.mxu0 %v6449_v52  ;;  %5191 = vmatprep.mubr.msk.f32.mxu0 %vm5787_vm3, %v5786_v1  ;;  %v6579_v51 = vld [vmem:[%s7005_s5 + $0x8] sm:$0xff]  ;;  %v6586_v50 = vld [vmem:[%s7005_s5] sm:$0xff] }
0x1c0d   :  { %5185 = vmatprep.subr.mxu0 %v5786_v1  ;;  %v2621_v62 = vld [vmem:[#allocation2 + $0x8] sm:$0x3]  ;;  %v6591_v17 = vld [vmem:[#allocation11 + $0x18] sm:$0xff] }
0x1c0e   :  { %v2033_v0 = vrot.slane %v2032_v39, 2  ;;  %v2026_v3 = vrot.slane %v2025_v43, 2  ;;  %5186 = vmatpush3.msra.mxu0 %v6458_v48 }
0x1c0f   :  { %5187 = vmatprep.subr.mxu0 %v5786_v1 }
0x1c10   :  { %v2034_v7 = vadd.f32 %v2033_v0, %v2032_v39  ;;  %v2027_v63 = vadd.f32 %v2026_v3, %v2025_v43  ;;  %5188 = vmatpush3.msra.mxu0 %v6465_v15  ;;  %v6601_v39 = vld [vmem:[#allocation11 + $0x8] sm:$0xff]  ;;  %v6605_v43 = vld [vmem:[#allocation11] sm:$0xff] }
0x1c11   :  { %5189 = vmatprep.subr.mxu0 %v5786_v1 }
0x1c12   :  { %v2035_v9 = vrot.slane %v2034_v7, 1  ;;  %v2028_v11 = vrot.slane %v2027_v63, 1  ;;  %5190 = vmatpush3.msra.mxu0 %v6472_v21 }
0x1c13   :  { %5205 = vmatprep.subr.mxu0 %v5786_v1 }
0x1c14   :  { %v2036_v23 = vadd.f32 %v2035_v9, %v2034_v7  ;;  %v2029_v25 = vadd.f32 %v2028_v11, %v2027_v63  ;;  %v6612_v63 = vld [vmem:[%s7011_s11] ss:$0 sm:$0xff] }
0x1c16   :  { %v2044_v27 = vsel %vm809_vm6, %v2036_v23, %v2029_v25 }
0x1c17   :  { %2047 = vst.msk [vmem:[#allocation4 + $0x4] sm:$0x3] %vm897_vm8, %v2044_v27  ;;  %5137 = vmatmul.mubr.msk.f32.vlgmr.msra.gmra.mxu1 %vm303_vm4, %v2044_v27 }
0x1c18   :  { %5151 = vmatpush3.msra.mxu1 %v6482_v29  ;;  %5158 = vmatprep.mubr.msk.f32.mxu1 %vm5787_vm3, %v5786_v1 }
0x1c19   :  { %5152 = vmatprep.subr.mxu1 %v5786_v1 }
0x1c1a   :  { %5153 = vmatpush3.msra.mxu1 %v6491_v55 }
0x1c1b   :  { %5154 = vmatprep.subr.mxu1 %v5786_v1 }
0x1c1c   :  { %5155 = vmatpush3.msra.mxu1 %v6498_v57 }
0x1c1d   :  { %5156 = vmatprep.subr.mxu1 %v5786_v1 }
0x1c1e   :  { %5157 = vmatpush3.msra.mxu1 %v6505_v2 }
0x1c1f   :  { %5159 = vmatmul.mubr.msk.f32.vlgmr.msra.gmra.mxu1 %vm303_vm4, %v6379_v32  ;;  %5172 = vmatprep.subr.mxu1 %v5786_v1  ;;  %v6530_v32 = vld [vmem:[%s7009_s9 + $0x8] sm:$0xff] }
0x1c20   :  { %5173 = vmatpush3.msra.mxu1 %v6514_v59  ;;  %5180 = vmatprep.mubr.msk.f32.mxu1 %vm5787_vm3, %v5786_v1 }
0x1c21   :  { %5174 = vmatprep.subr.mxu1 %v5786_v1 }
0x1c22   :  { %5175 = vmatpush3.msra.mxu1 %v6523_v61 }
0x1c23   :  { %5176 = vmatprep.subr.mxu1 %v5786_v1 }
0x1c24   :  { %5177 = vmatpush3.msra.mxu1 %v6530_v32 }
0x1c25   :  { %5178 = vmatprep.subr.mxu1 %v5786_v1 }
0x1c26   :  { %5179 = vmatpush3.msra.mxu1 %v6537_v53 }
0x1c27   :  { %5194 = vmatprep.subr.mxu1 %v5786_v1 }
0x1ccb   :  { %v2359_v4 = vpop.f32.mrf.mxu0 }
0x1ccd   :  { %v5171_v6 = vpop.f32.mrf.mxu0 }
0x1cd7   :  { %v2118_v10 = vpop.f32.mrf.mxu1 }
0x1cd8   :  { %v2192_v12 = vadd.f32 %v6405_v54, %v2118_v10 }
0x1cd9   :  { %v5138_v13 = vpop.f32.mrf.mxu1 }
0x1cdf   :  { %v2261_v40 = vpop.f32.mrf.mxu1 }
0x1ce0   :  { %v2265_v30 = vadd.f32 %v2261_v40, %v2192_v12 }
0x1ce1   :  { %v5160_v31 = vpop.f32.mrf.mxu1 }
0x1ce2   :  { %v2266_v22 = vadd.f32 %v6545_v45, %v2265_v30 }
0x1ce4   :  { %5468 = vtanh.f32 %v2266_v22  ;;  %v4709_v26 = vmul.f32 -1.442695, %v2266_v22 }
0x1ce6   :  { %5470 = vpow2.f32 %v4709_v26 }
0x1cf1   :  { %v5469_v24 = vpop.eup %5468 }
0x1cf2   :  { %2276 = vrot.lane.b32.xlu1 %v5469_v24, %s5788_s15 }
0x1cf3   :  { %v5471_v28 = vpop.eup %5470 }
0x1cf4   :  { %v2270_v33 = vadd.f32 1.0, %v5471_v28 }
0x1cf6   :  { %5472 = vrcp.f32 %v2270_v33 }
0x1d03   :  { %v5473_v54 = vpop.eup %5472 }
0x1d04   :  { %v2274_v58 = vmul.f32 %v5473_v54, %v6374_v19  ;;  %v6563_v19 = vld [vmem:[%s7005_s5 + $0x18] sm:$0xff] }
0x1d64   :  { %v2277_v56 = vpop.permute.xlu1 %2276 }
0x1d65   :  { %v2279_v35 = vmul.f32 %v5473_v54, %v2277_v56 }
0x1d67   :  { %2281 = vrot.lane.b32.xlu1 %v2279_v35, %s5780_s10 }
0x1dd9   :  { %v2282_v37 = vpop.permute.xlu1 %2281 }
0x1dda   :  { %v6551_v60 = vadd.f32 %v2282_v37, %v2274_v58  ;;  %v6631_v37 = vld [vmem:[#allocation8] sm:$0xff] }
0x1ddc   :  { %5474 = vtanh.f32 %v6551_v60 }
0x1de9   :  { %v5475_v41 = vpop.eup %5474 }
0x1dea   :  { %2287 = vrot.lane.b32.xlu1 %v5475_v41, %s5788_s15 }
0x1e5c   :  { %v2288_v5 = vpop.permute.xlu1 %2287 }
0x1e5d   :  { %v2290_v42 = vmul.f32 %v5473_v54, %v2288_v5 }
0x1e5f   :  { %2364 = vrot.lane.b32.xlu1 %v2290_v42, %s5780_s10  ;;  %v6634_v42 = vld [vmem:[#allocation8 + $0x8] sm:$0xff] }
0x1ed1   :  { %v6556_v8 = vpop.permute.xlu1 %2364 }
0x1ed2   :  { %5181 = vmatmul.mubr.msk.f32.vlgmr.msra.gmra.mxu1 %vm303_vm4, %v6556_v8 }
0x1ed3   :  { %5195 = vmatpush3.msra.mxu1 %v6563_v19  ;;  %5202 = vmatprep.mubr.msk.f32.mxu1 %vm5787_vm3, %v5786_v1 }
0x1ed4   :  { %5196 = vmatprep.subr.mxu1 %v5786_v1 }
0x1ed5   :  { %5197 = vmatpush3.msra.mxu1 %v6572_v47 }
0x1ed6   :  { %5198 = vmatprep.subr.mxu1 %v5786_v1 }
0x1ed7   :  { %5199 = vmatpush3.msra.mxu1 %v6579_v51 }
0x1ed8   :  { %5200 = vmatprep.subr.mxu1 %v5786_v1 }
0x1ed9   :  { %5201 = vmatpush3.msra.mxu1 %v6586_v50 }
0x1eda   :  { %5203 = vmatmul.mubr.msk.f32.vlgmr.msra.gmra.mxu1 %vm303_vm4, %v2621_v62  ;;  %5216 = vmatprep.subr.mxu1 %v5786_v1 }
0x1edb   :  { %5217 = vmatpush3.msra.mxu1 %v6591_v17  ;;  %5224 = vmatprep.mubr.msk.f32.mxu1 %vm5787_vm3, %v5786_v1 }
0x1edc   :  { %5218 = vmatprep.subr.mxu1 %v5786_v1 }
0x1edd   :  { %5219 = vmatpush3.msra.mxu1 %v6597_v16 }
0x1ede   :  { %5220 = vmatprep.subr.mxu1 %v5786_v1 }
0x1edf   :  { %5221 = vmatpush3.msra.mxu1 %v6601_v39 }
0x1ee0   :  { %5222 = vmatprep.subr.mxu1 %v5786_v1 }
0x1ee1   :  { %5223 = vmatpush3.msra.mxu1 %v6605_v43 }
0x1ee2   :  { %5238 = vmatprep.subr.mxu1 %v5786_v1 }
0x1f92   :  { %v2434_v0 = vpop.f32.mrf.mxu1 }
0x1f93   :  { %v2435_v3 = vadd.f32 %v2434_v0, %v2359_v4 }
0x1f94   :  { %v5182_v7 = vpop.f32.mrf.mxu1 }
0x1f95   :  { %v2438_v9 = vadd.f32 %v6612_v63, %v2435_v3 }
0x1f97   :  { %5476 = vtanh.f32 %v2438_v9  ;;  %v4712_v27 = vmul.f32 -1.442695, %v2438_v9 }
0x1f99   :  { %5478 = vpow2.f32 %v4712_v27 }
0x1f9a   :  { %v6615_v11 = vpop.f32.mrf.mxu1 }
0x1f9c   :  { %v5204_v23 = vpop.f32.mrf.mxu1 }
0x1fa4   :  { %v5477_v25 = vpop.eup %5476 }
0x1fa5   :  { %2448 = vrot.lane.b32.xlu0 %v5477_v25, %s5788_s15 }
0x1fa6   :  { %v5479_v6 = vpop.eup %5478 }
0x1fa7   :  { %v2442_v10 = vadd.f32 1.0, %v5479_v6 }
0x1fa9   :  { %5480 = vrcp.f32 %v2442_v10 }
0x1fb6   :  { %v5481_v4 = vpop.eup %5480 }
0x1fb7   :  { %v2446_v40 = vmul.f32 %v5481_v4, %v6410_v44 }
0x2017   :  { %v2449_v13 = vpop.permute.xlu0 %2448 }
0x2018   :  { %v2451_v12 = vmul.f32 %v5481_v4, %v2449_v13 }
0x201a   :  { %2453 = vrot.lane.b32.xlu1 %v2451_v12, %s5780_s10 }
0x208c   :  { %v2454_v30 = vpop.permute.xlu1 %2453 }
0x208d   :  { %v6620_v31 = vadd.f32 %v2454_v30, %v2446_v40 }
0x208f   :  { %5482 = vtanh.f32 %v6620_v31 }
0x209c   :  { %v5483_v22 = vpop.eup %5482 }
0x209d   :  { %2459 = vrot.lane.b32.xlu0 %v5483_v22, %s5788_s15 }
0x210f   :  { %v2460_v24 = vpop.permute.xlu0 %2459 }
0x2110   :  { %v2462_v26 = vmul.f32 %v5481_v4, %v2460_v24 }
0x2112   :  { %v2470_v28 = vrot.slane %v2462_v26, %v6167_v46 }
0x2114   :  { %v2471_v33 = vcombine.high %v2470_v28, %v2470_v28  ;;  %v2478_v54 = vrot.slane %v2470_v28, %v6167_v46 }
0x2116   :  { %v2489_v56 = vrot.slane %v2478_v54, %v6171_v49  ;;  %v2485_v35 = vrot.slane %v2471_v33, %v6167_v46 }
0x2118   :  { %2494 = vrot.lane.b32.xlu1 %v2489_v56, %s5780_s10  ;;  %v2493_v44 = vrot.slane %v2485_v35, %v6171_v49 }
0x211a   :  { %2496 = vrot.lane.b32.xlu0 %v2493_v44, %s5780_s10 }
0x218a   :  { %v2495_v58 = vpop.permute.xlu1 %2494 }
0x218b   :  { %v2500_v41 = vmul.f32 %v6631_v37, %v2495_v58 }
0x218c   :  { %v2497_v5 = vpop.permute.xlu0 %2496 }
0x218d   :  { %v2501_v62 = vmul.f32 %v6634_v42, %v2497_v5  ;;  %v2502_v0 = vsel %vm303_vm4, %v2500_v41, 0.0 }
0x218e   :  { %2503 = vadd.xlane.f32.xlu1 %v2502_v0 }
0x218f   :  { %v2505_v3 = vsel %vm303_vm4, %v2501_v62, 0.0 }
0x2190   :  { %2506 = vadd.xlane.f32.xlu0 %v2505_v3 }
0x2217   :  { %v2504_v7 = vpop.xlane.xlu1 %2503 }
0x2218   :  { %v2508_v9 = vadd.f32 %v2504_v7, %v6196_v36 }
0x2219   :  { %v2507_v23 = vpop.xlane.xlu0 %2506 }
0x221a   :  { %v2509_v25 = vadd.f32 %v2507_v23, %v6193_v34  ;;  %2513 = vperm.xlu0 %5400, %v2508_v9  }
0x221c   :  { %2516 = vperm.xlu1 %5401, %v2509_v25  }
0x2295   :  { %v2514_v27 = vpop.permute.xlu0 %2513 }
0x2296   :  { %v2521_v10 = vrot.slane %v2514_v27, %v6200_v38 }
0x2297   :  { %v2517_v6 = vpop.permute.xlu1 %2516 }
0x2298   :  { %v2525_v4 = vrot.slane %v2517_v6, %v6200_v38 }
0x229a   :  { %v2526_v13 = vsel %vm809_vm6, %v2525_v4, %v2521_v10 }
0x229b   :  { %v2528_v12 = vsel %vm812_vm7, %v2526_v13, -inf }
0x229c   :  { %2529 = vmax.xlane.f32.xlu1 %v2528_v12 }
0x2325   :  { %v2530_v40 = vpop.xlane.xlu1 %2529 }
0x2326   :  { %v2535_v30 = vrot.slane %v2530_v40, %v6171_v49  ;;  %v2539_v22 = vrot.slane %v2530_v40, %v6189_v14 }
0x2328   :  { %v2542_v24 = vsub.f32 %v2508_v9, %v2535_v30  ;;  %v2543_v28 = vsub.f32 %v2509_v25, %v2539_v22 }
0x232a   :  { %v2544_v33 = vmul.f32 1.442695, %v2542_v24  ;;  %v2546_v54 = vmul.f32 1.442695, %v2543_v28 }
0x232c   :  { %5484 = vpow2.f32 %v2544_v33 }
0x232d   :  { %5486 = vpow2.f32 %v2546_v54 }
0x2339   :  { %v5485_v56 = vpop.eup %5484 }
0x233a   :  { %2551 = vperm.xlu0 %5400, %v5485_v56   ;;  %v5487_v35 = vpop.eup %5486 }
0x233e   :  { %2554 = vperm.xlu0 %5400, %v5487_v35  }
0x23b5   :  { %v2552_v44 = vpop.permute.xlu0 %2551 }
0x23b6   :  { %v2559_v41 = vrot.slane %v2552_v44, %v6200_v38 }
0x23b9   :  { %v2555_v58 = vpop.permute.xlu0 %2554 }
0x23ba   :  { %v2563_v5 = vrot.slane %v2555_v58, %v6200_v38 }
0x23bc   :  { %v2564_v62 = vsel %vm809_vm6, %v2563_v5, %v2559_v41 }
0x23bd   :  { %v2566_v0 = vsel %vm812_vm7, %v2564_v62, 0.0 }
0x23be   :  { %2567 = vadd.xlane.f32.xlu0 %v2566_v0 }
0x2447   :  { %v2568_v3 = vpop.xlane.xlu0 %2567 }
0x2448   :  { %5488 = vrcp.f32 %v2568_v3 }
0x2455   :  { %v5489_v7 = vpop.eup %5488 }
0x2456   :  { %v2578_v9 = vrot.slane %v5489_v7, %v6189_v14  ;;  %v2574_v23 = vrot.slane %v5489_v7, %v6171_v49 }
0x2458   :  { %v2582_v25 = vmul.f32 %v5487_v35, %v2578_v9  ;;  %v2581_v27 = vmul.f32 %v5485_v56, %v2574_v23 }
0x245a   :  { %2590 = vperm.xlu0 %5400, %v2582_v25   ;;  %2585 = vperm.xlu1 %5401, %v2581_v27  }
0x245e   :  { %2609 = vrot.lane.b32.xlu0 %v2462_v26, %s5780_s10 }
0x24d5   :  { %v2591_v6 = vpop.permute.xlu0 %2590  ;;  %v2586_v10 = vpop.permute.xlu1 %2585 }
0x24d6   :  { %v2594_v4 = vmul.f32 %v6634_v42, %v2591_v6  ;;  %v2593_v13 = vmul.f32 %v6631_v37, %v2586_v10 }
0x24d8   :  { %v2602_v12 = vsel %vm303_vm4, %v2594_v4, 0.0  ;;  %v2595_v40 = vsel %vm303_vm4, %v2593_v13, 0.0 }
0x24d9   :  { %v2603_v30 = vrot.slane %v2602_v12, 4  ;;  %v2596_v22 = vrot.slane %v2595_v40, 4  ;;  %v2610_v24 = vpop.permute.xlu0 %2609 }
0x24da   :  { %2613 = vst.msk [vmem:[#allocation3 + $0x6] sm:$0x3] %vm897_vm8, %v2610_v24  ;;  %5225 = vmatmul.mubr.msk.f32.vlgmr.msra.gmra.mxu1 %vm303_vm4, %v2610_v24 }
0x24db   :  { %v2604_v28 = vadd.f32 %v2603_v30, %v2602_v12  ;;  %v2597_v33 = vadd.f32 %v2596_v22, %v2595_v40  ;;  %5239 = vmatpush3.msra.mxu1 %v6449_v52  ;;  %5246 = vmatprep.mubr.msk.f32.mxu1 %vm5787_vm3, %v5786_v1 }
0x24dc   :  { %5240 = vmatprep.subr.mxu1 %v5786_v1 }
0x24dd   :  { %v2605_v26 = vrot.slane %v2604_v28, 2  ;;  %v2598_v54 = vrot.slane %v2597_v33, 2  ;;  %5241 = vmatpush3.msra.mxu1 %v6458_v48 }
0x24de   :  { %5242 = vmatprep.subr.mxu1 %v5786_v1 }
0x24df   :  { %v2606_v56 = vadd.f32 %v2605_v26, %v2604_v28  ;;  %v2599_v35 = vadd.f32 %v2598_v54, %v2597_v33  ;;  %5243 = vmatpush3.msra.mxu1 %v6465_v15 }
0x24e0   :  { %5244 = vmatprep.subr.mxu1 %v5786_v1 }
0x24e1   :  { %v2607_v44 = vrot.slane %v2606_v56, 1  ;;  %v2600_v58 = vrot.slane %v2599_v35, 1  ;;  %5245 = vmatpush3.msra.mxu1 %v6472_v21 }
0x24e2   :  { %5260 = vmatprep.subr.mxu1 %v5786_v1 }
0x24e3   :  { %v2608_v41 = vadd.f32 %v2607_v44, %v2606_v56  ;;  %v2601_v5 = vadd.f32 %v2600_v58, %v2599_v35 }
0x24e5   :  { %v2616_v62 = vsel %vm809_vm6, %v2608_v41, %v2601_v5 }
0x24e6   :  { %2619 = vst.msk [vmem:[#allocation4 + $0x6] sm:$0x3] %vm897_vm8, %v2616_v62  ;;  %5192 = vmatmul.mubr.msk.f32.vlgmr.msra.gmra.mxu0 %vm303_vm4, %v2616_v62 }
0x24e7   :  { %5206 = vmatpush3.msra.mxu0 %v6482_v29  ;;  %5213 = vmatprep.mubr.msk.f32.mxu0 %vm5787_vm3, %v5786_v1 }
0x24e8   :  { %5207 = vmatprep.subr.mxu0 %v5786_v1 }
0x24e9   :  { %5208 = vmatpush3.msra.mxu0 %v6491_v55 }
0x24ea   :  { %5209 = vmatprep.subr.mxu0 %v5786_v1 }
0x24eb   :  { %5210 = vmatpush3.msra.mxu0 %v6498_v57 }
0x24ec   :  { %5211 = vmatprep.subr.mxu0 %v5786_v1 }
0x24ed   :  { %5212 = vmatpush3.msra.mxu0 %v6505_v2 }
0x24ee   :  { %5214 = vmatmul.mubr.msk.f32.vlgmr.msra.gmra.mxu0 %vm303_vm4, %v6556_v8  ;;  %5227 = vmatprep.subr.mxu0 %v5786_v1 }
0x24ef   :  { %5228 = vmatpush3.msra.mxu0 %v6514_v59  ;;  %5235 = vmatprep.mubr.msk.f32.mxu0 %vm5787_vm3, %v5786_v1 }
0x24f0   :  { %5229 = vmatprep.subr.mxu0 %v5786_v1 }
0x24f1   :  { %5230 = vmatpush3.msra.mxu0 %v6523_v61 }
0x24f2   :  { %5231 = vmatprep.subr.mxu0 %v5786_v1 }
0x24f3   :  { %5232 = vmatpush3.msra.mxu0 %v6530_v32 }
0x24f4   :  { %5233 = vmatprep.subr.mxu0 %v5786_v1 }
0x24f5   :  { %5234 = vmatpush3.msra.mxu0 %v6537_v53 }
0x24f6   :  { %5249 = vmatprep.subr.mxu0 %v5786_v1 }
0x259a   :  { %v2931_v8 = vpop.f32.mrf.mxu1 }
0x259c   :  { %v5226_v0 = vpop.f32.mrf.mxu1 }
0x25a6   :  { %v2690_v3 = vpop.f32.mrf.mxu0 }
0x25a7   :  { %v2764_v9 = vadd.f32 %v6615_v11, %v2690_v3 }
0x25a8   :  { %v5193_v7 = vpop.f32.mrf.mxu0 }
0x25ae   :  { %v2833_v23 = vpop.f32.mrf.mxu0 }
0x25af   :  { %v2837_v25 = vadd.f32 %v2833_v23, %v2764_v9 }
0x25b0   :  { %v5215_v27 = vpop.f32.mrf.mxu0 }
0x25b1   :  { %v2838_v6 = vadd.f32 %v6545_v45, %v2837_v25 }
0x25b3   :  { %5490 = vtanh.f32 %v2838_v6  ;;  %v4716_v4 = vmul.f32 -1.442695, %v2838_v6 }
0x25b5   :  { %5492 = vpow2.f32 %v4716_v4 }
0x25c0   :  { %v5491_v10 = vpop.eup %5490 }
0x25c1   :  { %2848 = vrot.lane.b32.xlu1 %v5491_v10, %s5788_s15 }
0x25c2   :  { %v5493_v13 = vpop.eup %5492 }
0x25c3   :  { %v2842_v12 = vadd.f32 1.0, %v5493_v13 }
0x25c5   :  { %5494 = vrcp.f32 %v2842_v12 }
0x25d2   :  { %v5495_v40 = vpop.eup %5494 }
0x25d3   :  { %v2846_v11 = vmul.f32 %v5495_v40, %v6551_v60  ;;  %v3193_v60 = vld [vmem:[#allocation2 + $0xa] sm:$0x3] }
0x2633   :  { %v2849_v30 = vpop.permute.xlu1 %2848 }
0x2634   :  { %v2851_v22 = vmul.f32 %v5495_v40, %v2849_v30 }
0x2636   :  { %2853 = vrot.lane.b32.xlu1 %v2851_v22, %s5780_s10 }
0x26a8   :  { %v2854_v24 = vpop.permute.xlu1 %2853 }
0x26a9   :  { %v6700_v28 = vadd.f32 %v2854_v24, %v2846_v11 }
0x26ab   :  { %5496 = vtanh.f32 %v6700_v28 }
0x26b8   :  { %v5497_v33 = vpop.eup %5496 }
0x26b9   :  { %2859 = vrot.lane.b32.xlu1 %v5497_v33, %s5788_s15 }
0x272b   :  { %v2860_v26 = vpop.permute.xlu1 %2859 }
0x272c   :  { %v2862_v54 = vmul.f32 %v5495_v40, %v2860_v26 }
0x272e   :  { %2936 = vrot.lane.b32.xlu1 %v2862_v54, %s5780_s10 }
0x27a0   :  { %v6705_v56 = vpop.permute.xlu1 %2936 }
0x27a1   :  { %5236 = vmatmul.mubr.msk.f32.vlgmr.msra.gmra.mxu0 %vm303_vm4, %v6705_v56 }
0x27a2   :  { %5250 = vmatpush3.msra.mxu0 %v6563_v19  ;;  %5257 = vmatprep.mubr.msk.f32.mxu0 %vm5787_vm3, %v5786_v1 }
0x27a3   :  { %5251 = vmatprep.subr.mxu0 %v5786_v1 }
0x27a4   :  { %5252 = vmatpush3.msra.mxu0 %v6572_v47 }
0x27a5   :  { %5253 = vmatprep.subr.mxu0 %v5786_v1 }
0x27a6   :  { %5254 = vmatpush3.msra.mxu0 %v6579_v51 }
0x27a7   :  { %5255 = vmatprep.subr.mxu0 %v5786_v1 }
0x27a8   :  { %5256 = vmatpush3.msra.mxu0 %v6586_v50 }
0x27a9   :  { %5258 = vmatmul.mubr.msk.f32.vlgmr.msra.gmra.mxu0 %vm303_vm4, %v3193_v60  ;;  %5271 = vmatprep.subr.mxu0 %v5786_v1 }
0x27aa   :  { %5272 = vmatpush3.msra.mxu0 %v6591_v17  ;;  %5279 = vmatprep.mubr.msk.f32.mxu0 %vm5787_vm3, %v5786_v1 }
0x27ab   :  { %5273 = vmatprep.subr.mxu0 %v5786_v1 }
0x27ac   :  { %5274 = vmatpush3.msra.mxu0 %v6597_v16 }
0x27ad   :  { %5275 = vmatprep.subr.mxu0 %v5786_v1 }
0x27ae   :  { %5276 = vmatpush3.msra.mxu0 %v6601_v39 }
0x27af   :  { %5277 = vmatprep.subr.mxu0 %v5786_v1 }
0x27b0   :  { %5278 = vmatpush3.msra.mxu0 %v6605_v43 }
0x27b1   :  { %5293 = vmatprep.subr.mxu0 %v5786_v1 }
0x2861   :  { %v3006_v35 = vpop.f32.mrf.mxu0 }
0x2862   :  { %v3007_v44 = vadd.f32 %v3006_v35, %v2931_v8 }
0x2863   :  { %v5237_v58 = vpop.f32.mrf.mxu0 }
0x2864   :  { %v3010_v41 = vadd.f32 %v6612_v63, %v3007_v44 }
0x2866   :  { %5498 = vtanh.f32 %v3010_v41  ;;  %v4719_v3 = vmul.f32 -1.442695, %v3010_v41 }
0x2868   :  { %5500 = vpow2.f32 %v4719_v3 }
0x2869   :  { %v6731_v5 = vpop.f32.mrf.mxu0 }
0x286b   :  { %v5259_v62 = vpop.f32.mrf.mxu0 }
0x2873   :  { %v5499_v0 = vpop.eup %5498 }
0x2874   :  { %3020 = vrot.lane.b32.xlu0 %v5499_v0, %s5788_s15 }
0x2875   :  { %v5501_v7 = vpop.eup %5500 }
0x2876   :  { %v3014_v9 = vadd.f32 1.0, %v5501_v7 }
0x2878   :  { %5502 = vrcp.f32 %v3014_v9 }
0x2885   :  { %v5503_v23 = vpop.eup %5502 }
0x2886   :  { %v3018_v8 = vmul.f32 %v5503_v23, %v6620_v31 }
0x28e6   :  { %v3021_v25 = vpop.permute.xlu0 %3020 }
0x28e7   :  { %v3023_v27 = vmul.f32 %v5503_v23, %v3021_v25 }
0x28e9   :  { %3025 = vrot.lane.b32.xlu1 %v3023_v27, %s5780_s10 }
0x295b   :  { %v3026_v6 = vpop.permute.xlu1 %3025 }
0x295c   :  { %v6736_v10 = vadd.f32 %v3026_v6, %v3018_v8 }
0x295e   :  { %5504 = vtanh.f32 %v6736_v10 }
0x296b   :  { %v5505_v4 = vpop.eup %5504 }
0x296c   :  { %3031 = vrot.lane.b32.xlu0 %v5505_v4, %s5788_s15 }
0x29de   :  { %v3032_v13 = vpop.permute.xlu0 %3031 }
0x29df   :  { %v3034_v12 = vmul.f32 %v5503_v23, %v3032_v13 }
0x29e1   :  { %v3042_v40 = vrot.slane %v3034_v12, %v6167_v46 }
0x29e3   :  { %v3043_v30 = vcombine.high %v3042_v40, %v3042_v40  ;;  %v3050_v22 = vrot.slane %v3042_v40, %v6167_v46 }
0x29e5   :  { %v3061_v11 = vrot.slane %v3050_v22, %v6171_v49  ;;  %v3057_v24 = vrot.slane %v3043_v30, %v6167_v46 }
0x29e7   :  { %3066 = vrot.lane.b32.xlu1 %v3061_v11, %s5780_s10  ;;  %v3065_v31 = vrot.slane %v3057_v24, %v6171_v49 }
0x29e9   :  { %3068 = vrot.lane.b32.xlu0 %v3065_v31, %s5780_s10 }
0x2a59   :  { %v3067_v33 = vpop.permute.xlu1 %3066 }
0x2a5a   :  { %v3072_v26 = vmul.f32 %v6631_v37, %v3067_v33 }
0x2a5b   :  { %v3069_v54 = vpop.permute.xlu0 %3068 }
0x2a5c   :  { %v3073_v60 = vmul.f32 %v6634_v42, %v3069_v54  ;;  %v3074_v35 = vsel %vm303_vm4, %v3072_v26, 0.0 }
0x2a5d   :  { %3075 = vadd.xlane.f32.xlu1 %v3074_v35 }
0x2a5e   :  { %v3077_v44 = vsel %vm303_vm4, %v3073_v60, 0.0 }
0x2a5f   :  { %3078 = vadd.xlane.f32.xlu0 %v3077_v44 }
0x2ae6   :  { %v3076_v58 = vpop.xlane.xlu1 %3075 }
0x2ae7   :  { %v3080_v41 = vadd.f32 %v3076_v58, %v6196_v36 }
0x2ae8   :  { %v3079_v62 = vpop.xlane.xlu0 %3078 }
0x2ae9   :  { %v3081_v0 = vadd.f32 %v3079_v62, %v6193_v34  ;;  %3085 = vperm.xlu0 %5400, %v3080_v41  }
0x2aeb   :  { %3088 = vperm.xlu1 %5401, %v3081_v0  }
0x2b64   :  { %v3086_v3 = vpop.permute.xlu0 %3085 }
0x2b65   :  { %v3093_v9 = vrot.slane %v3086_v3, %v6200_v38 }
0x2b66   :  { %v3089_v7 = vpop.permute.xlu1 %3088 }
0x2b67   :  { %v3097_v23 = vrot.slane %v3089_v7, %v6200_v38 }
0x2b69   :  { %v3098_v25 = vsel %vm809_vm6, %v3097_v23, %v3093_v9 }
0x2b6a   :  { %v3100_v27 = vsel %vm812_vm7, %v3098_v25, -inf }
0x2b6b   :  { %3101 = vmax.xlane.f32.xlu1 %v3100_v27 }
0x2bf4   :  { %v3102_v8 = vpop.xlane.xlu1 %3101 }
0x2bf5   :  { %v3107_v6 = vrot.slane %v3102_v8, %v6171_v49  ;;  %v3111_v4 = vrot.slane %v3102_v8, %v6189_v14 }
0x2bf7   :  { %v3114_v13 = vsub.f32 %v3080_v41, %v3107_v6  ;;  %v3115_v40 = vsub.f32 %v3081_v0, %v3111_v4 }
0x2bf9   :  { %v3116_v30 = vmul.f32 1.442695, %v3114_v13  ;;  %v3118_v22 = vmul.f32 1.442695, %v3115_v40 }
0x2bfb   :  { %5506 = vpow2.f32 %v3116_v30 }
0x2bfc   :  { %5508 = vpow2.f32 %v3118_v22 }
0x2c08   :  { %v5507_v11 = vpop.eup %5506 }
0x2c09   :  { %3123 = vperm.xlu0 %5400, %v5507_v11   ;;  %v5509_v24 = vpop.eup %5508 }
0x2c0d   :  { %3126 = vperm.xlu0 %5400, %v5509_v24  }
0x2c84   :  { %v3124_v31 = vpop.permute.xlu0 %3123 }
0x2c85   :  { %v3131_v26 = vrot.slane %v3124_v31, %v6200_v38 }
0x2c88   :  { %v3127_v33 = vpop.permute.xlu0 %3126 }
0x2c89   :  { %v3135_v54 = vrot.slane %v3127_v33, %v6200_v38 }
0x2c8b   :  { %v3136_v60 = vsel %vm809_vm6, %v3135_v54, %v3131_v26 }
0x2c8c   :  { %v3138_v35 = vsel %vm812_vm7, %v3136_v60, 0.0 }
0x2c8d   :  { %3139 = vadd.xlane.f32.xlu0 %v3138_v35 }
0x2d16   :  { %v3140_v44 = vpop.xlane.xlu0 %3139 }
0x2d17   :  { %5510 = vrcp.f32 %v3140_v44 }
0x2d24   :  { %v5511_v58 = vpop.eup %5510 }
0x2d25   :  { %v3150_v41 = vrot.slane %v5511_v58, %v6189_v14  ;;  %v3146_v62 = vrot.slane %v5511_v58, %v6171_v49 }
0x2d27   :  { %v3154_v0 = vmul.f32 %v5509_v24, %v3150_v41  ;;  %v3153_v3 = vmul.f32 %v5507_v11, %v3146_v62 }
0x2d29   :  { %3162 = vperm.xlu0 %5400, %v3154_v0   ;;  %3157 = vperm.xlu1 %5401, %v3153_v3  }
0x2d2d   :  { %3181 = vrot.lane.b32.xlu0 %v3034_v12, %s5780_s10 }
0x2da4   :  { %v3163_v7 = vpop.permute.xlu0 %3162  ;;  %v3158_v9 = vpop.permute.xlu1 %3157 }
0x2da5   :  { %v3166_v23 = vmul.f32 %v6634_v42, %v3163_v7  ;;  %v3165_v25 = vmul.f32 %v6631_v37, %v3158_v9 }
0x2da7   :  { %v3174_v27 = vsel %vm303_vm4, %v3166_v23, 0.0  ;;  %v3167_v8 = vsel %vm303_vm4, %v3165_v25, 0.0 }
0x2da8   :  { %v3175_v6 = vrot.slane %v3174_v27, 4  ;;  %v3168_v4 = vrot.slane %v3167_v8, 4  ;;  %v3182_v13 = vpop.permute.xlu0 %3181 }
0x2da9   :  { %3185 = vst.msk [vmem:[#allocation3 + $0x8] sm:$0x3] %vm897_vm8, %v3182_v13  ;;  %5280 = vmatmul.mubr.msk.f32.vlgmr.msra.gmra.mxu0 %vm303_vm4, %v3182_v13 }
0x2daa   :  { %v3176_v40 = vadd.f32 %v3175_v6, %v3174_v27  ;;  %v3169_v30 = vadd.f32 %v3168_v4, %v3167_v8  ;;  %5294 = vmatpush3.msra.mxu0 %v6449_v52  ;;  %5301 = vmatprep.mubr.msk.f32.mxu0 %vm5787_vm3, %v5786_v1 }
0x2dab   :  { %5295 = vmatprep.subr.mxu0 %v5786_v1 }
0x2dac   :  { %v3177_v12 = vrot.slane %v3176_v40, 2  ;;  %v3170_v22 = vrot.slane %v3169_v30, 2  ;;  %5296 = vmatpush3.msra.mxu0 %v6458_v48 }
0x2dad   :  { %5297 = vmatprep.subr.mxu0 %v5786_v1 }
0x2dae   :  { %v3178_v11 = vadd.f32 %v3177_v12, %v3176_v40  ;;  %v3171_v24 = vadd.f32 %v3170_v22, %v3169_v30  ;;  %5298 = vmatpush3.msra.mxu0 %v6465_v15 }
0x2daf   :  { %5299 = vmatprep.subr.mxu0 %v5786_v1 }
0x2db0   :  { %v3179_v31 = vrot.slane %v3178_v11, 1  ;;  %v3172_v33 = vrot.slane %v3171_v24, 1  ;;  %5300 = vmatpush3.msra.mxu0 %v6472_v21 }
0x2db1   :  { %5315 = vmatprep.subr.mxu0 %v5786_v1 }
0x2db2   :  { %v3180_v52 = vadd.f32 %v3179_v31, %v3178_v11  ;;  %v3173_v26 = vadd.f32 %v3172_v33, %v3171_v24 }
0x2db4   :  { %v3188_v54 = vsel %vm809_vm6, %v3180_v52, %v3173_v26 }
0x2db5   :  { %3191 = vst.msk [vmem:[#allocation4 + $0x8] sm:$0x3] %vm897_vm8, %v3188_v54  ;;  %5247 = vmatmul.mubr.msk.f32.vlgmr.msra.gmra.mxu1 %vm303_vm4, %v3188_v54 }
0x2db6   :  { %5261 = vmatpush3.msra.mxu1 %v6482_v29  ;;  %5268 = vmatprep.mubr.msk.f32.mxu1 %vm5787_vm3, %v5786_v1 }
0x2db7   :  { %5262 = vmatprep.subr.mxu1 %v5786_v1 }
0x2db8   :  { %5263 = vmatpush3.msra.mxu1 %v6491_v55 }
0x2db9   :  { %5264 = vmatprep.subr.mxu1 %v5786_v1 }
0x2dba   :  { %5265 = vmatpush3.msra.mxu1 %v6498_v57 }
0x2dbb   :  { %5266 = vmatprep.subr.mxu1 %v5786_v1 }
0x2dbc   :  { %5267 = vmatpush3.msra.mxu1 %v6505_v2 }
0x2dbd   :  { %5269 = vmatmul.mubr.msk.f32.vlgmr.msra.gmra.mxu1 %vm303_vm4, %v6705_v56  ;;  %5282 = vmatprep.subr.mxu1 %v5786_v1 }
0x2dbe   :  { %5283 = vmatpush3.msra.mxu1 %v6514_v59  ;;  %5290 = vmatprep.mubr.msk.f32.mxu1 %vm5787_vm3, %v5786_v1 }
0x2dbf   :  { %5284 = vmatprep.subr.mxu1 %v5786_v1 }
0x2dc0   :  { %5285 = vmatpush3.msra.mxu1 %v6523_v61 }
0x2dc1   :  { %5286 = vmatprep.subr.mxu1 %v5786_v1 }
0x2dc2   :  { %5287 = vmatpush3.msra.mxu1 %v6530_v32 }
0x2dc3   :  { %5288 = vmatprep.subr.mxu1 %v5786_v1 }
0x2dc4   :  { %5289 = vmatpush3.msra.mxu1 %v6537_v53 }
0x2dc5   :  { %5304 = vmatprep.subr.mxu1 %v5786_v1 }
0x2e69   :  { %v3503_v48 = vpop.f32.mrf.mxu0 }
0x2e6b   :  { %v5281_v15 = vpop.f32.mrf.mxu0 }
0x2e75   :  { %v3262_v21 = vpop.f32.mrf.mxu1 }
0x2e76   :  { %v3336_v55 = vadd.f32 %v6731_v5, %v3262_v21 }
0x2e77   :  { %v5248_v29 = vpop.f32.mrf.mxu1 }
0x2e7d   :  { %v3405_v57 = vpop.f32.mrf.mxu1 }
0x2e7e   :  { %v3409_v2 = vadd.f32 %v3405_v57, %v3336_v55 }
0x2e7f   :  { %v5270_v59 = vpop.f32.mrf.mxu1 }
0x2e80   :  { %v3410_v61 = vadd.f32 %v6545_v45, %v3409_v2 }
0x2e82   :  { %5512 = vtanh.f32 %v3410_v61  ;;  %v4723_v32 = vmul.f32 -1.442695, %v3410_v61 }
0x2e84   :  { %5514 = vpow2.f32 %v4723_v32 }
0x2e8f   :  { %v5513_v56 = vpop.eup %5512 }
0x2e90   :  { %3420 = vrot.lane.b32.xlu1 %v5513_v56, %s5788_s15 }
0x2e91   :  { %v5515_v53 = vpop.eup %5514 }
0x2e92   :  { %v3414_v60 = vadd.f32 1.0, %v5515_v53 }
0x2e94   :  { %5516 = vrcp.f32 %v3414_v60 }
0x2ea1   :  { %v5517_v35 = vpop.eup %5516 }
0x2ea2   :  { %v3418_v5 = vmul.f32 %v5517_v35, %v6700_v28  ;;  %v3765_v28 = vld [vmem:[#allocation2 + $0xc] sm:$0x3] }
0x2f02   :  { %v3421_v44 = vpop.permute.xlu1 %3420 }
0x2f03   :  { %v3423_v58 = vmul.f32 %v5517_v35, %v3421_v44 }
0x2f05   :  { %3425 = vrot.lane.b32.xlu1 %v3423_v58, %s5780_s10 }
0x2f77   :  { %v3426_v41 = vpop.permute.xlu1 %3425 }
0x2f78   :  { %v6812_v62 = vadd.f32 %v3426_v41, %v3418_v5 }
0x2f7a   :  { %5518 = vtanh.f32 %v6812_v62 }
0x2f87   :  { %v5519_v45 = vpop.eup %5518 }
0x2f88   :  { %3431 = vrot.lane.b32.xlu1 %v5519_v45, %s5788_s15 }
0x2ffa   :  { %v3432_v0 = vpop.permute.xlu1 %3431 }
0x2ffb   :  { %v3434_v3 = vmul.f32 %v5517_v35, %v3432_v0 }
0x2ffd   :  { %3508 = vrot.lane.b32.xlu1 %v3434_v3, %s5780_s10 }
0x306f   :  { %v6817_v7 = vpop.permute.xlu1 %3508 }
0x3070   :  { %5291 = vmatmul.mubr.msk.f32.vlgmr.msra.gmra.mxu1 %vm303_vm4, %v6817_v7 }
0x3071   :  { %5305 = vmatpush3.msra.mxu1 %v6563_v19  ;;  %5312 = vmatprep.mubr.msk.f32.mxu1 %vm5787_vm3, %v5786_v1 }
0x3072   :  { %5306 = vmatprep.subr.mxu1 %v5786_v1 }
0x3073   :  { %5307 = vmatpush3.msra.mxu1 %v6572_v47 }
0x3074   :  { %5308 = vmatprep.subr.mxu1 %v5786_v1 }
0x3075   :  { %5309 = vmatpush3.msra.mxu1 %v6579_v51 }
0x3076   :  { %5310 = vmatprep.subr.mxu1 %v5786_v1 }
0x3077   :  { %5311 = vmatpush3.msra.mxu1 %v6586_v50 }
0x3078   :  { %5313 = vmatmul.mubr.msk.f32.vlgmr.msra.gmra.mxu1 %vm303_vm4, %v3765_v28  ;;  %5326 = vmatprep.subr.mxu1 %v5786_v1 }
0x3079   :  { %5327 = vmatpush3.msra.mxu1 %v6591_v17  ;;  %5334 = vmatprep.mubr.msk.f32.mxu1 %vm5787_vm3, %v5786_v1 }
0x307a   :  { %5328 = vmatprep.subr.mxu1 %v5786_v1 }
0x307b   :  { %5329 = vmatpush3.msra.mxu1 %v6597_v16 }
0x307c   :  { %5330 = vmatprep.subr.mxu1 %v5786_v1 }
0x307d   :  { %5331 = vmatpush3.msra.mxu1 %v6601_v39 }
0x307e   :  { %5332 = vmatprep.subr.mxu1 %v5786_v1 }
0x307f   :  { %5333 = vmatpush3.msra.mxu1 %v6605_v43 }
0x3130   :  { %v3578_v19 = vpop.f32.mrf.mxu1 }
0x3131   :  { %v3579_v47 = vadd.f32 %v3578_v19, %v3503_v48 }
0x3132   :  { %v5292_v51 = vpop.f32.mrf.mxu1 }
0x3133   :  { %v3582_v50 = vadd.f32 %v6612_v63, %v3579_v47 }
0x3135   :  { %5520 = vtanh.f32 %v3582_v50  ;;  %v4726_v16 = vmul.f32 -1.442695, %v3582_v50 }
0x3137   :  { %5522 = vpow2.f32 %v4726_v16 }
0x3138   :  { %v6842_v17 = vpop.f32.mrf.mxu1 }
0x313a   :  { %v5314_v9 = vpop.f32.mrf.mxu1 }
0x3142   :  { %v5521_v23 = vpop.eup %5520 }
0x3143   :  { %3592 = vrot.lane.b32.xlu0 %v5521_v23, %s5788_s15 }
0x3144   :  { %v5523_v25 = vpop.eup %5522 }
0x3145   :  { %v3586_v39 = vadd.f32 1.0, %v5523_v25 }
0x3147   :  { %5524 = vrcp.f32 %v3586_v39 }
0x3154   :  { %v5525_v27 = vpop.eup %5524 }
0x3155   :  { %v3590_v6 = vmul.f32 %v5525_v27, %v6736_v10 }
0x31b5   :  { %v3593_v8 = vpop.permute.xlu0 %3592 }
0x31b6   :  { %v3595_v43 = vmul.f32 %v5525_v27, %v3593_v8 }
0x31b8   :  { %3597 = vrot.lane.b32.xlu1 %v3595_v43, %s5780_s10 }
0x322a   :  { %v3598_v63 = vpop.permute.xlu1 %3597 }
0x322b   :  { %v6847_v4 = vadd.f32 %v3598_v63, %v3590_v6 }
0x322d   :  { %5526 = vtanh.f32 %v6847_v4 }
0x323a   :  { %v5527_v13 = vpop.eup %5526 }
0x323b   :  { %3603 = vrot.lane.b32.xlu0 %v5527_v13, %s5788_s15 }
0x32ad   :  { %v3604_v40 = vpop.permute.xlu0 %3603 }
0x32ae   :  { %v3606_v30 = vmul.f32 %v5525_v27, %v3604_v40 }
0x32b0   :  { %v3614_v12 = vrot.slane %v3606_v30, %v6167_v46 }
0x32b2   :  { %v3615_v22 = vcombine.high %v3614_v12, %v3614_v12  ;;  %v3622_v11 = vrot.slane %v3614_v12, %v6167_v46 }
0x32b4   :  { %v3633_v24 = vrot.slane %v3622_v11, %v6171_v49  ;;  %v3629_v31 = vrot.slane %v3615_v22, %v6167_v46 }
0x32b6   :  { %3638 = vrot.lane.b32.xlu1 %v3633_v24, %s5780_s10  ;;  %v3637_v10 = vrot.slane %v3629_v31, %v6171_v49  ;;  %v4338_v31 = vld [vmem:[#allocation4] sm:$0xff] }
0x32b8   :  { %3640 = vrot.lane.b32.xlu0 %v3637_v10, %s5780_s10 }
0x3328   :  { %v3639_v33 = vpop.permute.xlu1 %3638 }
0x3329   :  { %v3644_v52 = vmul.f32 %v6631_v37, %v3639_v33 }
0x332a   :  { %v3641_v26 = vpop.permute.xlu0 %3640 }
0x332b   :  { %v3645_v54 = vmul.f32 %v6634_v42, %v3641_v26  ;;  %v3646_v48 = vsel %vm303_vm4, %v3644_v52, 0.0 }
0x332c   :  { %3647 = vadd.xlane.f32.xlu1 %v3646_v48 }
0x332d   :  { %v3649_v15 = vsel %vm303_vm4, %v3645_v54, 0.0 }
0x332e   :  { %3650 = vadd.xlane.f32.xlu0 %v3649_v15 }
0x33b5   :  { %v3648_v21 = vpop.xlane.xlu1 %3647 }
0x33b6   :  { %v3652_v29 = vadd.f32 %v3648_v21, %v6196_v36 }
0x33b7   :  { %v3651_v55 = vpop.xlane.xlu0 %3650 }
0x33b8   :  { %v3653_v57 = vadd.f32 %v3651_v55, %v6193_v34  ;;  %3657 = vperm.xlu0 %5400, %v3652_v29   ;;  %v5593_v55 = vld [vmem:[%s7007_s7 + $0x10] sm:$0xff] }
0x33ba   :  { %3660 = vperm.xlu1 %5401, %v3653_v57  }
0x3433   :  { %v3658_v2 = vpop.permute.xlu0 %3657 }
0x3434   :  { %v3665_v61 = vrot.slane %v3658_v2, %v6200_v38  ;;  %v5595_v2 = vld [vmem:[%s7007_s7] sm:$0xff] }
0x3435   :  { %v3661_v59 = vpop.permute.xlu1 %3660 }
0x3436   :  { %v3669_v56 = vrot.slane %v3661_v59, %v6200_v38  ;;  %v5596_v59 = vld [vmem:[%s7009_s9 + $0x18] sm:$0xff] }
0x3438   :  { %v3670_v32 = vsel %vm809_vm6, %v3669_v56, %v3665_v61  ;;  %v5597_v61 = vld [vmem:[%s7009_s9 + $0x10] sm:$0xff]  ;;  %v5599_v56 = vld [vmem:[%s7009_s9] sm:$0xff] }
0x3439   :  { %v3672_v53 = vsel %vm812_vm7, %v3670_v32, -inf }
0x343a   :  { %3673 = vmax.xlane.f32.xlu1 %v3672_v53 }
0x34c3   :  { %v3674_v60 = vpop.xlane.xlu1 %3673 }
0x34c4   :  { %v3679_v35 = vrot.slane %v3674_v60, %v6171_v49  ;;  %v3683_v44 = vrot.slane %v3674_v60, %v6189_v14 }
0x34c6   :  { %v3686_v58 = vsub.f32 %v3652_v29, %v3679_v35  ;;  %v3687_v5 = vsub.f32 %v3653_v57, %v3683_v44  ;;  %v5592_v29 = vld [vmem:[%s7007_s7 + $0x18] sm:$0xff]  ;;  %v5594_v57 = vld [vmem:[%s7007_s7 + $0x8] sm:$0xff] }
0x34c8   :  { %v3688_v41 = vmul.f32 1.442695, %v3686_v58  ;;  %v3690_v45 = vmul.f32 1.442695, %v3687_v5 }
0x34ca   :  { %5528 = vpow2.f32 %v3688_v41 }
0x34cb   :  { %5530 = vpow2.f32 %v3690_v45  ;;  %v5600_v45 = vld [vmem:[%s7008_s8] ss:$0 sm:$0xff] }
0x34d7   :  { %v5529_v0 = vpop.eup %5528 }
0x34d8   :  { %3695 = vperm.xlu0 %5400, %v5529_v0   ;;  %v5531_v3 = vpop.eup %5530 }
0x34dc   :  { %3698 = vperm.xlu0 %5400, %v5531_v3  }
0x3553   :  { %v3696_v28 = vpop.permute.xlu0 %3695 }
0x3554   :  { %v3703_v47 = vrot.slane %v3696_v28, %v6200_v38 }
0x3557   :  { %v3699_v19 = vpop.permute.xlu0 %3698 }
0x3558   :  { %v3707_v51 = vrot.slane %v3699_v19, %v6200_v38 }
0x355a   :  { %v3708_v50 = vsel %vm809_vm6, %v3707_v51, %v3703_v47 }
0x355b   :  { %v3710_v9 = vsel %vm812_vm7, %v3708_v50, 0.0 }
0x355c   :  { %3711 = vadd.xlane.f32.xlu0 %v3710_v9 }
0x35e5   :  { %v3712_v23 = vpop.xlane.xlu0 %3711 }
0x35e6   :  { %5532 = vrcp.f32 %v3712_v23 }
0x35f3   :  { %v5533_v16 = vpop.eup %5532 }
0x35f4   :  { %v3722_v25 = vrot.slane %v5533_v16, %v6189_v14  ;;  %v3718_v39 = vrot.slane %v5533_v16, %v6171_v49 }
0x35f6   :  { %v3726_v27 = vmul.f32 %v5531_v3, %v3722_v25  ;;  %v3725_v8 = vmul.f32 %v5529_v0, %v3718_v39 }
0x35f8   :  { %3734 = vperm.xlu0 %5400, %v3726_v27   ;;  %3729 = vperm.xlu1 %5401, %v3725_v8   ;;  %v4336_v8 = vld [vmem:[#allocation3] sm:$0xff] }
0x35fc   :  { %3753 = vrot.lane.b32.xlu0 %v3606_v30, %s5780_s10 }
0x3673   :  { %v3735_v43 = vpop.permute.xlu0 %3734  ;;  %v3730_v6 = vpop.permute.xlu1 %3729 }
0x3674   :  { %v3738_v63 = vmul.f32 %v6634_v42, %v3735_v43  ;;  %v3737_v13 = vmul.f32 %v6631_v37, %v3730_v6 }
0x3676   :  { %v3746_v40 = vsel %vm303_vm4, %v3738_v63, 0.0  ;;  %v3739_v12 = vsel %vm303_vm4, %v3737_v13, 0.0 }
0x3677   :  { %v3747_v22 = vrot.slane %v3746_v40, 4  ;;  %v3740_v11 = vrot.slane %v3739_v12, 4  ;;  %v3754_v24 = vpop.permute.xlu0 %3753 }
0x3678   :  { %3757 = vst.msk [vmem:[#allocation3 + $0xa] sm:$0x3] %vm897_vm8, %v3754_v24  ;;  %5335 = vmatmul.mubr.msk.f32.vlgmr.msra.gmra.mxu1 %vm303_vm4, %v3754_v24 }
0x3679   :  { %v3748_v10 = vadd.f32 %v3747_v22, %v3746_v40  ;;  %v3741_v30 = vadd.f32 %v3740_v11, %v3739_v12  ;;  %5356 = vmatprep.mubr.msk.f32.mxu1 %vm303_vm4, %v4338_v31 }
0x367b   :  { %v3749_v33 = vrot.slane %v3748_v10, 2  ;;  %v3742_v42 = vrot.slane %v3741_v30, 2 }
0x367d   :  { %v3750_v52 = vadd.f32 %v3749_v33, %v3748_v10  ;;  %v3743_v37 = vadd.f32 %v3742_v42, %v3741_v30 }
0x367f   :  { %v3751_v26 = vrot.slane %v3750_v52, 1  ;;  %v3744_v54 = vrot.slane %v3743_v37, 1 }
0x3681   :  { %v3752_v48 = vadd.f32 %v3751_v26, %v3750_v52  ;;  %v3745_v15 = vadd.f32 %v3744_v54, %v3743_v37 }
0x3683   :  { %v3760_v21 = vsel %vm809_vm6, %v3752_v48, %v3745_v15 }
0x3684   :  { %3763 = vst.msk [vmem:[#allocation4 + $0xa] sm:$0x3] %vm897_vm8, %v3760_v21  ;;  %5302 = vmatmul.mubr.msk.f32.vlgmr.msra.gmra.mxu0 %vm303_vm4, %v3760_v21 }
0x3685   :  { %5316 = vmatpush3.msra.mxu0 %v5592_v29  ;;  %5323 = vmatprep.mubr.msk.f32.mxu0 %vm5787_vm3, %v5786_v1 }
0x3686   :  { %5317 = vmatprep.subr.mxu0 %v5786_v1 }
0x3687   :  { %5318 = vmatpush3.msra.mxu0 %v5593_v55 }
0x3688   :  { %5319 = vmatprep.subr.mxu0 %v5786_v1 }
0x3689   :  { %5320 = vmatpush3.msra.mxu0 %v5594_v57  ;;  %v6952_v57 = vld [vmem:[#allocation8] sm:$0xff] }
0x368a   :  { %5321 = vmatprep.subr.mxu0 %v5786_v1 }
0x368b   :  { %5322 = vmatpush3.msra.mxu0 %v5595_v2 }
0x368c   :  { %5324 = vmatmul.mubr.msk.f32.vlgmr.msra.gmra.mxu0 %vm303_vm4, %v6817_v7  ;;  %5337 = vmatprep.subr.mxu0 %v5786_v1  ;;  %v5598_v7 = vld [vmem:[%s7009_s9 + $0x8] sm:$0xff] }
0x368d   :  { %5338 = vmatpush3.msra.mxu0 %v5596_v59  ;;  %5345 = vmatprep.mubr.msk.f32.mxu0 %vm5787_vm3, %v5786_v1 }
0x368e   :  { %5339 = vmatprep.subr.mxu0 %v5786_v1 }
0x368f   :  { %5340 = vmatpush3.msra.mxu0 %v5597_v61  ;;  %v6955_v61 = vld [vmem:[#allocation8 + $0x8] sm:$0xff] }
0x3690   :  { %5341 = vmatprep.subr.mxu0 %v5786_v1 }
0x3691   :  { %5342 = vmatpush3.msra.mxu0 %v5598_v7 }
0x3692   :  { %5343 = vmatprep.subr.mxu0 %v5786_v1 }
0x3693   :  { %5344 = vmatpush3.msra.mxu0 %v5599_v56 }
0x3738   :  { %v4075_v32 = vpop.f32.mrf.mxu1 }
0x373a   :  { %v5336_v53 = vpop.f32.mrf.mxu1 }
0x3744   :  { %v3834_v60 = vpop.f32.mrf.mxu0 }
0x3745   :  { %v3908_v44 = vadd.f32 %v6842_v17, %v3834_v60 }
0x3746   :  { %v5303_v35 = vpop.f32.mrf.mxu0 }
0x374c   :  { %v3977_v58 = vpop.f32.mrf.mxu0 }
0x374d   :  { %v3981_v5 = vadd.f32 %v3977_v58, %v3908_v44 }
0x374e   :  { %v5325_v41 = vpop.f32.mrf.mxu0 }
0x374f   :  { %v3982_v0 = vadd.f32 %v5600_v45, %v3981_v5 }
0x3751   :  { %5534 = vtanh.f32 %v3982_v0  ;;  %v4730_v3 = vmul.f32 -1.442695, %v3982_v0 }
0x3753   :  { %5536 = vpow2.f32 %v4730_v3 }
0x375e   :  { %v5535_v1 = vpop.eup %5534 }
0x375f   :  { %3992 = vrot.lane.b32.xlu1 %v5535_v1, %s5788_s15 }
0x3760   :  { %v5537_v28 = vpop.eup %5536 }
0x3761   :  { %v3986_v19 = vadd.f32 1.0, %v5537_v28 }
0x3763   :  { %5538 = vrcp.f32 %v3986_v19 }
0x3770   :  { %v5539_v47 = vpop.eup %5538 }
0x3771   :  { %v3990_v50 = vmul.f32 %v5539_v47, %v6812_v62  ;;  %v5601_v62 = vld [vmem:[%s7011_s11] ss:$0 sm:$0xff] }
0x37d1   :  { %v3993_v51 = vpop.permute.xlu1 %3992 }
0x37d2   :  { %v3995_v17 = vmul.f32 %v5539_v47, %v3993_v51 }
0x37d4   :  { %3997 = vrot.lane.b32.xlu1 %v3995_v17, %s5780_s10 }
0x3846   :  { %v3998_v9 = vpop.permute.xlu1 %3997 }
0x3847   :  { %v4000_v23 = vadd.f32 %v3998_v9, %v3990_v50 }
0x3849   :  { %5540 = vtanh.f32 %v4000_v23 }
0x3856   :  { %v5541_v16 = vpop.eup %5540 }
0x3857   :  { %4003 = vrot.lane.b32.xlu1 %v5541_v16, %s5788_s15 }
0x38c9   :  { %v4004_v25 = vpop.permute.xlu1 %4003 }
0x38ca   :  { %v4006_v39 = vmul.f32 %v5539_v47, %v4004_v25 }
0x38cc   :  { %4080 = vrot.lane.b32.xlu1 %v4006_v39, %s5780_s10 }
0x393e   :  { %v4081_v27 = vpop.permute.xlu1 %4080 }
0x393f   :  { %5346 = vmatmul.mubr.msk.f32.vlgmr.msra.gmra.mxu0 %vm303_vm4, %v4081_v27 }
0x3940   :  { %5367 = vmatprep.mubr.msk.f32.mxu0 %vm303_vm4, %v4336_v8 }
0x39ff   :  { %v4150_v43 = vpop.f32.mrf.mxu0 }
0x3a00   :  { %v4151_v6 = vadd.f32 %v4150_v43, %v4075_v32 }
0x3a01   :  { %v5347_v63 = vpop.f32.mrf.mxu0 }
0x3a02   :  { %v4154_v13 = vadd.f32 %v5601_v62, %v4151_v6 }
0x3a04   :  { %5542 = vtanh.f32 %v4154_v13  ;;  %v4733_v12 = vmul.f32 -1.442695, %v4154_v13  ;;  %v199_v13 = vld [vmem:[#allocation13 + $0x18] sm:$0xff] }
0x3a05   :  { %5359 = vmatprep.subr.mxu0 %v199_v13 }
0x3a06   :  { %5544 = vpow2.f32 %v4733_v12  ;;  %5360 = vmatpush3.msra.mxu0 %v199_v13  ;;  %v196_v12 = vld [vmem:[#allocation13] sm:$0xff] }
0x3a11   :  { %v5543_v40 = vpop.eup %5542 }
0x3a12   :  { %4164 = vrot.lane.b32.xlu0 %v5543_v40, %s5788_s15  ;;  %v197_v40 = vld [vmem:[#allocation13 + $0x8] sm:$0xff] }
0x3a13   :  { %v5545_v22 = vpop.eup %5544 }
0x3a14   :  { %v4158_v11 = vadd.f32 1.0, %v5545_v22  ;;  %v201_v22 = vld [vmem:[#allocation14 + $0x8] sm:$0xff] }
0x3a16   :  { %5546 = vrcp.f32 %v4158_v11  ;;  %v200_v11 = vld [vmem:[#allocation14] sm:$0xff] }
0x3a23   :  { %v5547_v24 = vpop.eup %5546 }
0x3a24   :  { %v4162_v30 = vmul.f32 %v5547_v24, %v6847_v4 }
0x3a84   :  { %v4165_v31 = vpop.permute.xlu0 %4164 }
0x3a85   :  { %v4167_v10 = vmul.f32 %v5547_v24, %v4165_v31 }
0x3a87   :  { %4169 = vrot.lane.b32.xlu1 %v4167_v10, %s5780_s10 }
0x3af9   :  { %v4170_v33 = vpop.permute.xlu1 %4169 }
0x3afa   :  { %v4172_v42 = vadd.f32 %v4170_v33, %v4162_v30 }
0x3afc   :  { %5548 = vtanh.f32 %v4172_v42 }
0x3b09   :  { %v5549_v52 = vpop.eup %5548 }
0x3b0a   :  { %4175 = vrot.lane.b32.xlu0 %v5549_v52, %s5788_s15 }
0x3b7c   :  { %v4176_v37 = vpop.permute.xlu0 %4175 }
0x3b7d   :  { %v6942_v26 = vmul.f32 %v5547_v24, %v4176_v37 }
0x3b7f   :  { %v4186_v54 = vrot.slane %v6942_v26, %v6167_v46 }
0x3b81   :  { %v4187_v48 = vcombine.high %v4186_v54, %v4186_v54  ;;  %v4194_v15 = vrot.slane %v4186_v54, %v6167_v46 }
0x3b83   :  { %v4205_v21 = vrot.slane %v4194_v15, %v6171_v49  ;;  %v4201_v29 = vrot.slane %v4187_v48, %v6167_v46 }
0x3b85   :  { %4210 = vrot.lane.b32.xlu1 %v4205_v21, %s5780_s10  ;;  %v4209_v4 = vrot.slane %v4201_v29, %v6171_v49 }
0x3b87   :  { %4212 = vrot.lane.b32.xlu0 %v4209_v4, %s5780_s10 }
0x3bf7   :  { %v4211_v55 = vpop.permute.xlu1 %4210 }
0x3bf8   :  { %v4216_v2 = vmul.f32 %v6952_v57, %v4211_v55 }
0x3bf9   :  { %v4213_v59 = vpop.permute.xlu0 %4212 }
0x3bfa   :  { %v4217_v7 = vmul.f32 %v6955_v61, %v4213_v59  ;;  %v4218_v56 = vsel %vm303_vm4, %v4216_v2, 0.0 }
0x3bfb   :  { %4219 = vadd.xlane.f32.xlu1 %v4218_v56 }
0x3bfc   :  { %v4221_v46 = vsel %vm303_vm4, %v4217_v7, 0.0 }
0x3bfd   :  { %4222 = vadd.xlane.f32.xlu0 %v4221_v46  ;;  %v161_v46 = vld [vmem:[#allocation16 + $0x18] sm:$0xff] }
0x3c84   :  { %v4220_v32 = vpop.xlane.xlu1 %4219 }
0x3c85   :  { %v4224_v53 = vadd.f32 %v4220_v32, %v6196_v36  ;;  %v160_v32 = vld [vmem:[#allocation16 + $0x10] sm:$0xff] }
0x3c86   :  { %v4223_v60 = vpop.xlane.xlu0 %4222 }
0x3c87   :  { %v4225_v35 = vadd.f32 %v4223_v60, %v6193_v34  ;;  %4229 = vperm.xlu0 %5400, %v4224_v53   ;;  %v158_v60 = vld [vmem:[#allocation16] sm:$0xff] }
0x3c89   :  { %4232 = vperm.xlu1 %5401, %v4225_v35  }
0x3d02   :  { %v4230_v44 = vpop.permute.xlu0 %4229 }
0x3d03   :  { %v4237_v5 = vrot.slane %v4230_v44, %v6200_v38 }
0x3d04   :  { %v4233_v58 = vpop.permute.xlu1 %4232 }
0x3d05   :  { %v4241_v41 = vrot.slane %v4233_v58, %v6200_v38  ;;  %v4738_v58 = vld [vmem:[%s7014_s14] ss:$0 sm:$0xff]  ;;  %s5790_s14 = smov [#allocation17]  }
0x3d06   :  { %s4668_s15 = sshll.u32 %s5790_s14, 4  ;;  %s4669_s15 = int_to_ptr.vmem [resolvable:$true] %s4668_s15 }
0x3d07   :  { %v4242_v45 = vsel %vm809_vm6, %v4241_v41, %v4237_v5  ;;  %s5744_s29 = scalar_lea.vmem %s4669_s15, 16  ;;  %s5748_s6 = scalar_lea.vmem %s4669_s15, 32 }
0x3d08   :  { %v4244_v0 = vsel %vm812_vm7, %v4242_v45, -inf  ;;  %p5745_p7 = scmp.ne.s32.totalorder %s4669_s15, %s5744_s29  ;;  %p5749_p8 = scmp.lt.s32.totalorder %s4669_s15, %s4669_s15 }
0x3d09   :  { %4245 = vmax.xlane.f32.xlu1 %v4244_v0  ;;  %p5750_p9 = scmp.lt.s32.totalorder %s5748_s6, %s5744_s29 }
0x3d0b   :  { %p5751_p10 = por %p5750_p9, %p5749_p8 }
0x3d0d   :  { %p5752_p11 = pnand %p5751_p10, %p5745_p7 }
0x3d92   :  { %v4246_v1 = vpop.xlane.xlu1 %4245 }
0x3d93   :  { %v4251_v3 = vrot.slane %v4246_v1, %v6171_v49  ;;  %v4255_v36 = vrot.slane %v4246_v1, %v6189_v14 }
0x3d95   :  { %v4258_v28 = vsub.f32 %v4224_v53, %v4251_v3  ;;  %v4259_v34 = vsub.f32 %v4225_v35, %v4255_v36  ;;  %v159_v53 = vld [vmem:[#allocation16 + $0x8] sm:$0xff] }
0x3d97   :  { %v4260_v19 = vmul.f32 1.442695, %v4258_v28  ;;  %v4262_v47 = vmul.f32 1.442695, %v4259_v34 }
0x3d99   :  { %5550 = vpow2.f32 %v4260_v19 }
0x3d9a   :  { %5552 = vpow2.f32 %v4262_v47 }
0x3da6   :  { %v5551_v51 = vpop.eup %5550 }
0x3da7   :  { %4267 = vperm.xlu0 %5400, %v5551_v51   ;;  %v5553_v17 = vpop.eup %5552 }
0x3dab   :  { %4270 = vperm.xlu0 %5400, %v5553_v17  }
0x3e22   :  { %v4268_v50 = vpop.permute.xlu0 %4267 }
0x3e23   :  { %v4275_v23 = vrot.slane %v4268_v50, %v6200_v38 }
0x3e26   :  { %v4271_v9 = vpop.permute.xlu0 %4270 }
0x3e27   :  { %v4279_v16 = vrot.slane %v4271_v9, %v6200_v38  ;;  %v198_v38 = vld [vmem:[#allocation13 + $0x10] sm:$0xff] }
0x3e28   :  { %5361 = vmatprep.subr.mxu0 %v198_v38 }
0x3e29   :  { %v4280_v25 = vsel %vm809_vm6, %v4279_v16, %v4275_v23  ;;  %5362 = vmatpush3.msra.mxu0 %v198_v38 }
0x3e2a   :  { %v4282_v39 = vsel %vm812_vm7, %v4280_v25, 0.0  ;;  %5363 = vmatprep.subr.mxu0 %v197_v40 }
0x3e2b   :  { %4283 = vadd.xlane.f32.xlu0 %v4282_v39  ;;  %5364 = vmatpush3.msra.mxu0 %v197_v40 }
0x3e2c   :  { %5365 = vmatprep.subr.mxu0 %v196_v12 }
0x3e2d   :  { %5366 = vmatpush3.msra.mxu0 %v196_v12 }
0x3eb4   :  { %v4284_v27 = vpop.xlane.xlu0 %4283 }
0x3eb5   :  { %5554 = vrcp.f32 %v4284_v27 }
0x3ec2   :  { %v5555_v8 = vpop.eup %5554 }
0x3ec3   :  { %v4294_v43 = vrot.slane %v5555_v8, %v6189_v14  ;;  %v4290_v6 = vrot.slane %v5555_v8, %v6171_v49  ;;  %v203_v49 = vld [vmem:[#allocation14 + $0x18] sm:$0xff]  ;;  %v202_v14 = vld [vmem:[#allocation14 + $0x10] sm:$0xff] }
0x3ec4   :  { %5348 = vmatprep.subr.mxu1 %v203_v49 }
0x3ec5   :  { %v4298_v63 = vmul.f32 %v5553_v17, %v4294_v43  ;;  %v4297_v62 = vmul.f32 %v5551_v51, %v4290_v6  ;;  %5349 = vmatpush3.msra.mxu1 %v203_v49 }
0x3ec6   :  { %5350 = vmatprep.subr.mxu1 %v202_v14 }
0x3ec7   :  { %4306 = vperm.xlu0 %5400, %v4298_v63   ;;  %4301 = vperm.xlu1 %5401, %v4297_v62  }
0x3ec8   :  { %5351 = vmatpush3.msra.mxu1 %v202_v14 }
0x3ec9   :  { %5352 = vmatprep.subr.mxu1 %v201_v22 }
0x3eca   :  { %5353 = vmatpush3.msra.mxu1 %v201_v22 }
0x3ecb   :  { %4325 = vrot.lane.b32.xlu1 %v6942_v26, %s5780_s10  ;;  %5354 = vmatprep.subr.mxu1 %v200_v11 }
0x3ecc   :  { %5355 = vmatpush3.msra.mxu1 %v200_v11 }
0x3ecd   :  { %5370 = vmatprep.subr.mxu1 %v161_v46 }
0x3f42   :  { %v4307_v24 = vpop.permute.xlu0 %4306  ;;  %v4302_v31 = vpop.permute.xlu1 %4301 }
0x3f43   :  { %v4310_v10 = vmul.f32 %v6955_v61, %v4307_v24  ;;  %v4309_v30 = vmul.f32 %v6952_v57, %v4302_v31 }
0x3f45   :  { %v4318_v33 = vsel %vm303_vm4, %v4310_v10, 0.0  ;;  %v4311_v42 = vsel %vm303_vm4, %v4309_v30, 0.0 }
0x3f46   :  { %v4319_v52 = vrot.slane %v4318_v33, 4  ;;  %v4312_v37 = vrot.slane %v4311_v42, 4  ;;  %v4326_v26 = vpop.permute.xlu1 %4325 }
0x3f47   :  { %4329 = vst.msk [vmem:[#allocation3 + $0xc] sm:$0x3] %vm897_vm8, %v4326_v26 }
0x3f48   :  { %v4320_v54 = vadd.f32 %v4319_v52, %v4318_v33  ;;  %v4313_v48 = vadd.f32 %v4312_v37, %v4311_v42 }
0x3f4a   :  { %v4321_v15 = vrot.slane %v4320_v54, 2  ;;  %v4314_v21 = vrot.slane %v4313_v48, 2 }
0x3f4c   :  { %v4322_v29 = vadd.f32 %v4321_v15, %v4320_v54  ;;  %v4315_v4 = vadd.f32 %v4314_v21, %v4313_v48 }
0x3f4e   :  { %v4323_v55 = vrot.slane %v4322_v29, 1  ;;  %v4316_v2 = vrot.slane %v4315_v4, 1  ;;  %v4337_v59 = vld [vmem:[#allocation3 + $0x8] sm:$0x3f] }
0x3f4f   :  { %5368 = vmatmul.mubr.msk.f32.vlgmr.msra.gmra.mxu0 %vm303_vm4, %v4337_v59 }
0x3f50   :  { %v4324_v57 = vadd.f32 %v4323_v55, %v4322_v29  ;;  %v4317_v61 = vadd.f32 %v4316_v2, %v4315_v4 }
0x3f52   :  { %v4332_v7 = vsel %vm809_vm6, %v4324_v57, %v4317_v61 }
0x3f53   :  { %4335 = vst.msk [vmem:[#allocation4 + $0xc] sm:$0x3] %vm897_vm8, %v4332_v7 }
0x3f5a   :  { %v4339_v56 = vld [vmem:[#allocation4 + $0x8] sm:$0x3f] }
0x3f5b   :  { %5357 = vmatmul.mubr.msk.f32.vlgmr.msra.gmra.mxu1 %vm303_vm4, %v4339_v56 }
0x3f5c   :  { %5371 = vmatpush3.msra.mxu1 %v161_v46 }
0x3f5d   :  { %5372 = vmatprep.subr.mxu1 %v160_v32 }
0x3f5e   :  { %5373 = vmatpush3.msra.mxu1 %v160_v32 }
0x3f5f   :  { %5374 = vmatprep.subr.mxu1 %v159_v53 }
0x3f60   :  { %5375 = vmatpush3.msra.mxu1 %v159_v53 }
0x3f61   :  { %5376 = vmatprep.subr.mxu1 %v158_v60 }
0x3f62   :  { %5377 = vmatpush3.msra.mxu1 %v158_v60 }
0x400f   :  { %v5369_v35 = vpop.f32.mrf.mxu0 }
0x4011   :  { %v4493_v41 = vpop.f32.mrf.mxu0 }
0x401b   :  { %v5358_v44 = vpop.f32.mrf.mxu1 }
0x401c   :  { %v4499_v5 = vadd.f32 %v5369_v35, %v5358_v44 }
0x401d   :  { %v4412_v45 = vpop.f32.mrf.mxu1 }
0x401e   :  { %v4494_v0 = vadd.f32 %v4493_v41, %v4412_v45  ;;  %v4509_v1 = vadd.f32 %v4738_v58, %v4499_v5 }
0x4020   :  { %v4508_v3 = vadd.f32 %v4738_v58, %v4494_v0 }
0x4022   :  { %5556 = vtanh.f32 %v4508_v3 }
0x4023   :  { %5558 = vtanh.f32 %v4509_v1 }
0x402f   :  { %v5557_v36 = vpop.eup %5556 }
0x4030   :  { %v5559_v28 = vpop.eup %5558  ;;  %5378 = vmatprep.mubr.msk.f32.mxu1 %vm303_vm4, %v5557_v36 }
0x4031   :  { %5379 = vmatmul.mubr.msk.f32.vlgmr.msra.gmra.mxu1 %vm303_vm4, %v5559_v28 }
0x40f1   :  { %v5380_v34 = vpop.f32.mrf.mxu1 }
0x40f2   :  { %v4597_v19 = vsel %vm4596_vm9, %v5380_v34, -inf  ;;  %v4622_v27 = vrot.slane %v5380_v34, 6 }
0x40f3   :  { %4598 = vmax.xlane.f32.xlu0 %v4597_v19  ;;  %v4584_v47 = vpop.f32.mrf.mxu1 }
0x40f4   :  { %v4593_v51 = vsel %vm221_vm0, %v4584_v47, -inf  ;;  %v4621_v39 = vrot.slane %v4584_v47, 6 }
0x40f5   :  { %4594 = vmax.xlane.f32.xlu1 %v4593_v51 }
0x40f6   :  { %v4623_v8 = vsel %vm4620_vm10, %v4621_v39, %v4622_v27  ;;  %v4626_v38 = vmul.f32 %v5972_v18, %v4621_v39 }
0x40f7   :  { %v4627_v63 = vmul.f32 %v5978_v20, %v4623_v8 }
0x40f8   :  { %v4629_v12 = vsel %vm4628_vm11, %v4626_v38, 0.0 }
0x40f9   :  { %v4632_v40 = vsel %vm221_vm0, %v4627_v63, 0.0 }
0x417c   :  { %v4599_v17 = vpop.xlane.xlu0 %4598 }
0x417d   :  { %v4601_v50 = vsub.f32 %v5380_v34, %v4599_v17 }
0x417e   :  { %v4595_v9 = vpop.xlane.xlu1 %4594 }
0x417f   :  { %v4604_v23 = vmul.f32 1.442695, %v4601_v50  ;;  %v4600_v16 = vsub.f32 %v4584_v47, %v4595_v9 }
0x4181   :  { %5560 = vpow2.f32 %v4604_v23  ;;  %v4602_v25 = vmul.f32 1.442695, %v4600_v16 }
0x4183   :  { %5562 = vpow2.f32 %v4602_v25 }
0x418e   :  { %v5561_v43 = vpop.eup %5560 }
0x418f   :  { %v4609_v6 = vsel %vm4596_vm9, %v5561_v43, 0.0 }
0x4190   :  { %v5563_v62 = vpop.eup %5562  ;;  %4610 = vadd.xlane.f32.xlu0 %v4609_v6 }
0x4191   :  { %v4606_v13 = vsel %vm221_vm0, %v5563_v62, 0.0 }
0x4192   :  { %4607 = vadd.xlane.f32.xlu1 %v4606_v13 }
0x4194   :  { %4633 = vadd.xlane.f32.xlu0 %v4632_v40 }
0x4196   :  { %4630 = vadd.xlane.f32.xlu1 %v4629_v12 }
0x4219   :  { %v4611_v49 = vpop.xlane.xlu0 %4610 }
0x421a   :  { %5564 = vlog2.f32 %v4611_v49 }
0x421b   :  { %v4608_v14 = vpop.xlane.xlu1 %4607 }
0x421c   :  { %5566 = vlog2.f32 %v4608_v14 }
0x421d   :  { %v4634_v20 = vpop.xlane.xlu0 %4633 }
0x421e   :  { %v4639_v18 = vrot.slane %v4634_v20, 2 }
0x421f   :  { %v4631_v22 = vpop.xlane.xlu1 %4630 }
0x4220   :  { %v4638_v10 = vrot.slane %v4631_v22, 2 }
0x4222   :  { %v4640_v37 = vsel %vm4637_vm12, %v4638_v10, %v4639_v18 }
0x4227   :  { %v5565_v11 = vpop.eup %5564 }
0x4228   :  { %v4615_v24 = vmul.f32 0.6931472, %v5565_v11 }
0x4229   :  { %v5567_v31 = vpop.eup %5566 }
0x422a   :  { %v4613_v30 = vmul.f32 0.6931472, %v5567_v31  ;;  %v4617_v33 = vadd.f32 %v4615_v24, %v4599_v17 }
0x422c   :  { %v4616_v42 = vadd.f32 %v4613_v30, %v4595_v9  ;;  %v4644_v52 = vsub.f32 %v4617_v33, %v4639_v18 }
0x422e   :  { %v4643_v26 = vsub.f32 %v4616_v42, %v4640_v37  ;;  %v4648_v54 = vsel %vm4647_vm13, %v4644_v52, 0.0 }
0x4230   :  { %v4646_v48 = vsel %vm4645_vm14, %v4643_v26, 0.0 }
0x4231   :  { %v4649_v15 = vadd.f32 %v4648_v54, %v4646_v48 }
0x4233   :  { %4650 = vadd.xlane.f32.xlu1 %v4649_v15 }
0x42bc   :  { %v4651_v21 = vpop.xlane.xlu1 %4650 }
0x42bd   :  { %v4652_v29 = vrot.slane %v4651_v21, 4 }
0x42bf   :  { %v4653_v4 = vadd.f32 %v4652_v29, %v4651_v21 }
0x42c1   :  { %v4654_v55 = vrot.slane %v4653_v4, 2 }
0x42c3   :  { %v4655_v2 = vadd.f32 %v4654_v55, %v4653_v4 }
0x42c5   :  { %v4656_v59 = vrot.slane %v4655_v2, 1 }
0x42c7   :  { %v4657_v57 = vadd.f32 %v4656_v59, %v4655_v2 }
0x42c9   :  { %5381 = vpush %v4657_v57 }
0x42fa   :  { %s5382_s28 = spop %5381 }
0x42fb   :  { %v4659_v61 = vstv %s5382_s28 }
0x42fc   :  { %4661 = vst.msk [vmem:[#allocation17] sm:$0x1] %vm4660_vm15, %v4659_v61 }
0x42fd   :  { %5755 = shalt.err (!%p5752_p11)
}
0x42fe   :  { %4671 = dma.vmem_to_hbm [thread:$0]  %s4669_s15, 16, %s7016_s16, [#allocation7]  }
0x42ff   :  { %5772 = dma.done.wait [#allocation7], 16  }
0x4300   :  { %5773 = vsyncadd [#allocation7], 4294967280 }
0x4301   :  { %4675 = vsyncpa [#allocation6], 1 }
0x4302   :  { %4676 = vsyncpa [#allocation9], 1 }
0x4303   :  { %4677 = vsyncpa [#allocation12], 1 }
0x4304   :  { %4678 = vsyncpa [#allocation15], 1 }
0x4305   :  { %4679 = vsyncpa [#allocation7], 1 }

</bundles_post_ra>
